<compile_context>
chip_gen: v7x
topology: tpu7x:2x2x1
jax: 0.10.0
libtpu: 0.0.40
codegen_flags: <defaults>
</compile_context>

<pallas_src>
import functools
import math

import numpy as np

import jax
import jax.numpy as jnp
from jax.experimental import pallas as pl
from jax.experimental.pallas import tpu as pltpu

# LeNet geometry constants.
CONV1_OUT, CONV2_OUT, FC1_OUT = 20, 50, 500
BN_EPS = 1e-5


# ----------------------------------------------------------------------------
# small helpers
# ----------------------------------------------------------------------------
def _round_up(x, m):
    return ((x + m - 1) // m) * m


def _cdiv(a, b):
    return -(-a // b)


def _block_bytes(shape, itemsize):
    # VMEM layout pads sublanes to 8 and lanes to 128.
    s = list(shape)
    s[-1] = _round_up(s[-1], 128)
    if len(s) >= 2:
        s[-2] = _round_up(s[-2], 8)
    n = 1
    for d in s:
        n *= d
    return n * itemsize


def _kaiming_padded(key, fan_in, valid_shape, padded_shape):
    # kaiming_normal_ (fan_in, relu gain), zero-padded to lane-dense shapes.
    w = math.sqrt(2.0 / fan_in) * jax.random.normal(key, valid_shape, dtype=jnp.float32)
    wp = jnp.zeros(padded_shape, jnp.float32)
    return wp.at[: valid_shape[0], : valid_shape[1]].set(w)


# ----------------------------------------------------------------------------
# fused LeNet forward kernel
# ----------------------------------------------------------------------------
def _make_lenet_kernel(num_hidden, num_classes):
    """One fused kernel: conv1+pool+relu, conv2+pool+relu, fc1, hidden FCs, logits,
    softmax / log_softmax.  All intermediates live in VMEM/vregs."""
    n_in = 9 + 2 * num_hidden

    def kernel(*refs):
        (x_ref, B1_ref, b1_ref, B2_ref, b2_ref, W1_ref, bfc1_ref) = refs[:7]
        hidden_refs = refs[7:7 + 2 * num_hidden]
        WL_ref = refs[7 + 2 * num_hidden]
        bL_ref = refs[8 + 2 * num_hidden]
        feat_o = refs[n_in]
        hidden_o = [refs[n_in + 1 + k] for k in range(num_hidden)]
        logits_o = refs[n_in + 1 + num_hidden]
        probs_o = refs[n_in + 2 + num_hidden]
        logp_o = refs[n_in + 3 + num_hidden]

        f32 = jnp.float32
        TB = x_ref.shape[1] // 7          # images per grid step

        X = x_ref[...]                    # (4, 7*TB, 28) bf16; row a*TB+t == image row 4a+m of sample t
        B1 = B1_ref[...]                  # (5, 28, 512)  bf16; col = dx*256 + pw*20 + co
        B2 = B2_ref[...]                  # (5, 240, 512) bf16; col = dx*256 + qw*50 + co
        b1 = b1_ref[...]                  # (1, 240) f32
        b2 = b2_ref[...]                  # (1, 200) f32

        # slabs[K]: image rows 4u+K for u = 0..5, flattened to (6*TB, 28), row = u*TB + t
        slabs = [X[K % 4, (K // 4) * TB:(K // 4 + 6) * TB, :] for K in range(8)]
        # pairs[j]: pooling-row corner dy=0 (rows 4u+j) stacked over dy=1 (rows 4u+j+1)
        pairs = [jnp.concatenate([slabs[j], slabs[j + 1]], axis=0) for j in range(7)]

        # ---- conv1 (5x5, 1->20) + 2x2 max-pool + bias + ReLU -------------------
        def conv1_half(R):
            # pooled output rows ph = 2u + R//2; returns (6*TB, 240) bf16
            s = None
            for i in range(5):
                t = jnp.dot(pairs[R + i], B1[i], preferred_element_type=f32)   # (12*TB, 512)
                s = t if s is None else s + t
            six = 6 * TB
            corners = (s[:six, 0:240], s[:six, 256:496],
                       s[six:, 0:240], s[six:, 256:496])
            acc = corners[0]
            for c in corners[1:]:
                acc = jnp.maximum(acc, c)
            return jnp.maximum(acc + b1, 0.0).astype(jnp.bfloat16)

        h1e = conv1_half(0)               # h1 rows ph = 0, 2, ..., 10  (row = u*TB + t)
        h1o = conv1_half(2)               # h1 rows ph = 1, 3, ..., 11

        # ---- conv2 (5x5, 20->50) + 2x2 max-pool + bias + ReLU ------------------
        slab2 = []
        for L in range(6):                # h1 row ph = 2*qh + L, qh = 0..3
            src = h1e if L % 2 == 0 else h1o
            u0 = L // 2
            slab2.append(src[u0 * TB:(u0 + 4) * TB, :])        # (4*TB, 240)
        pairs2 = [jnp.concatenate([slab2[i], slab2[i + 1]], axis=0) for i in range(5)]
        s = None
        for i in range(5):
            t = jnp.dot(pairs2[i], B2[i], preferred_element_type=f32)          # (8*TB, 512)
            s = t if s is None else s + t
        four = 4 * TB
        corners = (s[:four, 0:200], s[:four, 256:456],
                   s[four:, 0:200], s[four:, 256:456])
        acc = corners[0]
        for c in corners[1:]:
            acc = jnp.maximum(acc, c)
        h2 = jnp.maximum(acc + b2, 0.0).astype(jnp.bfloat16)   # (4*TB, 200), row = qh*TB + t

        # ---- fc1 over flatten(qh, qw, co): 800 -> 500 (padded 512) -------------
        W1 = W1_ref[...]                                       # (4, 200, 512) bf16
        feat = None
        for q in range(4):
            t = jnp.dot(h2[q * TB:(q + 1) * TB, :], W1[q], preferred_element_type=f32)
            feat = t if feat is None else feat + t
        feat = feat + bfc1_ref[...]
        feat_o[...] = feat

        # TODO(synk): dropout is identity; BN eval-scale is folded into the weights.
        h = feat.astype(jnp.bfloat16)
        for k in range(num_hidden):
            w_r, b_r = hidden_refs[2 * k], hidden_refs[2 * k + 1]
            hk = jnp.dot(h, w_r[...], preferred_element_type=f32) + b_r[...]
            hk = jnp.maximum(hk, 0.0)
            hidden_o[k][...] = hk
            h = hk.astype(jnp.bfloat16)

        logits = jnp.dot(h, WL_ref[...], preferred_element_type=f32) + bL_ref[...]
        logits_o[...] = logits

        # softmax / log_softmax over valid classes only (padded lanes -> -inf)
        lane = jax.lax.broadcasted_iota(jnp.int32, logits.shape, 1)
        valid = lane < num_classes
        z = jnp.where(valid, logits, -jnp.inf)
        m = jnp.max(z, axis=1, keepdims=True)
        e = jnp.where(valid, jnp.exp(z - m), 0.0)
        denom = jnp.sum(e, axis=1, keepdims=True)
        probs_o[...] = e * pl.reciprocal(denom, approx=True)
        logp_o[...] = jnp.where(valid, (z - m) - jnp.log(denom), 0.0)

    return kernel


# ----------------------------------------------------------------------------
# parameter init (logical / PyTorch-equivalent weights) + packing for the kernel
# ----------------------------------------------------------------------------
def init_params(key, num_classes=10, fc_hidden_dims=(64,)):
    ks = jax.random.split(key, 4 + len(fc_hidden_dims))
    f1p = _round_up(FC1_OUT, 128)        # 512
    cls_p = _round_up(num_classes, 128)  # 128

    params = {
        "conv1_w": math.sqrt(2.0 / 25.0)
        * jax.random.normal(ks[0], (5, 5, CONV1_OUT), jnp.float32),
        "conv1_b": jnp.zeros((CONV1_OUT,), jnp.float32),
        "conv2_w": math.sqrt(2.0 / (25.0 * CONV1_OUT))
        * jax.random.normal(ks[1], (5, 5, CONV1_OUT, CONV2_OUT), jnp.float32),
        "conv2_b": jnp.zeros((CONV2_OUT,), jnp.float32),
        # fc1 rows ordered as flatten(qh, qw, co); cols padded 500 -> 512
        "fc1_w": _kaiming_padded(ks[2], 16 * CONV2_OUT,
                                 (16 * CONV2_OUT, FC1_OUT), (16 * CONV2_OUT, f1p)),
        "fc1_b": jnp.zeros((f1p,), jnp.float32),
    }

    # Hidden FC layers: BN eval-scale 1/sqrt(1+eps) folded into W (bias is 0).
    bn_scale = 1.0 / math.sqrt(1.0 + BN_EPS)
    in_valid, in_pad = FC1_OUT, f1p
    hidden = []
    for k, out_dim in enumerate(fc_hidden_dims):
        out_pad = _round_up(out_dim, 128)
        w = _kaiming_padded(ks[3 + k], in_valid, (in_valid, out_dim), (in_pad, out_pad))
        hidden.append((w * bn_scale, jnp.zeros((out_pad,), jnp.float32)))
        in_valid, in_pad = out_dim, out_pad
    params["fc_hidden"] = hidden
    params["logits_w"] = _kaiming_padded(ks[-1], in_valid, (in_valid, num_classes),
                                         (in_pad, cls_p))
    params["logits_b"] = jnp.zeros((cls_p,), jnp.float32)
    return params


def pack_params(p):
    """Build the MXU-friendly 'lowered' conv weights and bf16 FC weights."""
    w1, b1 = p["conv1_w"], p["conv1_b"]          # (5,5,20), (20,)
    w2, b2 = p["conv2_w"], p["conv2_b"]          # (5,5,20,50), (50,)

    # conv1: B1[i, w, dx*256 + pw*20 + co] = w1[i, w-(2*pw+dx), co]
    sel1 = np.zeros((28, 12, 2, 5), np.float32)
    for pw in range(12):
        for dx in range(2):
            for j in range(5):
                sel1[2 * pw + dx + j, pw, dx, j] = 1.0
    B1 = jnp.einsum("wpdj,ijc->iwdpc", jnp.asarray(sel1), w1)        # (5,28,2,12,20)
    B1 = B1.reshape(5, 28, 2, 240)
    B1 = jnp.pad(B1, ((0, 0), (0, 0), (0, 0), (0, 16))).reshape(5, 28, 512)

    # conv2: B2[i, pw*20 + c, dx*256 + qw*50 + co] = w2[i, pw-(2*qw+dx), c, co]
    sel2 = np.zeros((12, 4, 2, 5), np.float32)
    for qw in range(4):
        for dx in range(2):
            for j in range(5):
                sel2[2 * qw + dx + j, qw, dx, j] = 1.0
    B2 = jnp.einsum("pqdj,ijcn->ipcdqn", jnp.asarray(sel2), w2)      # (5,12,20,2,4,50)
    B2 = B2.reshape(5, 240, 2, 200)
    B2 = jnp.pad(B2, ((0, 0), (0, 0), (0, 0), (0, 56))).reshape(5, 240, 512)

    return {
        "B1": B1.astype(jnp.bfloat16),
        "b1": jnp.tile(b1, 12).reshape(1, 240).astype(jnp.float32),
        "B2": B2.astype(jnp.bfloat16),
        "b2": jnp.tile(b2, 4).reshape(1, 200).astype(jnp.float32),
        "W1": p["fc1_w"].reshape(4, 200, -1).astype(jnp.bfloat16),
        "bfc1": p["fc1_b"].reshape(1, -1).astype(jnp.float32),
        "hidden": [(w.astype(jnp.bfloat16), b.reshape(1, -1).astype(jnp.float32))
                   for (w, b) in p["fc_hidden"]],
        "WL": p["logits_w"].astype(jnp.bfloat16),
        "bL": p["logits_b"].reshape(1, -1).astype(jnp.float32),
    }


# ----------------------------------------------------------------------------
# forward wrapper (single fused pallas_call)
# ----------------------------------------------------------------------------
def lenet_forward(kp, x_nchw, *, num_classes=10, fc_hidden_dims=(64,), tb=128):
    N = x_nchw.shape[0]
    assert x_nchw.shape[1:] == (1, 28, 28), "LeNetEncoder expects 1x28x28 inputs"
    num_hidden = len(fc_hidden_dims)

    # Batch tiling: multiple of 8 rows, >= 2 grid steps so both v7x TCs get work.
    TB = int(min(tb, max(8, _round_up(_cdiv(N, 2), 8))))
    num_blocks = max(2, _cdiv(N, TB))
    N_pad = num_blocks * TB

    # Host-side prep: only a row permutation (rows grouped by index mod 4) so the
    # kernel's patch slabs are contiguous 2-D slices.  Same byte count as the input.
    x2 = x_nchw[:, 0].astype(jnp.float32)
    if N_pad != N:
        x2 = jnp.pad(x2, ((0, N_pad - N), (0, 0), (0, 0)))
    xq = (x2.reshape(num_blocks, TB, 7, 4, 28)
             .transpose(3, 0, 2, 1, 4)
             .reshape(4, num_blocks * 7 * TB, 28)
             .astype(jnp.bfloat16))

    ins = [xq, kp["B1"], kp["b1"], kp["B2"], kp["b2"], kp["W1"], kp["bfc1"]]
    for (w, b) in kp["hidden"]:
        ins += [w, b]
    ins += [kp["WL"], kp["bL"]]

    def _const_spec(arr):
        nd = arr.ndim
        return pl.BlockSpec(arr.shape, lambda b, _nd=nd: (0,) * _nd)

    in_specs = [pl.BlockSpec((4, 7 * TB, 28), lambda b: (0, b, 0))]
    in_specs += [_const_spec(a) for a in ins[1:]]

    f1p = kp["W1"].shape[-1]             # 512
    cls_p = kp["WL"].shape[-1]           # 128
    hid_p = [w.shape[-1] for (w, _) in kp["hidden"]]

    out_shape = [jax.ShapeDtypeStruct((N_pad, f1p), jnp.float32)]
    out_specs = [pl.BlockSpec((TB, f1p), lambda b: (b, 0))]
    for hp_ in hid_p:
        out_shape.append(jax.ShapeDtypeStruct((N_pad, hp_), jnp.float32))
        out_specs.append(pl.BlockSpec((TB, hp_), lambda b: (b, 0)))
    for _ in range(3):                   # logits, probs, log_probs
        out_shape.append(jax.ShapeDtypeStruct((N_pad, cls_p), jnp.float32))
        out_specs.append(pl.BlockSpec((TB, cls_p), lambda b: (b, 0)))

    # Explicit scoped-VMEM limit from block-buffer math + intermediate allowance.
    blocks = _block_bytes((4, 7 * TB, 28), 2)
    for a in ins[1:]:
        blocks += _block_bytes(a.shape, a.dtype.itemsize)
    for s in out_shape:
        blocks += _block_bytes((TB,) + tuple(s.shape[1:]), 4)
    vmem = 2 * blocks + TB * (100 << 10) + (4 << 20)
    vmem = int(min(max(vmem, 32 << 20), 48 << 20))

    outs = pl.pallas_call(
        _make_lenet_kernel(num_hidden, num_classes),
        out_shape=tuple(out_shape),
        grid=(num_blocks,),
        in_specs=in_specs,
        out_specs=tuple(out_specs),
        compiler_params=pltpu.CompilerParams(
            dimension_semantics=("parallel",),
            vmem_limit_bytes=vmem),
    )(*ins)

    res = {"feat": outs[0][:N, :FC1_OUT]}
    for k, d in enumerate(fc_hidden_dims):
        res[str(k)] = outs[1 + k][:N, :d]
    res["logits"] = outs[1 + num_hidden][:N, :num_classes]
    res["probs"] = outs[2 + num_hidden][:N, :num_classes]
    res["log_probs"] = outs[3 + num_hidden][:N, :num_classes]
    return res


# ----------------------------------------------------------------------------
# Pure-JAX reference (lax.conv, same bf16 operands / f32 accumulation)
# ----------------------------------------------------------------------------
def lenet_reference(params, x_nchw, *, num_classes=10, fc_hidden_dims=(64,)):
    N = x_nchw.shape[0]
    x = x_nchw[:, 0].astype(jnp.bfloat16)[..., None]          # (N,28,28,1)

    def conv_pool(inp, w, b):
        y = jax.lax.conv_general_dilated(
            inp.astype(jnp.bfloat16), w.astype(jnp.bfloat16),
            window_strides=(1, 1), padding="VALID",
            dimension_numbers=("NHWC", "HWIO", "NHWC"),
            preferred_element_type=jnp.float32)
        n, hh, ww, c = y.shape
        y = y.reshape(n, hh // 2, 2, ww // 2, 2, c).max(axis=(2, 4))
        return jnp.maximum(y + b, 0.0)

    h1 = conv_pool(x, params["conv1_w"].reshape(5, 5, 1, CONV1_OUT), params["conv1_b"])
    h2 = conv_pool(h1, params["conv2_w"], params["conv2_b"])
    flat = h2.reshape(N, 4 * 4 * CONV2_OUT).astype(jnp.bfloat16)

    feat = jnp.dot(flat, params["fc1_w"].astype(jnp.bfloat16),
                   preferred_element_type=jnp.float32) + params["fc1_b"]
    out = {"feat": feat[:, :FC1_OUT]}
    h = feat.astype(jnp.bfloat16)
    for k, d in enumerate(fc_hidden_dims):
        w, b = params["fc_hidden"][k]
        hk = jnp.maximum(jnp.dot(h, w.astype(jnp.bfloat16),
                                 preferred_element_type=jnp.float32) + b, 0.0)
        out[str(k)] = hk[:, :d]
        h = hk.astype(jnp.bfloat16)
    logits = (jnp.dot(h, params["logits_w"].astype(jnp.bfloat16),
                      preferred_element_type=jnp.float32)
              + params["logits_b"])[:, :num_classes]
    out["logits"] = logits
    out["probs"] = jax.nn.softmax(logits, axis=1)
    out["log_probs"] = jax.nn.log_softmax(logits, axis=1)
    return out


if __name__ == "__main__":
    key = jax.random.PRNGKey(0)
    pkey, xkey = jax.random.split(key)
    num_classes, hidden_dims = 10, (64,)

    params = init_params(pkey, num_classes=num_classes, fc_hidden_dims=hidden_dims)
    kparams = pack_params(params)

    # LeNetEncoder geometry requires 1x28x28 inputs (28->24->12->8->4).
    x = jax.random.normal(xkey, (2, 1, 28, 28), dtype=jnp.float32)

    fwd = jax.jit(functools.partial(lenet_forward, num_classes=num_classes,
                                    fc_hidden_dims=hidden_dims))
    out = fwd(kparams, x)
    jax.block_until_ready(out)

    # shape / normalization sanity checks
    assert out["feat"].shape == (2, 500)
    assert out["0"].shape == (2, 64)
    assert out["logits"].shape == (2, 10)
    assert out["probs"].shape == (2, 10) and out["log_probs"].shape == (2, 10)
    assert bool(jnp.allclose(jnp.sum(out["probs"], axis=1), 1.0, atol=5e-3))

    # numerics vs. pure-JAX / lax.conv reference (same bf16 operands, f32 accumulation)
    ref = jax.jit(functools.partial(lenet_reference, num_classes=num_classes,
                                    fc_hidden_dims=hidden_dims))(params, x)
    jax.block_until_ready(ref)
    for name in ("feat", "0", "logits", "probs", "log_probs"):
        assert bool(jnp.allclose(out[name], ref[name], atol=2e-2, rtol=2e-2)), name

    print("KERNEL_OK")
</pallas_src>

<mosaic_0001>
module attributes {stable_mosaic.version = 11 : i64} {
  func.func @kernel(%arg0: i32, %arg1: memref<4x56x28xbf16, #tpu.memory_space<vmem>>, %arg2: memref<5x28x512xbf16, #tpu.memory_space<vmem>>, %arg3: memref<1x240xf32, #tpu.memory_space<vmem>>, %arg4: memref<5x240x512xbf16, #tpu.memory_space<vmem>>, %arg5: memref<1x200xf32, #tpu.memory_space<vmem>>, %arg6: memref<4x200x512xbf16, #tpu.memory_space<vmem>>, %arg7: memref<1x512xf32, #tpu.memory_space<vmem>>, %arg8: memref<512x128xbf16, #tpu.memory_space<vmem>>, %arg9: memref<1x128xf32, #tpu.memory_space<vmem>>, %arg10: memref<128x128xbf16, #tpu.memory_space<vmem>>, %arg11: memref<1x128xf32, #tpu.memory_space<vmem>>, %arg12: memref<8x512xf32, #tpu.memory_space<vmem>>, %arg13: memref<8x128xf32, #tpu.memory_space<vmem>>, %arg14: memref<8x128xf32, #tpu.memory_space<vmem>>, %arg15: memref<8x128xf32, #tpu.memory_space<vmem>>, %arg16: memref<8x128xf32, #tpu.memory_space<vmem>>) attributes {dimension_semantics = [#tpu.dimension_semantics<parallel>], iteration_bounds = array<i64: 2>, scalar_prefetch = 0 : i64, scratch_operands = 0 : i64, tpu.core_type = #tpu.core_type<tc>, window_params = [{transform_indices = @transform_0, window_bounds = array<i64: 4, 56, 28>}, {pipeline_mode = #tpu.pipeline_mode<synchronous>, transform_indices = @transform_1, window_bounds = array<i64: 5, 28, 512>}, {pipeline_mode = #tpu.pipeline_mode<synchronous>, transform_indices = @transform_2, window_bounds = array<i64: 1, 240>}, {pipeline_mode = #tpu.pipeline_mode<synchronous>, transform_indices = @transform_3, window_bounds = array<i64: 5, 240, 512>}, {pipeline_mode = #tpu.pipeline_mode<synchronous>, transform_indices = @transform_4, window_bounds = array<i64: 1, 200>}, {pipeline_mode = #tpu.pipeline_mode<synchronous>, transform_indices = @transform_5, window_bounds = array<i64: 4, 200, 512>}, {pipeline_mode = #tpu.pipeline_mode<synchronous>, transform_indices = @transform_6, window_bounds = array<i64: 1, 512>}, {pipeline_mode = #tpu.pipeline_mode<synchronous>, transform_indices = @transform_7, window_bounds = array<i64: 512, 128>}, {pipeline_mode = #tpu.pipeline_mode<synchronous>, transform_indices = @transform_8, window_bounds = array<i64: 1, 128>}, {pipeline_mode = #tpu.pipeline_mode<synchronous>, transform_indices = @transform_9, window_bounds = array<i64: 128, 128>}, {pipeline_mode = #tpu.pipeline_mode<synchronous>, transform_indices = @transform_10, window_bounds = array<i64: 1, 128>}, {transform_indices = @transform_11, window_bounds = array<i64: 8, 512>}, {transform_indices = @transform_12, window_bounds = array<i64: 8, 128>}, {transform_indices = @transform_13, window_bounds = array<i64: 8, 128>}, {transform_indices = @transform_14, window_bounds = array<i64: 8, 128>}, {transform_indices = @transform_15, window_bounds = array<i64: 8, 128>}]} {
    %c0 = arith.constant 0 : index
    %c0_0 = arith.constant 0 : index
    %c0_1 = arith.constant 0 : index
    %0 = vector.load %arg1[%c0, %c0_0, %c0_1] : memref<4x56x28xbf16, #tpu.memory_space<vmem>>, vector<4x56x28xbf16>
    %c0_2 = arith.constant 0 : index
    %c0_3 = arith.constant 0 : index
    %c0_4 = arith.constant 0 : index
    %1 = vector.load %arg2[%c0_2, %c0_3, %c0_4] : memref<5x28x512xbf16, #tpu.memory_space<vmem>>, vector<5x28x512xbf16>
    %c0_5 = arith.constant 0 : index
    %c0_6 = arith.constant 0 : index
    %c0_7 = arith.constant 0 : index
    %2 = vector.load %arg4[%c0_5, %c0_6, %c0_7] : memref<5x240x512xbf16, #tpu.memory_space<vmem>>, vector<5x240x512xbf16>
    %c0_8 = arith.constant 0 : index
    %c0_9 = arith.constant 0 : index
    %3 = vector.load %arg3[%c0_8, %c0_9] : memref<1x240xf32, #tpu.memory_space<vmem>>, vector<1x240xf32>
    %c0_10 = arith.constant 0 : index
    %c0_11 = arith.constant 0 : index
    %4 = vector.load %arg5[%c0_10, %c0_11] : memref<1x200xf32, #tpu.memory_space<vmem>>, vector<1x200xf32>
    %5 = vector.extract_strided_slice %0 {offsets = [0, 0, 0], sizes = [1, 48, 28], strides = [1, 1, 1]} : vector<4x56x28xbf16> to vector<1x48x28xbf16>
    %6 = vector.shape_cast %5 : vector<1x48x28xbf16> to vector<48x28xbf16>
    %7 = vector.extract_strided_slice %0 {offsets = [1, 0, 0], sizes = [1, 48, 28], strides = [1, 1, 1]} : vector<4x56x28xbf16> to vector<1x48x28xbf16>
    %8 = vector.shape_cast %7 : vector<1x48x28xbf16> to vector<48x28xbf16>
    %9 = vector.extract_strided_slice %0 {offsets = [2, 0, 0], sizes = [1, 48, 28], strides = [1, 1, 1]} : vector<4x56x28xbf16> to vector<1x48x28xbf16>
    %10 = vector.shape_cast %9 : vector<1x48x28xbf16> to vector<48x28xbf16>
    %11 = vector.extract_strided_slice %0 {offsets = [3, 0, 0], sizes = [1, 48, 28], strides = [1, 1, 1]} : vector<4x56x28xbf16> to vector<1x48x28xbf16>
    %12 = vector.shape_cast %11 : vector<1x48x28xbf16> to vector<48x28xbf16>
    %13 = vector.extract_strided_slice %0 {offsets = [0, 8, 0], sizes = [1, 48, 28], strides = [1, 1, 1]} : vector<4x56x28xbf16> to vector<1x48x28xbf16>
    %14 = vector.shape_cast %13 : vector<1x48x28xbf16> to vector<48x28xbf16>
    %15 = vector.extract_strided_slice %0 {offsets = [1, 8, 0], sizes = [1, 48, 28], strides = [1, 1, 1]} : vector<4x56x28xbf16> to vector<1x48x28xbf16>
    %16 = vector.shape_cast %15 : vector<1x48x28xbf16> to vector<48x28xbf16>
    %17 = vector.extract_strided_slice %0 {offsets = [2, 8, 0], sizes = [1, 48, 28], strides = [1, 1, 1]} : vector<4x56x28xbf16> to vector<1x48x28xbf16>
    %18 = vector.shape_cast %17 : vector<1x48x28xbf16> to vector<48x28xbf16>
    %19 = vector.extract_strided_slice %0 {offsets = [3, 8, 0], sizes = [1, 48, 28], strides = [1, 1, 1]} : vector<4x56x28xbf16> to vector<1x48x28xbf16>
    %20 = vector.shape_cast %19 : vector<1x48x28xbf16> to vector<48x28xbf16>
    %21 = tpu.concatenate %6, %8 in 0 : vector<48x28xbf16>, vector<48x28xbf16> -> vector<96x28xbf16>
    %22 = tpu.concatenate %8, %10 in 0 : vector<48x28xbf16>, vector<48x28xbf16> -> vector<96x28xbf16>
    %23 = tpu.concatenate %10, %12 in 0 : vector<48x28xbf16>, vector<48x28xbf16> -> vector<96x28xbf16>
    %24 = tpu.concatenate %12, %14 in 0 : vector<48x28xbf16>, vector<48x28xbf16> -> vector<96x28xbf16>
    %25 = tpu.concatenate %14, %16 in 0 : vector<48x28xbf16>, vector<48x28xbf16> -> vector<96x28xbf16>
    %26 = tpu.concatenate %16, %18 in 0 : vector<48x28xbf16>, vector<48x28xbf16> -> vector<96x28xbf16>
    %27 = tpu.concatenate %18, %20 in 0 : vector<48x28xbf16>, vector<48x28xbf16> -> vector<96x28xbf16>
    %28 = vector.extract_strided_slice %1 {offsets = [0, 0, 0], sizes = [1, 28, 512], strides = [1, 1, 1]} : vector<5x28x512xbf16> to vector<1x28x512xbf16>
    %29 = vector.shape_cast %28 : vector<1x28x512xbf16> to vector<28x512xbf16>
    %cst = arith.constant dense<0.000000e+00> : vector<96x512xf32>
    %30 = tpu.matmul %21, %29, %cst {dimension_numbers = #tpu.dot_dimension_numbers<[1], [0], [0], [1], [0, 0, 1, 1], [], []>} : vector<96x28xbf16>, vector<28x512xbf16>, vector<96x512xf32> -> vector<96x512xf32>
    %31 = vector.extract_strided_slice %1 {offsets = [1, 0, 0], sizes = [1, 28, 512], strides = [1, 1, 1]} : vector<5x28x512xbf16> to vector<1x28x512xbf16>
    %32 = vector.shape_cast %31 : vector<1x28x512xbf16> to vector<28x512xbf16>
    %cst_12 = arith.constant dense<0.000000e+00> : vector<96x512xf32>
    %33 = tpu.matmul %22, %32, %cst_12 {dimension_numbers = #tpu.dot_dimension_numbers<[1], [0], [0], [1], [0, 0, 1, 1], [], []>} : vector<96x28xbf16>, vector<28x512xbf16>, vector<96x512xf32> -> vector<96x512xf32>
    %34 = arith.addf %30, %33 : vector<96x512xf32>
    %35 = vector.extract_strided_slice %1 {offsets = [2, 0, 0], sizes = [1, 28, 512], strides = [1, 1, 1]} : vector<5x28x512xbf16> to vector<1x28x512xbf16>
    %36 = vector.shape_cast %35 : vector<1x28x512xbf16> to vector<28x512xbf16>
    %cst_13 = arith.constant dense<0.000000e+00> : vector<96x512xf32>
    %37 = tpu.matmul %23, %36, %cst_13 {dimension_numbers = #tpu.dot_dimension_numbers<[1], [0], [0], [1], [0, 0, 1, 1], [], []>} : vector<96x28xbf16>, vector<28x512xbf16>, vector<96x512xf32> -> vector<96x512xf32>
    %38 = arith.addf %34, %37 : vector<96x512xf32>
    %39 = vector.extract_strided_slice %1 {offsets = [3, 0, 0], sizes = [1, 28, 512], strides = [1, 1, 1]} : vector<5x28x512xbf16> to vector<1x28x512xbf16>
    %40 = vector.shape_cast %39 : vector<1x28x512xbf16> to vector<28x512xbf16>
    %cst_14 = arith.constant dense<0.000000e+00> : vector<96x512xf32>
    %41 = tpu.matmul %24, %40, %cst_14 {dimension_numbers = #tpu.dot_dimension_numbers<[1], [0], [0], [1], [0, 0, 1, 1], [], []>} : vector<96x28xbf16>, vector<28x512xbf16>, vector<96x512xf32> -> vector<96x512xf32>
    %42 = arith.addf %38, %41 : vector<96x512xf32>
    %43 = vector.extract_strided_slice %1 {offsets = [4, 0, 0], sizes = [1, 28, 512], strides = [1, 1, 1]} : vector<5x28x512xbf16> to vector<1x28x512xbf16>
    %44 = vector.shape_cast %43 : vector<1x28x512xbf16> to vector<28x512xbf16>
    %cst_15 = arith.constant dense<0.000000e+00> : vector<96x512xf32>
    %45 = tpu.matmul %25, %44, %cst_15 {dimension_numbers = #tpu.dot_dimension_numbers<[1], [0], [0], [1], [0, 0, 1, 1], [], []>} : vector<96x28xbf16>, vector<28x512xbf16>, vector<96x512xf32> -> vector<96x512xf32>
    %46 = arith.addf %42, %45 : vector<96x512xf32>
    %47 = vector.extract_strided_slice %46 {offsets = [0, 0], sizes = [48, 240], strides = [1, 1]} : vector<96x512xf32> to vector<48x240xf32>
    %48 = vector.extract_strided_slice %46 {offsets = [0, 256], sizes = [48, 240], strides = [1, 1]} : vector<96x512xf32> to vector<48x240xf32>
    %49 = vector.extract_strided_slice %46 {offsets = [48, 0], sizes = [48, 240], strides = [1, 1]} : vector<96x512xf32> to vector<48x240xf32>
    %50 = vector.extract_strided_slice %46 {offsets = [48, 256], sizes = [48, 240], strides = [1, 1]} : vector<96x512xf32> to vector<48x240xf32>
    %51 = arith.maximumf %47, %48 : vector<48x240xf32>
    %52 = arith.maximumf %51, %49 : vector<48x240xf32>
    %53 = arith.maximumf %52, %50 : vector<48x240xf32>
    %54 = vector.broadcast %3 : vector<1x240xf32> to vector<48x240xf32>
    %55 = arith.addf %53, %54 : vector<48x240xf32>
    %cst_16 = arith.constant 0.000000e+00 : f32
    %56 = vector.broadcast %cst_16 : f32 to vector<48x240xf32>
    %57 = arith.maximumf %55, %56 : vector<48x240xf32>
    %58 = arith.truncf %57 : vector<48x240xf32> to vector<48x240xbf16>
    %59 = vector.extract_strided_slice %1 {offsets = [0, 0, 0], sizes = [1, 28, 512], strides = [1, 1, 1]} : vector<5x28x512xbf16> to vector<1x28x512xbf16>
    %60 = vector.shape_cast %59 : vector<1x28x512xbf16> to vector<28x512xbf16>
    %cst_17 = arith.constant dense<0.000000e+00> : vector<96x512xf32>
    %61 = tpu.matmul %23, %60, %cst_17 {dimension_numbers = #tpu.dot_dimension_numbers<[1], [0], [0], [1], [0, 0, 1, 1], [], []>} : vector<96x28xbf16>, vector<28x512xbf16>, vector<96x512xf32> -> vector<96x512xf32>
    %62 = vector.extract_strided_slice %1 {offsets = [1, 0, 0], sizes = [1, 28, 512], strides = [1, 1, 1]} : vector<5x28x512xbf16> to vector<1x28x512xbf16>
    %63 = vector.shape_cast %62 : vector<1x28x512xbf16> to vector<28x512xbf16>
    %cst_18 = arith.constant dense<0.000000e+00> : vector<96x512xf32>
    %64 = tpu.matmul %24, %63, %cst_18 {dimension_numbers = #tpu.dot_dimension_numbers<[1], [0], [0], [1], [0, 0, 1, 1], [], []>} : vector<96x28xbf16>, vector<28x512xbf16>, vector<96x512xf32> -> vector<96x512xf32>
    %65 = arith.addf %61, %64 : vector<96x512xf32>
    %66 = vector.extract_strided_slice %1 {offsets = [2, 0, 0], sizes = [1, 28, 512], strides = [1, 1, 1]} : vector<5x28x512xbf16> to vector<1x28x512xbf16>
    %67 = vector.shape_cast %66 : vector<1x28x512xbf16> to vector<28x512xbf16>
    %cst_19 = arith.constant dense<0.000000e+00> : vector<96x512xf32>
    %68 = tpu.matmul %25, %67, %cst_19 {dimension_numbers = #tpu.dot_dimension_numbers<[1], [0], [0], [1], [0, 0, 1, 1], [], []>} : vector<96x28xbf16>, vector<28x512xbf16>, vector<96x512xf32> -> vector<96x512xf32>
    %69 = arith.addf %65, %68 : vector<96x512xf32>
    %70 = vector.extract_strided_slice %1 {offsets = [3, 0, 0], sizes = [1, 28, 512], strides = [1, 1, 1]} : vector<5x28x512xbf16> to vector<1x28x512xbf16>
    %71 = vector.shape_cast %70 : vector<1x28x512xbf16> to vector<28x512xbf16>
    %cst_20 = arith.constant dense<0.000000e+00> : vector<96x512xf32>
    %72 = tpu.matmul %26, %71, %cst_20 {dimension_numbers = #tpu.dot_dimension_numbers<[1], [0], [0], [1], [0, 0, 1, 1], [], []>} : vector<96x28xbf16>, vector<28x512xbf16>, vector<96x512xf32> -> vector<96x512xf32>
    %73 = arith.addf %69, %72 : vector<96x512xf32>
    %74 = vector.extract_strided_slice %1 {offsets = [4, 0, 0], sizes = [1, 28, 512], strides = [1, 1, 1]} : vector<5x28x512xbf16> to vector<1x28x512xbf16>
    %75 = vector.shape_cast %74 : vector<1x28x512xbf16> to vector<28x512xbf16>
    %cst_21 = arith.constant dense<0.000000e+00> : vector<96x512xf32>
    %76 = tpu.matmul %27, %75, %cst_21 {dimension_numbers = #tpu.dot_dimension_numbers<[1], [0], [0], [1], [0, 0, 1, 1], [], []>} : vector<96x28xbf16>, vector<28x512xbf16>, vector<96x512xf32> -> vector<96x512xf32>
    %77 = arith.addf %73, %76 : vector<96x512xf32>
    %78 = vector.extract_strided_slice %77 {offsets = [0, 0], sizes = [48, 240], strides = [1, 1]} : vector<96x512xf32> to vector<48x240xf32>
    %79 = vector.extract_strided_slice %77 {offsets = [0, 256], sizes = [48, 240], strides = [1, 1]} : vector<96x512xf32> to vector<48x240xf32>
    %80 = vector.extract_strided_slice %77 {offsets = [48, 0], sizes = [48, 240], strides = [1, 1]} : vector<96x512xf32> to vector<48x240xf32>
    %81 = vector.extract_strided_slice %77 {offsets = [48, 256], sizes = [48, 240], strides = [1, 1]} : vector<96x512xf32> to vector<48x240xf32>
    %82 = arith.maximumf %78, %79 : vector<48x240xf32>
    %83 = arith.maximumf %82, %80 : vector<48x240xf32>
    %84 = arith.maximumf %83, %81 : vector<48x240xf32>
    %85 = vector.broadcast %3 : vector<1x240xf32> to vector<48x240xf32>
    %86 = arith.addf %84, %85 : vector<48x240xf32>
    %cst_22 = arith.constant 0.000000e+00 : f32
    %87 = vector.broadcast %cst_22 : f32 to vector<48x240xf32>
    %88 = arith.maximumf %86, %87 : vector<48x240xf32>
    %89 = arith.truncf %88 : vector<48x240xf32> to vector<48x240xbf16>
    %90 = vector.extract_strided_slice %58 {offsets = [0, 0], sizes = [32, 240], strides = [1, 1]} : vector<48x240xbf16> to vector<32x240xbf16>
    %91 = vector.extract_strided_slice %89 {offsets = [0, 0], sizes = [32, 240], strides = [1, 1]} : vector<48x240xbf16> to vector<32x240xbf16>
    %92 = vector.extract_strided_slice %58 {offsets = [8, 0], sizes = [32, 240], strides = [1, 1]} : vector<48x240xbf16> to vector<32x240xbf16>
    %93 = vector.extract_strided_slice %89 {offsets = [8, 0], sizes = [32, 240], strides = [1, 1]} : vector<48x240xbf16> to vector<32x240xbf16>
    %94 = vector.extract_strided_slice %58 {offsets = [16, 0], sizes = [32, 240], strides = [1, 1]} : vector<48x240xbf16> to vector<32x240xbf16>
    %95 = vector.extract_strided_slice %89 {offsets = [16, 0], sizes = [32, 240], strides = [1, 1]} : vector<48x240xbf16> to vector<32x240xbf16>
    %96 = tpu.concatenate %90, %91 in 0 : vector<32x240xbf16>, vector<32x240xbf16> -> vector<64x240xbf16>
    %97 = tpu.concatenate %91, %92 in 0 : vector<32x240xbf16>, vector<32x240xbf16> -> vector<64x240xbf16>
    %98 = tpu.concatenate %92, %93 in 0 : vector<32x240xbf16>, vector<32x240xbf16> -> vector<64x240xbf16>
    %99 = tpu.concatenate %93, %94 in 0 : vector<32x240xbf16>, vector<32x240xbf16> -> vector<64x240xbf16>
    %100 = tpu.concatenate %94, %95 in 0 : vector<32x240xbf16>, vector<32x240xbf16> -> vector<64x240xbf16>
    %101 = vector.extract_strided_slice %2 {offsets = [0, 0, 0], sizes = [1, 240, 512], strides = [1, 1, 1]} : vector<5x240x512xbf16> to vector<1x240x512xbf16>
    %102 = vector.shape_cast %101 : vector<1x240x512xbf16> to vector<240x512xbf16>
    %cst_23 = arith.constant dense<0.000000e+00> : vector<64x512xf32>
    %103 = tpu.matmul %96, %102, %cst_23 {dimension_numbers = #tpu.dot_dimension_numbers<[1], [0], [0], [1], [0, 0, 1, 1], [], []>} : vector<64x240xbf16>, vector<240x512xbf16>, vector<64x512xf32> -> vector<64x512xf32>
    %104 = vector.extract_strided_slice %2 {offsets = [1, 0, 0], sizes = [1, 240, 512], strides = [1, 1, 1]} : vector<5x240x512xbf16> to vector<1x240x512xbf16>
    %105 = vector.shape_cast %104 : vector<1x240x512xbf16> to vector<240x512xbf16>
    %cst_24 = arith.constant dense<0.000000e+00> : vector<64x512xf32>
    %106 = tpu.matmul %97, %105, %cst_24 {dimension_numbers = #tpu.dot_dimension_numbers<[1], [0], [0], [1], [0, 0, 1, 1], [], []>} : vector<64x240xbf16>, vector<240x512xbf16>, vector<64x512xf32> -> vector<64x512xf32>
    %107 = arith.addf %103, %106 : vector<64x512xf32>
    %108 = vector.extract_strided_slice %2 {offsets = [2, 0, 0], sizes = [1, 240, 512], strides = [1, 1, 1]} : vector<5x240x512xbf16> to vector<1x240x512xbf16>
    %109 = vector.shape_cast %108 : vector<1x240x512xbf16> to vector<240x512xbf16>
    %cst_25 = arith.constant dense<0.000000e+00> : vector<64x512xf32>
    %110 = tpu.matmul %98, %109, %cst_25 {dimension_numbers = #tpu.dot_dimension_numbers<[1], [0], [0], [1], [0, 0, 1, 1], [], []>} : vector<64x240xbf16>, vector<240x512xbf16>, vector<64x512xf32> -> vector<64x512xf32>
    %111 = arith.addf %107, %110 : vector<64x512xf32>
    %112 = vector.extract_strided_slice %2 {offsets = [3, 0, 0], sizes = [1, 240, 512], strides = [1, 1, 1]} : vector<5x240x512xbf16> to vector<1x240x512xbf16>
    %113 = vector.shape_cast %112 : vector<1x240x512xbf16> to vector<240x512xbf16>
    %cst_26 = arith.constant dense<0.000000e+00> : vector<64x512xf32>
    %114 = tpu.matmul %99, %113, %cst_26 {dimension_numbers = #tpu.dot_dimension_numbers<[1], [0], [0], [1], [0, 0, 1, 1], [], []>} : vector<64x240xbf16>, vector<240x512xbf16>, vector<64x512xf32> -> vector<64x512xf32>
    %115 = arith.addf %111, %114 : vector<64x512xf32>
    %116 = vector.extract_strided_slice %2 {offsets = [4, 0, 0], sizes = [1, 240, 512], strides = [1, 1, 1]} : vector<5x240x512xbf16> to vector<1x240x512xbf16>
    %117 = vector.shape_cast %116 : vector<1x240x512xbf16> to vector<240x512xbf16>
    %cst_27 = arith.constant dense<0.000000e+00> : vector<64x512xf32>
    %118 = tpu.matmul %100, %117, %cst_27 {dimension_numbers = #tpu.dot_dimension_numbers<[1], [0], [0], [1], [0, 0, 1, 1], [], []>} : vector<64x240xbf16>, vector<240x512xbf16>, vector<64x512xf32> -> vector<64x512xf32>
    %119 = arith.addf %115, %118 : vector<64x512xf32>
    %120 = vector.extract_strided_slice %119 {offsets = [0, 0], sizes = [32, 200], strides = [1, 1]} : vector<64x512xf32> to vector<32x200xf32>
    %121 = vector.extract_strided_slice %119 {offsets = [0, 256], sizes = [32, 200], strides = [1, 1]} : vector<64x512xf32> to vector<32x200xf32>
    %122 = vector.extract_strided_slice %119 {offsets = [32, 0], sizes = [32, 200], strides = [1, 1]} : vector<64x512xf32> to vector<32x200xf32>
    %123 = vector.extract_strided_slice %119 {offsets = [32, 256], sizes = [32, 200], strides = [1, 1]} : vector<64x512xf32> to vector<32x200xf32>
    %124 = arith.maximumf %120, %121 : vector<32x200xf32>
    %125 = arith.maximumf %124, %122 : vector<32x200xf32>
    %126 = arith.maximumf %125, %123 : vector<32x200xf32>
    %127 = vector.broadcast %4 : vector<1x200xf32> to vector<32x200xf32>
    %128 = arith.addf %126, %127 : vector<32x200xf32>
    %cst_28 = arith.constant 0.000000e+00 : f32
    %129 = vector.broadcast %cst_28 : f32 to vector<32x200xf32>
    %130 = arith.maximumf %128, %129 : vector<32x200xf32>
    %131 = arith.truncf %130 : vector<32x200xf32> to vector<32x200xbf16>
    %c0_29 = arith.constant 0 : index
    %c0_30 = arith.constant 0 : index
    %c0_31 = arith.constant 0 : index
    %132 = vector.load %arg6[%c0_29, %c0_30, %c0_31] : memref<4x200x512xbf16, #tpu.memory_space<vmem>>, vector<4x200x512xbf16>
    %133 = vector.extract_strided_slice %131 {offsets = [0, 0], sizes = [8, 200], strides = [1, 1]} : vector<32x200xbf16> to vector<8x200xbf16>
    %134 = vector.extract_strided_slice %132 {offsets = [0, 0, 0], sizes = [1, 200, 512], strides = [1, 1, 1]} : vector<4x200x512xbf16> to vector<1x200x512xbf16>
    %135 = vector.shape_cast %134 : vector<1x200x512xbf16> to vector<200x512xbf16>
    %cst_32 = arith.constant dense<0.000000e+00> : vector<8x512xf32>
    %136 = tpu.matmul %133, %135, %cst_32 {dimension_numbers = #tpu.dot_dimension_numbers<[1], [0], [0], [1], [0, 0, 1, 1], [], []>} : vector<8x200xbf16>, vector<200x512xbf16>, vector<8x512xf32> -> vector<8x512xf32>
    %137 = vector.extract_strided_slice %131 {offsets = [8, 0], sizes = [8, 200], strides = [1, 1]} : vector<32x200xbf16> to vector<8x200xbf16>
    %138 = vector.extract_strided_slice %132 {offsets = [1, 0, 0], sizes = [1, 200, 512], strides = [1, 1, 1]} : vector<4x200x512xbf16> to vector<1x200x512xbf16>
    %139 = vector.shape_cast %138 : vector<1x200x512xbf16> to vector<200x512xbf16>
    %cst_33 = arith.constant dense<0.000000e+00> : vector<8x512xf32>
    %140 = tpu.matmul %137, %139, %cst_33 {dimension_numbers = #tpu.dot_dimension_numbers<[1], [0], [0], [1], [0, 0, 1, 1], [], []>} : vector<8x200xbf16>, vector<200x512xbf16>, vector<8x512xf32> -> vector<8x512xf32>
    %141 = arith.addf %136, %140 : vector<8x512xf32>
    %142 = vector.extract_strided_slice %131 {offsets = [16, 0], sizes = [8, 200], strides = [1, 1]} : vector<32x200xbf16> to vector<8x200xbf16>
    %143 = vector.extract_strided_slice %132 {offsets = [2, 0, 0], sizes = [1, 200, 512], strides = [1, 1, 1]} : vector<4x200x512xbf16> to vector<1x200x512xbf16>
    %144 = vector.shape_cast %143 : vector<1x200x512xbf16> to vector<200x512xbf16>
    %cst_34 = arith.constant dense<0.000000e+00> : vector<8x512xf32>
    %145 = tpu.matmul %142, %144, %cst_34 {dimension_numbers = #tpu.dot_dimension_numbers<[1], [0], [0], [1], [0, 0, 1, 1], [], []>} : vector<8x200xbf16>, vector<200x512xbf16>, vector<8x512xf32> -> vector<8x512xf32>
    %146 = arith.addf %141, %145 : vector<8x512xf32>
    %147 = vector.extract_strided_slice %131 {offsets = [24, 0], sizes = [8, 200], strides = [1, 1]} : vector<32x200xbf16> to vector<8x200xbf16>
    %148 = vector.extract_strided_slice %132 {offsets = [3, 0, 0], sizes = [1, 200, 512], strides = [1, 1, 1]} : vector<4x200x512xbf16> to vector<1x200x512xbf16>
    %149 = vector.shape_cast %148 : vector<1x200x512xbf16> to vector<200x512xbf16>
    %cst_35 = arith.constant dense<0.000000e+00> : vector<8x512xf32>
    %150 = tpu.matmul %147, %149, %cst_35 {dimension_numbers = #tpu.dot_dimension_numbers<[1], [0], [0], [1], [0, 0, 1, 1], [], []>} : vector<8x200xbf16>, vector<200x512xbf16>, vector<8x512xf32> -> vector<8x512xf32>
    %151 = arith.addf %146, %150 : vector<8x512xf32>
    %c0_36 = arith.constant 0 : index
    %c0_37 = arith.constant 0 : index
    %152 = vector.load %arg7[%c0_36, %c0_37] : memref<1x512xf32, #tpu.memory_space<vmem>>, vector<1x512xf32>
    %153 = vector.broadcast %152 : vector<1x512xf32> to vector<8x512xf32>
    %154 = arith.addf %151, %153 : vector<8x512xf32>
    %c0_38 = arith.constant 0 : index
    %c0_39 = arith.constant 0 : index
    %155 = vector.load %arg12[%c0_38, %c0_39] : memref<8x512xf32, #tpu.memory_space<vmem>>, vector<8x512xf32>
    tpu.vector_store %arg12[%c0_38, %c0_39], %154 {strides = array<i32>} : memref<8x512xf32, #tpu.memory_space<vmem>>, vector<8x512xf32>,
    %156 = arith.truncf %154 : vector<8x512xf32> to vector<8x512xbf16>
    %c0_40 = arith.constant 0 : index
    %c0_41 = arith.constant 0 : index
    %157 = vector.load %arg8[%c0_40, %c0_41] : memref<512x128xbf16, #tpu.memory_space<vmem>>, vector<512x128xbf16>
    %cst_42 = arith.constant dense<0.000000e+00> : vector<8x128xf32>
    %158 = tpu.matmul %156, %157, %cst_42 {dimension_numbers = #tpu.dot_dimension_numbers<[1], [0], [0], [1], [0, 0, 1, 1], [], []>} : vector<8x512xbf16>, vector<512x128xbf16>, vector<8x128xf32> -> vector<8x128xf32>
    %c0_43 = arith.constant 0 : index
    %c0_44 = arith.constant 0 : index
    %159 = vector.load %arg9[%c0_43, %c0_44] : memref<1x128xf32, #tpu.memory_space<vmem>>, vector<1x128xf32>
    %160 = vector.broadcast %159 : vector<1x128xf32> to vector<8x128xf32>
    %161 = arith.addf %158, %160 : vector<8x128xf32>
    %cst_45 = arith.constant 0.000000e+00 : f32
    %162 = vector.broadcast %cst_45 : f32 to vector<8x128xf32>
    %163 = arith.maximumf %161, %162 : vector<8x128xf32>
    %c0_46 = arith.constant 0 : index
    %c0_47 = arith.constant 0 : index
    %164 = vector.load %arg13[%c0_46, %c0_47] : memref<8x128xf32, #tpu.memory_space<vmem>>, vector<8x128xf32>
    tpu.vector_store %arg13[%c0_46, %c0_47], %163 {strides = array<i32>} : memref<8x128xf32, #tpu.memory_space<vmem>>, vector<8x128xf32>,
    %165 = arith.truncf %163 : vector<8x128xf32> to vector<8x128xbf16>
    %c0_48 = arith.constant 0 : index
    %c0_49 = arith.constant 0 : index
    %166 = vector.load %arg10[%c0_48, %c0_49] : memref<128x128xbf16, #tpu.memory_space<vmem>>, vector<128x128xbf16>
    %cst_50 = arith.constant dense<0.000000e+00> : vector<8x128xf32>
    %167 = tpu.matmul %165, %166, %cst_50 {dimension_numbers = #tpu.dot_dimension_numbers<[1], [0], [0], [1], [0, 0, 1, 1], [], []>} : vector<8x128xbf16>, vector<128x128xbf16>, vector<8x128xf32> -> vector<8x128xf32>
    %c0_51 = arith.constant 0 : index
    %c0_52 = arith.constant 0 : index
    %168 = vector.load %arg11[%c0_51, %c0_52] : memref<1x128xf32, #tpu.memory_space<vmem>>, vector<1x128xf32>
    %169 = vector.broadcast %168 : vector<1x128xf32> to vector<8x128xf32>
    %170 = arith.addf %167, %169 : vector<8x128xf32>
    %c0_53 = arith.constant 0 : index
    %c0_54 = arith.constant 0 : index
    %171 = vector.load %arg14[%c0_53, %c0_54] : memref<8x128xf32, #tpu.memory_space<vmem>>, vector<8x128xf32>
    tpu.vector_store %arg14[%c0_53, %c0_54], %170 {strides = array<i32>} : memref<8x128xf32, #tpu.memory_space<vmem>>, vector<8x128xf32>,
    %172 = tpu.iota {dimensions = array<i32: 1>} : vector<8x128xi32>
    %c10_i32 = arith.constant 10 : i32
    %173 = vector.broadcast %c10_i32 : i32 to vector<8x128xi32>
    %174 = arith.cmpi slt, %172, %173 : vector<8x128xi32>
    %cst_55 = arith.constant 0xFF800000 : f32
    %175 = vector.broadcast %cst_55 : f32 to vector<8x128xf32>
    %176 = arith.select %174, %170, %175 : vector<8x128xi1>, vector<8x128xf32>
    %cst_56 = arith.constant dense<0xFF800000> : vector<8xf32>
    %177 = vector.multi_reduction <maximumf>, %176, %cst_56 [1] : vector<8x128xf32> to vector<8xf32>
    %178 = vector.shape_cast %177 : vector<8xf32> to vector<8x1xf32>
    %179 = vector.broadcast %178 : vector<8x1xf32> to vector<8x128xf32>
    %180 = arith.subf %176, %179 : vector<8x128xf32>
    %181 = math.exp %180 : vector<8x128xf32>
    %cst_57 = arith.constant 0.000000e+00 : f32
    %182 = vector.broadcast %cst_57 : f32 to vector<8x128xf32>
    %183 = arith.select %174, %181, %182 : vector<8x128xi1>, vector<8x128xf32>
    %cst_58 = arith.constant dense<0.000000e+00> : vector<8xf32>
    %184 = vector.multi_reduction <add>, %183, %cst_58 [1] : vector<8x128xf32> to vector<8xf32>
    %185 = vector.shape_cast %184 : vector<8xf32> to vector<8x1xf32>
    %186 = tpu.reciprocal %185 {approx = true} : vector<8x1xf32> -> vector<8x1xf32>
    %187 = vector.broadcast %186 : vector<8x1xf32> to vector<8x128xf32>
    %188 = arith.mulf %183, %187 : vector<8x128xf32>
    %c0_59 = arith.constant 0 : index
    %c0_60 = arith.constant 0 : index
    %189 = vector.load %arg15[%c0_59, %c0_60] : memref<8x128xf32, #tpu.memory_space<vmem>>, vector<8x128xf32>
    tpu.vector_store %arg15[%c0_59, %c0_60], %188 {strides = array<i32>} : memref<8x128xf32, #tpu.memory_space<vmem>>, vector<8x128xf32>,
    %190 = vector.broadcast %178 : vector<8x1xf32> to vector<8x128xf32>
    %191 = arith.subf %176, %190 : vector<8x128xf32>
    %192 = math.log %185 : vector<8x1xf32>
    %193 = vector.broadcast %192 : vector<8x1xf32> to vector<8x128xf32>
    %194 = arith.subf %191, %193 : vector<8x128xf32>
    %cst_61 = arith.constant 0.000000e+00 : f32
    %195 = vector.broadcast %cst_61 : f32 to vector<8x128xf32>
    %196 = arith.select %174, %194, %195 : vector<8x128xi1>, vector<8x128xf32>
    %c0_62 = arith.constant 0 : index
    %c0_63 = arith.constant 0 : index
    %197 = vector.load %arg16[%c0_62, %c0_63] : memref<8x128xf32, #tpu.memory_space<vmem>>, vector<8x128xf32>
    tpu.vector_store %arg16[%c0_62, %c0_63], %196 {strides = array<i32>} : memref<8x128xf32, #tpu.memory_space<vmem>>, vector<8x128xf32>,
    return
  }
  func.func @transform_0(%arg0: i32) -> (i32, i32, i32) {
    %c0_i32 = arith.constant 0 : i32
    %c0_i32_0 = arith.constant 0 : i32
    %c0_i32_1 = arith.constant 0 : i32
    return %c0_i32, %arg0, %c0_i32_0 : i32, i32, i32
  }
  func.func @transform_1(%arg0: i32) -> (i32, i32, i32) {
    %c0_i32 = arith.constant 0 : i32
    %c0_i32_0 = arith.constant 0 : i32
    %c0_i32_1 = arith.constant 0 : i32
    %c0_i32_2 = arith.constant 0 : i32
    return %c0_i32, %c0_i32_0, %c0_i32_1 : i32, i32, i32
  }
  func.func @transform_2(%arg0: i32) -> (i32, i32) {
    %c0_i32 = arith.constant 0 : i32
    %c0_i32_0 = arith.constant 0 : i32
    %c0_i32_1 = arith.constant 0 : i32
    return %c0_i32, %c0_i32_0 : i32, i32
  }
  func.func @transform_3(%arg0: i32) -> (i32, i32, i32) {
    %c0_i32 = arith.constant 0 : i32
    %c0_i32_0 = arith.constant 0 : i32
    %c0_i32_1 = arith.constant 0 : i32
    %c0_i32_2 = arith.constant 0 : i32
    return %c0_i32, %c0_i32_0, %c0_i32_1 : i32, i32, i32
  }
  func.func @transform_4(%arg0: i32) -> (i32, i32) {
    %c0_i32 = arith.constant 0 : i32
    %c0_i32_0 = arith.constant 0 : i32
    %c0_i32_1 = arith.constant 0 : i32
    return %c0_i32, %c0_i32_0 : i32, i32
  }
  func.func @transform_5(%arg0: i32) -> (i32, i32, i32) {
    %c0_i32 = arith.constant 0 : i32
    %c0_i32_0 = arith.constant 0 : i32
    %c0_i32_1 = arith.constant 0 : i32
    %c0_i32_2 = arith.constant 0 : i32
    return %c0_i32, %c0_i32_0, %c0_i32_1 : i32, i32, i32
  }
  func.func @transform_6(%arg0: i32) -> (i32, i32) {
    %c0_i32 = arith.constant 0 : i32
    %c0_i32_0 = arith.constant 0 : i32
    %c0_i32_1 = arith.constant 0 : i32
    return %c0_i32, %c0_i32_0 : i32, i32
  }
  func.func @transform_7(%arg0: i32) -> (i32, i32) {
    %c0_i32 = arith.constant 0 : i32
    %c0_i32_0 = arith.constant 0 : i32
    %c0_i32_1 = arith.constant 0 : i32
    return %c0_i32, %c0_i32_0 : i32, i32
  }
  func.func @transform_8(%arg0: i32) -> (i32, i32) {
    %c0_i32 = arith.constant 0 : i32
    %c0_i32_0 = arith.constant 0 : i32
    %c0_i32_1 = arith.constant 0 : i32
    return %c0_i32, %c0_i32_0 : i32, i32
  }
  func.func @transform_9(%arg0: i32) -> (i32, i32) {
    %c0_i32 = arith.constant 0 : i32
    %c0_i32_0 = arith.constant 0 : i32
    %c0_i32_1 = arith.constant 0 : i32
    return %c0_i32, %c0_i32_0 : i32, i32
  }
  func.func @transform_10(%arg0: i32) -> (i32, i32) {
    %c0_i32 = arith.constant 0 : i32
    %c0_i32_0 = arith.constant 0 : i32
    %c0_i32_1 = arith.constant 0 : i32
    return %c0_i32, %c0_i32_0 : i32, i32
  }
  func.func @transform_11(%arg0: i32) -> (i32, i32) {
    %c0_i32 = arith.constant 0 : i32
    %c0_i32_0 = arith.constant 0 : i32
    return %arg0, %c0_i32 : i32, i32
  }
  func.func @transform_12(%arg0: i32) -> (i32, i32) {
    %c0_i32 = arith.constant 0 : i32
    %c0_i32_0 = arith.constant 0 : i32
    return %arg0, %c0_i32 : i32, i32
  }
  func.func @transform_13(%arg0: i32) -> (i32, i32) {
    %c0_i32 = arith.constant 0 : i32
    %c0_i32_0 = arith.constant 0 : i32
    return %arg0, %c0_i32 : i32, i32
  }
  func.func @transform_14(%arg0: i32) -> (i32, i32) {
    %c0_i32 = arith.constant 0 : i32
    %c0_i32_0 = arith.constant 0 : i32
    return %arg0, %c0_i32 : i32, i32
  }
  func.func @transform_15(%arg0: i32) -> (i32, i32) {
    %c0_i32 = arith.constant 0 : i32
    %c0_i32_0 = arith.constant 0 : i32
    return %arg0, %c0_i32 : i32, i32
  }
}

</mosaic_0001>

<bundles_post_ra>
// kernel: lenet_forward.1
= control target key start
LH: loop header
LB: loop body
LE: loop exit
PB: predicated region body
PF: predicated region fallthrough
CT: control target
= control target key end

     0   :  { %s12897_s0 = inlined_call_operand.vmem [shape: bf16[4,112,28], index: 0, kind: input, shape index: {}]   ;;  %s12898_s1 = inlined_call_operand.hbm [shape: bf16[5,28,512], index: 1, kind: input, shape index: {}]   ;;  %s12899_s2 = inlined_call_operand.hbm [shape: f32[1,240], index: 2, kind: input, shape index: {}]   ;;  %s12900_s3 = inlined_call_operand.hbm [shape: bf16[5,240,512], index: 3, kind: input, shape index: {}]   ;;  %s12901_s4 = inlined_call_operand.hbm [shape: f32[1,200], index: 4, kind: input, shape index: {}]   ;;  %s12902_s5 = inlined_call_operand.hbm [shape: bf16[4,200,512], index: 5, kind: input, shape index: {}]   ;;  %s12903_s6 = inlined_call_operand.hbm [shape: f32[1,512], index: 6, kind: input, shape index: {}]   ;;  %s12904_s7 = inlined_call_operand.hbm [shape: bf16[512,128], index: 7, kind: input, shape index: {}]   ;;  %s12905_s8 = inlined_call_operand.hbm [shape: f32[1,128], index: 8, kind: input, shape index: {}]   ;;  %s12906_s9 = inlined_call_operand.hbm [shape: bf16[128,128], index: 9, kind: input, shape index: {}]   ;;  %s12907_s10 = inlined_call_operand.hbm [shape: f32[1,128], index: 10, kind: input, shape index: {}]   ;;  %s12908_s11 = inlined_call_operand.vmem [shape: f32[16,512], index: 11, kind: output, shape index: {0}]   ;;  %s12909_s12 = inlined_call_operand.vmem [shape: f32[16,128], index: 12, kind: output, shape index: {1}]   ;;  %s12910_s13 = inlined_call_operand.vmem [shape: f32[16,128], index: 13, kind: output, shape index: {2}]   ;;  %s12911_s14 = inlined_call_operand.vmem [shape: f32[16,128], index: 14, kind: output, shape index: {3}]   ;;  %s12912_s15 = inlined_call_operand.vmem [shape: f32[16,128], index: 15, kind: output, shape index: {4}]  }
   0x1   :  { %12917 = sst [smem:[#allocation27_spill]] %s12899_s2 }
   0x2   :  { %12918 = sst [smem:[#allocation28_spill]] %s12901_s4 }
   0x3   :  { %12919 = sst [smem:[#allocation29_spill]] %s12903_s6 }
   0x4   :  { %12920 = sst [smem:[#allocation30_spill]] %s12905_s8 }
   0x5   :  { %12921 = sst [smem:[#allocation31_spill]] %s12908_s11 }
   0x6   :  { %12922 = sst [smem:[#allocation32_spill]] %s12909_s12 }
   0x7   :  { %12923 = sst [smem:[#allocation33_spill]] %s12910_s13 }
   0x8   :  { %12924 = sst [smem:[#allocation34_spill]] %s12911_s14 }
   0x9   :  { %12925 = sst [smem:[#allocation35_spill]] %s12912_s15 }
   0xa   :  { %21 = vsyncpa [#allocation4], 0 }
   0xb   :  { %22 = vsyncpa [#allocation6], 0 }
   0xc   :  { %23 = vsyncpa [#allocation9], 0 }
   0xd   :  { %24 = vsyncpa [#allocation12], 0 }
   0xe   :  { %25 = vsyncpa [#allocation15], 0 }
   0xf   :  { %26 = vsyncpa [#allocation18], 0  ;;  %s11645_s18 = smov 0   ;;  %s11647_s19 = smov 0  }
  0x10   :  { %s11649_s20 = smov 0  }
  0x11 LB: > { %s11661_s21 = sadd.s32 4294967295, %s11546_s20   ;;  %s11664_s22 = sadd.s32 1, %s11546_s20   ;;  %s11546_s20 = sphi %s11649_s20, %s12955_s20   ;;  %s11542_s19 = sphi %s11647_s19, %s12958_s19   ;;  %s11538_s18 = sphi %s11645_s18, %s12957_s18  }
  0x12   : > { %12926 = sst [smem:[#allocation25_spill]] %s11664_s22  ;;  %s36_s23 = ssub.s32 %s11546_s20, %s11664_s22 }
  0x13   : > { %s39_s24 = sadd.s32 1, %s11542_s19  ;;  %p37_p0 = scmp.eq.s32.totalorder %s36_s23, 0 }
  0x14   : > { %p46_p1 = scmp.ne.s32.totalorder %s11542_s19, %s11538_s18  ;;  %p47_p2 = scmp.eq.s32.totalorder %s11546_s20, 0 }
  0x15   : > { %p8733_p3 = scmp.ge.s32.totalorder %s11546_s20, 1  ;;  %p403_p5 = scmp.lt.s32.totalorder %s11546_s20, 3 }
  0x16   : > { %s11674_s25 = scalar_select %p37_p0, %s11542_s19, %s39_s24  }
  0x17   : > { %p11676_p4 = por %p47_p2, %p46_p1  ;;  %p12915_p6 = scmp.eq.s32.totalorder %s11661_s21, 0 }
  0x18   : > { %12927 = sst [smem:[#allocation26_spill]] %s11674_s25  ;;  %p11682_p7 = pnand %p8733_p3, %p403_p5 }
  0x19   : > { %s12928_s26 = scalar_select %p11676_p4, 1, 0 }
  0x1a   : > { %s12929_s27 = scalar_select %p11682_p7, 1, 0 }
  0x1b   : > { %s11548_s28 = smov [#allocation5]   ;;  %p10208_p8 = pneg %p11682_p7 }
  0x1c   : > { %s429_s29 = sshll.u32 %s11548_s28, 4  ;;  %s11549_s30 = smov [#allocation8]   ;;  %s430_s29 = int_to_ptr.vmem [resolvable:$true] %s429_s29 }
  0x1d   : > { %s453_s16 = sshll.u32 %s11549_s30, 4  ;;  %p11690_p9 = pnand %p12915_p6, %p10208_p8  ;;  %s11694_s16 = int_to_ptr.vmem [resolvable:$true] %s453_s16 }
  0x1e   : > { %s11550_s23 = smov [#allocation11]   ;;  %s12931_s2 = sld [smem:[#allocation27_spill]] }
  0x1f   : > { %s477_s24 = sshll.u32 %s11550_s23, 4  ;;  %p11706_p11 = pneg %p11690_p9  ;;  %s11696_s24 = int_to_ptr.vmem [resolvable:$true] %s477_s24 }
  0x24   : > { %s11220_s28 = scalar_lea.hbm %s12931_s2, 32 }
  0x25   : > { %p11221_p10 = scmp.ne.s32.totalorder %s12931_s2, %s11220_s28  ;;  %p11227_p0 = scmp.lt.u32.totalorder %s11220_s28, %s12931_s2 }
  0x27   : > { %p11223_p12 = pnand %p11706_p11, %p11221_p10 }
  0x29   : > { %p11224_p13 = pneg %p11223_p12 }
  0x2b   : > { %p11229_p1 = pnand %p11227_p0, %p11224_p13 }
  0x2d   : > { %11232 = shalt.err (!%p11229_p1)
}
  0x2e   : > { %s11233_s22 = scalar_lea.vmem %s430_s29, 32  ;;  %p11241_p8 = scmp.lt.s32.totalorder %s430_s29, %s430_s29 }
  0x2f   : > { %p11234_p2 = scmp.ne.s32.totalorder %s430_s29, %s11233_s22  ;;  %p11242_p6 = scmp.lt.s32.totalorder %s11233_s22, %s11233_s22 }
  0x31   : > { %p11236_p3 = pnand %p11234_p2, %p11706_p11  ;;  %p11243_p7 = por %p11242_p6, %p11241_p8 }
  0x33   : > { %p11237_p5 = pneg %p11236_p3 }
  0x35   : > { %p11244_p4 = pnand %p11243_p7, %p11237_p5 }
  0x37   : > { %11247 = shalt.err (!%p11244_p4)
}
  0x38   : > { %10214 = dma.hbm_to_vmem [thread:$0]  (!%p11690_p9), %s12931_s2, 32, %s430_s29, [#allocation6]  }
  0x39   : > { %s12933_s4 = sld [smem:[#allocation28_spill]] }
  0x3f   : > { %s11248_s28 = scalar_lea.hbm %s12933_s4, 32 }
  0x40   : > { %p11249_p10 = scmp.ne.s32.totalorder %s12933_s4, %s11248_s28  ;;  %p11255_p4 = scmp.lt.u32.totalorder %s11248_s28, %s12933_s4 }
  0x42   : > { %p11251_p12 = pnand %p11249_p10, %p11706_p11 }
  0x44   : > { %p11252_p6 = pneg %p11251_p12 }
  0x46   : > { %p11257_p7 = pnand %p11255_p4, %p11252_p6 }
  0x48   : > { %11260 = shalt.err (!%p11257_p7)
}
  0x49   : > { %s11261_s29 = scalar_lea.vmem %s11694_s16, 32  ;;  %p11269_p2 = scmp.lt.s32.totalorder %s11694_s16, %s11694_s16 }
  0x4a   : > { %p11262_p13 = scmp.ne.s32.totalorder %s11694_s16, %s11261_s29  ;;  %p11270_p3 = scmp.lt.s32.totalorder %s11261_s29, %s11261_s29 }
  0x4c   : > { %p11264_p0 = pnand %p11262_p13, %p11706_p11  ;;  %p11271_p5 = por %p11270_p3, %p11269_p2 }
  0x4e   : > { %p11265_p1 = pneg %p11264_p0 }
  0x50   : > { %p11272_p8 = pnand %p11271_p5, %p11265_p1 }
  0x52   : > { %11275 = shalt.err (!%p11272_p8)
}
  0x53   : > { %10220 = dma.hbm_to_vmem [thread:$0]  (!%p11690_p9), %s12933_s4, 32, %s11694_s16, [#allocation9]  }
  0x54   : > { %s12934_s6 = sld [smem:[#allocation29_spill]] }
  0x5a   : > { %s11276_s13 = scalar_lea.hbm %s12934_s6, 64 }
  0x5b   : > { %p11277_p10 = scmp.ne.s32.totalorder %s12934_s6, %s11276_s13  ;;  %p11283_p4 = scmp.lt.u32.totalorder %s11276_s13, %s12934_s6 }
  0x5d   : > { %p11279_p12 = pnand %p11277_p10, %p11706_p11 }
  0x5f   : > { %p11280_p6 = pneg %p11279_p12 }
  0x61   : > { %p11285_p7 = pnand %p11283_p4, %p11280_p6 }
  0x63   : > { %11288 = shalt.err (!%p11285_p7)
}
  0x64   : > { %s11289_s16 = scalar_lea.vmem %s11696_s24, 64  ;;  %p11297_p2 = scmp.lt.s32.totalorder %s11696_s24, %s11696_s24 }
  0x65   : > { %p11290_p13 = scmp.ne.s32.totalorder %s11696_s24, %s11289_s16  ;;  %p11298_p3 = scmp.lt.s32.totalorder %s11289_s16, %s11289_s16 }
  0x67   : > { %p11292_p0 = pnand %p11290_p13, %p11706_p11  ;;  %p11299_p5 = por %p11298_p3, %p11297_p2 }
  0x69   : > { %p11293_p1 = pneg %p11292_p0 }
  0x6b   : > { %p11300_p8 = pnand %p11299_p5, %p11293_p1 }
  0x6d   : > { %11303 = shalt.err (!%p11300_p8)
}
  0x6e   : > { %10226 = dma.hbm_to_vmem [thread:$0]  (!%p11690_p9), %s12934_s6, 64, %s11696_s24, [#allocation12]  }
  0x6f   : > { %s11551_s12 = smov [#allocation14]   ;;  %s11552_s15 = smov [#allocation3]  }
  0x70   : > { %s501_s14 = sshll.u32 %s11551_s12, 4  ;;  %s415_s13 = sshll.u32 %s11552_s15, 4  ;;  %s502_s14 = int_to_ptr.vmem [resolvable:$true] %s501_s14  ;;  %s416_s13 = int_to_ptr.vmem [resolvable:$true] %s415_s13 }
  0x71   : > { %s12935_s8 = sld [smem:[#allocation30_spill]] }
  0x77   : > { %s11304_s23 = scalar_lea.hbm %s12935_s8, 16 }
  0x78   : > { %p11305_p10 = scmp.ne.s32.totalorder %s12935_s8, %s11304_s23  ;;  %p11311_p4 = scmp.lt.u32.totalorder %s11304_s23, %s12935_s8 }
  0x7a   : > { %p11307_p12 = pnand %p11305_p10, %p11706_p11 }
  0x7c   : > { %p11308_p6 = pneg %p11307_p12 }
  0x7e   : > { %p11313_p7 = pnand %p11311_p4, %p11308_p6 }
  0x80   : > { %11316 = shalt.err (!%p11313_p7)
}
  0x81   : > { %s11317_s24 = scalar_lea.vmem %s502_s14, 16  ;;  %s11324_s11 = scalar_lea.vmem %s502_s14, 32 }
  0x82   : > { %p11318_p13 = scmp.ne.s32.totalorder %s502_s14, %s11317_s24  ;;  %p11325_p2 = scmp.lt.s32.totalorder %s502_s14, %s502_s14 }
  0x83   : > { %p11326_p3 = scmp.lt.s32.totalorder %s11324_s11, %s11317_s24 }
  0x84   : > { %p11320_p0 = pnand %p11318_p13, %p11706_p11 }
  0x85   : > { %p11327_p5 = por %p11326_p3, %p11325_p2 }
  0x86   : > { %p11321_p1 = pneg %p11320_p0 }
  0x88   : > { %p11328_p8 = pnand %p11327_p5, %p11321_p1 }
  0x8a   : > { %11331 = shalt.err (!%p11328_p8)
}
  0x8b   : > { %10232 = dma.hbm_to_vmem [thread:$0]  (!%p11690_p9), %s12935_s8, 16, %s502_s14, [#allocation15]  }
  0x8c   : > { %s11332_s28 = scalar_lea.hbm %s12898_s1, 5120 }
  0x8d   : > { %p11333_p10 = scmp.ne.s32.totalorder %s12898_s1, %s11332_s28  ;;  %p11339_p4 = scmp.lt.u32.totalorder %s11332_s28, %s12898_s1 }
  0x8f   : > { %p11335_p12 = pnand %p11333_p10, %p11706_p11 }
  0x91   : > { %p11336_p6 = pneg %p11335_p12 }
  0x93   : > { %p11341_p7 = pnand %p11339_p4, %p11336_p6 }
  0x95   : > { %11344 = shalt.err (!%p11341_p7)
}
  0x96   : > { %s11345_s24 = scalar_lea.vmem %s416_s13, 5120  ;;  %p11353_p2 = scmp.lt.s32.totalorder %s416_s13, %s416_s13 }
  0x97   : > { %p11346_p13 = scmp.ne.s32.totalorder %s416_s13, %s11345_s24  ;;  %p11354_p3 = scmp.lt.s32.totalorder %s11345_s24, %s11345_s24 }
  0x99   : > { %p11348_p0 = pnand %p11346_p13, %p11706_p11  ;;  %p11355_p5 = por %p11354_p3, %p11353_p2 }
  0x9b   : > { %p11349_p1 = pneg %p11348_p0 }
  0x9d   : > { %p11356_p8 = pnand %p11355_p5, %p11349_p1 }
  0x9f   : > { %11359 = shalt.err (!%p11356_p8)
}
  0xa0   : > { %s11553_s14 = smov 256   ;;  %s11554_s11 = smov 16  }
  0xa1   : > { %10211 = dma.hbm_to_vmem [thread:$0]  (!%p11690_p9), %s12898_s1, 5120, %s416_s13, [#allocation4], %s11553_s14, %s11553_s14, %s11554_s11  }
  0xa2   : > { %s11555_s2 = smov [#allocation7]   ;;  %s11556_s28 = smov [#allocation10]  }
  0xa3   : > { %s439_s25 = sshll.u32 %s11555_s2, 4  ;;  %s463_s23 = sshll.u32 %s11556_s28, 4  ;;  %s440_s25 = int_to_ptr.vmem [resolvable:$true] %s439_s25  ;;  %s464_s23 = int_to_ptr.vmem [resolvable:$true] %s463_s23 }
  0xa4   : > { %s11360_s29 = scalar_lea.hbm %s12900_s3, 38400 }
  0xa5   : > { %p11361_p10 = scmp.ne.s32.totalorder %s12900_s3, %s11360_s29  ;;  %p11367_p4 = scmp.lt.u32.totalorder %s11360_s29, %s12900_s3 }
  0xa7   : > { %p11363_p12 = pnand %p11361_p10, %p11706_p11 }
  0xa9   : > { %p11364_p6 = pneg %p11363_p12 }
  0xab   : > { %p11369_p7 = pnand %p11367_p4, %p11364_p6 }
  0xad   : > { %11372 = shalt.err (!%p11369_p7)
}
  0xae   : > { %s11373_s13 = scalar_lea.vmem %s440_s25, 38400  ;;  %p11381_p2 = scmp.lt.s32.totalorder %s440_s25, %s440_s25 }
  0xaf   : > { %p11374_p13 = scmp.ne.s32.totalorder %s440_s25, %s11373_s13  ;;  %p11382_p3 = scmp.lt.s32.totalorder %s11373_s13, %s11373_s13 }
  0xb1   : > { %p11376_p0 = pnand %p11374_p13, %p11706_p11  ;;  %p11383_p5 = por %p11382_p3, %p11381_p2 }
  0xb3   : > { %p11377_p1 = pneg %p11376_p0 }
  0xb5   : > { %p11384_p8 = pnand %p11383_p5, %p11377_p1 }
  0xb7   : > { %11387 = shalt.err (!%p11384_p8)
}
  0xb8   : > { %10217 = dma.hbm_to_vmem [thread:$0]  (!%p11690_p9), %s12900_s3, 38400, %s440_s25, [#allocation6], %s11553_s14, %s11553_s14, %s11554_s11  }
  0xb9   : > { %s11388_s15 = scalar_lea.hbm %s12902_s5, 25600 }
  0xba   : > { %p11389_p10 = scmp.ne.s32.totalorder %s12902_s5, %s11388_s15  ;;  %p11395_p4 = scmp.lt.u32.totalorder %s11388_s15, %s12902_s5 }
  0xbc   : > { %p11391_p12 = pnand %p11389_p10, %p11706_p11 }
  0xbe   : > { %p11392_p6 = pneg %p11391_p12 }
  0xc0   : > { %p11397_p7 = pnand %p11395_p4, %p11392_p6 }
  0xc2   : > { %11400 = shalt.err (!%p11397_p7)
}
  0xc3   : > { %s11401_s29 = scalar_lea.vmem %s464_s23, 25600  ;;  %p11409_p2 = scmp.lt.s32.totalorder %s464_s23, %s464_s23 }
  0xc4   : > { %p11402_p13 = scmp.ne.s32.totalorder %s464_s23, %s11401_s29  ;;  %p11410_p3 = scmp.lt.s32.totalorder %s11401_s29, %s11401_s29 }
  0xc6   : > { %p11404_p0 = pnand %p11402_p13, %p11706_p11  ;;  %p11411_p5 = por %p11410_p3, %p11409_p2 }
  0xc8   : > { %p11405_p1 = pneg %p11404_p0 }
  0xca   : > { %p11412_p8 = pnand %p11411_p5, %p11405_p1 }
  0xcc   : > { %11415 = shalt.err (!%p11412_p8)
}
  0xcd   : > { %10223 = dma.hbm_to_vmem [thread:$0]  (!%p11690_p9), %s12902_s5, 25600, %s464_s23, [#allocation9], %s11553_s14, %s11553_s14, %s11554_s11  }
  0xce   : > { %s11557_s13 = smov [#allocation13]   ;;  %s11416_s12 = scalar_lea.hbm %s12904_s7, 4096 }
  0xcf   : > { %s487_s4 = sshll.u32 %s11557_s13, 4  ;;  %p11417_p10 = scmp.ne.s32.totalorder %s12904_s7, %s11416_s12  ;;  %s488_s4 = int_to_ptr.vmem [resolvable:$true] %s487_s4 }
  0xd0   : > { %p11423_p4 = scmp.lt.u32.totalorder %s11416_s12, %s12904_s7 }
  0xd1   : > { %p11419_p12 = pnand %p11417_p10, %p11706_p11 }
  0xd3   : > { %p11420_p6 = pneg %p11419_p12 }
  0xd5   : > { %p11425_p7 = pnand %p11423_p4, %p11420_p6 }
  0xd7   : > { %11428 = shalt.err (!%p11425_p7)
}
  0xd8   : > { %s11429_s14 = scalar_lea.vmem %s488_s4, 4096  ;;  %p11437_p2 = scmp.lt.s32.totalorder %s488_s4, %s488_s4 }
  0xd9   : > { %p11430_p13 = scmp.ne.s32.totalorder %s488_s4, %s11429_s14  ;;  %p11438_p3 = scmp.lt.s32.totalorder %s11429_s14, %s11429_s14 }
  0xdb   : > { %p11432_p0 = pnand %p11430_p13, %p11706_p11  ;;  %p11439_p5 = por %p11438_p3, %p11437_p2 }
  0xdd   : > { %p11433_p1 = pneg %p11432_p0 }
  0xdf   : > { %p11440_p8 = pnand %p11439_p5, %p11433_p1 }
  0xe1   : > { %11443 = shalt.err (!%p11440_p8)
}
  0xe2   : > { %s11558_s11 = smov 64   ;;  %s11559_s23 = smov 4  }
  0xe3   : > { %10229 = dma.hbm_to_vmem [thread:$0]  (!%p11690_p9), %s12904_s7, 4096, %s488_s4, [#allocation12], %s11558_s11, %s11558_s11, %s11559_s23  }
  0xe4   : > { %s11560_s25 = smov [#allocation16]   ;;  %s11561_s13 = smov [#allocation17]  }
  0xe5   : > { %s511_s24 = sshll.u32 %s11560_s25, 4  ;;  %s525_s6 = sshll.u32 %s11561_s13, 4  ;;  %s512_s24 = int_to_ptr.vmem [resolvable:$true] %s511_s24  ;;  %s11867_s6 = int_to_ptr.vmem [resolvable:$true] %s525_s6 }
  0xe6   : > { %s11444_s15 = scalar_lea.hbm %s12906_s9, 1024 }
  0xe7   : > { %p11445_p10 = scmp.ne.s32.totalorder %s12906_s9, %s11444_s15  ;;  %p11451_p4 = scmp.lt.u32.totalorder %s11444_s15, %s12906_s9 }
  0xe9   : > { %p11447_p12 = pnand %p11445_p10, %p11706_p11 }
  0xeb   : > { %p11448_p6 = pneg %p11447_p12 }
  0xed   : > { %p11453_p7 = pnand %p11451_p4, %p11448_p6 }
  0xef   : > { %11456 = shalt.err (!%p11453_p7)
}
  0xf0   : > { %s11457_s14 = scalar_lea.vmem %s512_s24, 1024  ;;  %p11465_p2 = scmp.lt.s32.totalorder %s512_s24, %s512_s24 }
  0xf1   : > { %p11458_p13 = scmp.ne.s32.totalorder %s512_s24, %s11457_s14  ;;  %p11466_p3 = scmp.lt.s32.totalorder %s11457_s14, %s11457_s14 }
  0xf3   : > { %p11460_p0 = pnand %p11458_p13, %p11706_p11  ;;  %p11467_p5 = por %p11466_p3, %p11465_p2 }
  0xf5   : > { %p11461_p1 = pneg %p11460_p0 }
  0xf7   : > { %p11468_p8 = pnand %p11467_p5, %p11461_p1 }
  0xf9   : > { %11471 = shalt.err (!%p11468_p8)
}
  0xfa   : > { %10235 = dma.hbm_to_vmem [thread:$0]  (!%p11690_p9), %s12906_s9, 1024, %s512_s24, [#allocation15], %s11558_s11, %s11558_s11, %s11559_s23  }
  0xfb   : > { %s11472_s8 = scalar_lea.hbm %s12907_s10, 16 }
  0xfc   : > { %p11473_p10 = scmp.ne.s32.totalorder %s12907_s10, %s11472_s8  ;;  %p11479_p4 = scmp.lt.u32.totalorder %s11472_s8, %s12907_s10 }
  0xfe   : > { %p11475_p12 = pnand %p11473_p10, %p11706_p11 }
 0x100   : > { %p11476_p6 = pneg %p11475_p12 }
 0x102   : > { %p11481_p7 = pnand %p11479_p4, %p11476_p6 }
 0x104   : > { %11484 = shalt.err (!%p11481_p7)
}
 0x105   : > { %s11485_s11 = scalar_lea.vmem %s11867_s6, 16  ;;  %s11492_s23 = scalar_lea.vmem %s11867_s6, 32 }
 0x106   : > { %p11486_p13 = scmp.ne.s32.totalorder %s11867_s6, %s11485_s11  ;;  %p11493_p2 = scmp.lt.s32.totalorder %s11867_s6, %s11867_s6 }
 0x107   : > { %p11494_p3 = scmp.lt.s32.totalorder %s11492_s23, %s11485_s11 }
 0x108   : > { %p11488_p0 = pnand %p11486_p13, %p11706_p11 }
 0x109   : > { %p11495_p5 = por %p11494_p3, %p11493_p2 }
 0x10a   : > { %p11489_p1 = pneg %p11488_p0 }
 0x10c   : > { %p11496_p8 = pnand %p11495_p5, %p11489_p1 }
 0x10e   : > { %11499 = shalt.err (!%p11496_p8)
}
 0x10f   : > { %10238 = dma.hbm_to_vmem [thread:$0]  (!%p11690_p9), %s12907_s10, 16, %s11867_s6, [#allocation18]  }
 0x110   : > { %p8744_p10 = scmp.ge.s32.totalorder %s11546_s20, 2 }
 0x111   : > { %p12936_p11 = scmp.ne.s32.totalorder (!%p8744_p10), %s12928_s26, 0 }
 0x112   : > { %532 = sbr.rel (%p8744_p10) target bundleno = 294 (0x126), region = 56 }
 0x119   : > { %535 = sbr.rel (!%p12936_p11) target bundleno = 294 (0x126), region = 60  ;;  %s537_s30 = sand.u32 (%p12936_p11), 1, %s11542_s19  }
 0x11a   : > { %s9575_s4 = smul.u32 (%p12936_p11), 28, %s11546_s20 }
 0x11b   : > { %s10166_s14 = smul.u32 (%p12936_p11), 112, %s537_s30 }
 0x11c   : > { %s11919_s17 = scalar_lea.vmem (%p12936_p11), %s12897_s0, %s9575_s4 }
 0x11d   : > { %v558_v0 = vld [vmem:[%s11919_s17] sm:$0xff] (%p12936_p11)   ;;  %v562_v1 = vld [vmem:[%s11919_s17 + $0x8] sm:$0xff] (%p12936_p11)   ;;  %v566_v2 = vld [vmem:[%s11919_s17 + $0x10] sm:$0xff] (%p12936_p11)   ;;  %s539_s26 = scalar_lea.vmem (%p12936_p11), [#allocation2], %s10166_s14 }
 0x11e   : > { %559 = vst [vmem:[%s539_s26] sm:$0xff] (%p12936_p11), %v558_v0   ;;  %563 = vst [vmem:[%s539_s26 + $0x8] sm:$0xff] (%p12936_p11), %v562_v1   ;;  %v570_v3 = vld [vmem:[%s11919_s17 + $0x18] sm:$0xf] (%p12936_p11)  ;;  %v576_v5 = vld [vmem:[%s11919_s17 + $0x40] sm:$0xff] (%p12936_p11)  }
 0x11f   : > { %567 = vst [vmem:[%s539_s26 + $0x10] sm:$0xff] (%p12936_p11), %v566_v2   ;;  %v572_v4 = vld [vmem:[%s11919_s17 + $0x38] sm:$0xff] (%p12936_p11)   ;;  %571 = vst [vmem:[%s539_s26 + $0x18] sm:$0xf] (%p12936_p11), %v570_v3  ;;  %v580_v6 = vld [vmem:[%s11919_s17 + $0x48] sm:$0xff] (%p12936_p11)  }
 0x120   : > { %573 = vst [vmem:[%s539_s26 + $0x1c] sm:$0xff] %v572_v4   ;;  %577 = vst [vmem:[%s539_s26 + $0x24] sm:$0xff] %v576_v5   ;;  %v584_v7 = vld [vmem:[%s11919_s17 + $0x50] sm:$0xf]  ;;  %v590_v9 = vld [vmem:[%s11919_s17 + $0x78] sm:$0xff]  }
 0x121   : > { %v586_v8 = vld [vmem:[%s11919_s17 + $0x70] sm:$0xff]   ;;  %581 = vst [vmem:[%s539_s26 + $0x2c] sm:$0xff] %v580_v6   ;;  %585 = vst [vmem:[%s539_s26 + $0x34] sm:$0xf] %v584_v7  ;;  %v594_v10 = vld [vmem:[%s11919_s17 + $0x80] sm:$0xff]  }
 0x122   : > { %587 = vst [vmem:[%s539_s26 + $0x38] sm:$0xff] %v586_v8   ;;  %v598_v11 = vld [vmem:[%s11919_s17 + $0x88] sm:$0xf]  ;;  %591 = vst [vmem:[%s539_s26 + $0x40] sm:$0xff] %v590_v9   ;;  %v604_v13 = vld [vmem:[%s11919_s17 + $0xb0] sm:$0xff]  }
 0x123   : > { %595 = vst [vmem:[%s539_s26 + $0x48] sm:$0xff] %v594_v10   ;;  %599 = vst [vmem:[%s539_s26 + $0x50] sm:$0xf] %v598_v11  ;;  %v600_v12 = vld [vmem:[%s11919_s17 + $0xa8] sm:$0xff]   ;;  %v608_v14 = vld [vmem:[%s11919_s17 + $0xb8] sm:$0xff]  }
 0x124   : > { %601 = vst [vmem:[%s539_s26 + $0x54] sm:$0xff] %v600_v12   ;;  %605 = vst [vmem:[%s539_s26 + $0x5c] sm:$0xff] %v604_v13   ;;  %v612_v15 = vld [vmem:[%s11919_s17 + $0xc0] sm:$0xf] }
 0x125   : > { %609 = vst [vmem:[%s539_s26 + $0x64] sm:$0xff] %v608_v14   ;;  %613 = vst [vmem:[%s539_s26 + $0x6c] sm:$0xf] %v612_v15 }
 0x126 PF: > { %p12937_p9 = scmp.ne.s32.totalorder %s12929_s27, 0 }
 0x127   : > { %s698_s20 = sand.u32 (!%p12937_p9), 1, %s11538_s18   ;;  %p12938_p12 = scmp.eq.s32.totalorder (!%p12937_p9), %s11661_s21, 0 }
 0x128   : > { %695 = sbr.rel (%p12937_p9) target bundleno = 2646 (0xa56), region = 101 }
 0x129   : > { %s10167_s6 = smul.u32 (!%p12937_p9), 112, %s698_s20 }
 0x12b   : > { %s11940_s25 = scalar_lea.vmem (!%p12937_p9), [#allocation2], %s10167_s6 }
 0x12f   : > { %11513 = dma.done.wait (%p12938_p12), [#allocation4], 5120   ;;  %p12939_p6 = pmov %p12938_p12 }
 0x131   : > { %11515 = vsyncadd (%p12939_p6), [#allocation4], 4294962176  ;;  %p12940_p4 = pmov %p12939_p6 }
 0x133   : > { %11517 = dma.done.wait (%p12940_p4), [#allocation6], 38432   ;;  %p12941_p7 = pmov %p12940_p4 }
 0x134   : > { %p12942_p13 = pmov %p12940_p4 }
 0x135   : > { %11519 = vsyncadd (%p12941_p7), [#allocation6], 4294928864 }
 0x136   : > { %11521 = dma.done.wait (%p12942_p13), [#allocation9], 25632   ;;  %p12943_p0 = pmov %p12940_p4 }
 0x138   : > { %11523 = vsyncadd (%p12943_p0), [#allocation9], 4294941664  ;;  %p12944_p1 = pmov %p12943_p0 }
 0x139   : > { %p12945_p2 = pmov %p12943_p0 }
 0x13a   : > { %11525 = dma.done.wait (%p12944_p1), [#allocation12], 4160  }
 0x13b   : > { %11527 = vsyncadd (%p12945_p2), [#allocation12], 4294963136  ;;  %p12946_p3 = pmov %p12943_p0 }
 0x13c   : > { %p12947_p5 = pmov %p12943_p0 }
 0x13d   : > { %11529 = dma.done.wait (%p12946_p3), [#allocation15], 1040  }
 0x13e   : > { %11531 = vsyncadd (%p12947_p5), [#allocation15], 4294966256  ;;  %p12948_p8 = pmov %p12943_p0 }
 0x13f   : > { %p12949_p10 = pmov %p12943_p0 }
 0x140   : > { %11533 = dma.done.wait (%p12948_p8), [#allocation18], 16  }
 0x141   : > { %11535 = vsyncadd (%p12949_p10), [#allocation18], 4294967280  ;;  %v11562_v16 = vmov 0   ;;  %v10300_v17 = vld [vmem:[#allocation3 + $0x44] ss:$16 sps:$4 sm:$0xff]   ;;  %vm1329_vm0 = vcmask 1045504  }
 0x142   : > { %1374 = vmatprep.mubr.bf16.mxu0 %v11562_v16  ;;  %1414 = vmatprep.mubr.bf16.mxu1 %v11562_v16  ;;  %v10302_v18 = vld [vmem:[#allocation3 + $0x40] ss:$16 sps:$4 sm:$0xff]   ;;  %v10303_v19 = vld [vmem:[#allocation3 + $0x64] ss:$16 sps:$4 sm:$0x3f]   ;;  %vm1310_vm1 = vcmask 228352  }
 0x143   : > { %1342 = vmatprep.subr.bf16.mxu0 %v10300_v17  ;;  %9650 = vmatprep.subr.bf16.mxu1 %v10300_v17  ;;  %v10305_v20 = vld [vmem:[#allocation3 + $0x60] ss:$16 sps:$4 sm:$0x3f]   ;;  %v831_v21 = vld [vmem:[%s11940_s25 + $0x1c] sm:$0xf]  ;;  %vm4216_vm2 = vcmask 916480  }
 0x144   : > { %1343 = vmatpush1.bf16.msra.mxu0 %v10302_v18  ;;  %9652 = vmatpush1.bf16.msra.mxu1 %v10302_v18  ;;  %v832_v22 = vld [vmem:[%s11940_s25 + $0x20] sm:$0xf]  ;;  %v11974_v24 = vsel %vm1329_vm0, %v10305_v20, 0  ;;  %v841_v25 = vld [vmem:[%s11940_s25 + $0x44] sm:$0xf]  ;;  %vm3885_vm3 = vcmask 1043456  }
 0x145   : > { %v840_v23 = vld [vmem:[%s11940_s25 + $0x40] sm:$0xf]  ;;  %8795 = vmatprep.subr.msk.bf16.mxu0 %vm1329_vm0, %v10303_v19  ;;  %9651 = vmatprep.subr.msk.bf16.mxu1 %vm1329_vm0, %v10303_v19  ;;  %v10310_v26 = vld [vmem:[#allocation3 + $0x4c] ss:$16 sps:$4 sm:$0xff]   ;;  %v833_v27 = vld [vmem:[%s11940_s25 + $0x24] sm:$0xf]  ;;  %v11978_v28 = vcombine.low %v831_v21, %v832_v22 }
 0x146   : > { %v11980_v29 = vcombine.low %v840_v23, %v841_v25  ;;  %v10308_v30 = vld [vmem:[#allocation3 + $0x48] ss:$16 sps:$4 sm:$0xff]   ;;  %v11983_v32 = vcombine.low %v832_v22, %v833_v27  ;;  %v10314_v33 = vld [vmem:[#allocation3 + $0x6c] ss:$16 sps:$4 sm:$0x3f]   ;;  %vm6783_vm4 = vcmask 588800  }
 0x147   : > { %v834_v31 = vld [vmem:[%s11940_s25 + $0x28] sm:$0xf]  ;;  %v835_v35 = vld [vmem:[%s11940_s25 + $0x2c] sm:$0xf]  ;;  %v10324_v41 = vld [vmem:[#allocation3] ss:$16 sps:$4 sm:$0xff]  }
 0x148   : > { %1345 = vmatpush1.bf16.msra.mxu0 %v11974_v24  ;;  %9653 = vmatpush1.bf16.msra.mxu1 %v11974_v24  ;;  %v10316_v34 = vld [vmem:[#allocation3 + $0x68] ss:$16 sps:$4 sm:$0x3f]   ;;  %v11988_v36 = vcombine.low %v834_v31, %v835_v35  ;;  %v843_v38 = vld [vmem:[%s11940_s25 + $0x4c] sm:$0xf]  ;;  %v12002_v44 = vcombine.low %v833_v27, %v834_v31  ;;  %p802_p11 = scmp.lt.s32.totalorder %s11661_s21, 1 }
 0x149   : > { %1435 = vmatprep.subr.bf16.mxu1 %v10310_v26  ;;  %v842_v37 = vld [vmem:[%s11940_s25 + $0x48] sm:$0xf]  ;;  %v10322_v39 = vld [vmem:[#allocation3 + $0xc] ss:$16 sps:$4 sm:$0xff]   ;;  %v12000_v40 = vsel %vm1329_vm0, %v10316_v34, 0  ;;  %s12950_s8 = sld [smem:[#allocation31_spill]] }
 0x14a   : > { %v10326_v42 = vld [vmem:[#allocation3 + $0x4] ss:$16 sps:$4 sm:$0xff]   ;;  %v12004_v45 = vcombine.low %v842_v37, %v843_v38  ;;  %v10329_v46 = vld [vmem:[#allocation3 + $0x20] ss:$16 sps:$4 sm:$0x3f]   ;;  %s12960_s21 = smov (!%p802_p11, %s11661_s21), 1 }
 0x14b   : > { %8796 = vmatmul.mubr.msk.bf16.vlgmr.msra.gmra.mrb[0].mxu0 %vm1310_vm1, %v11978_v28  ;;  %8800 = vmatmul.mubr.msk.bf16.vlgmr.msra.gmra.mrb[0].mxu1 %vm1310_vm1, %v11980_v29  ;;  %v10327_v43 = vld [vmem:[#allocation3 + $0x24] ss:$16 sps:$4 sm:$0x3f]   ;;  %v826_v48 = vld [vmem:[%s11940_s25 + $0x8] sm:$0xf]  ;;  %v12013_v50 = vsel %vm1329_vm0, %v10329_v46, 0 }
 0x14c   : > { %1436 = vmatpush1.bf16.msra.mxu1 %v10308_v30  ;;  %1384 = vmatprep.mubr.bf16.mxu0 %v11562_v16  ;;  %v825_v47 = vld [vmem:[%s11940_s25 + $0x4] sm:$0xf]  ;;  %v827_v51 = vld [vmem:[%s11940_s25 + $0xc] sm:$0xf]  ;;  %v828_v52 = vld [vmem:[%s11940_s25 + $0x10] sm:$0xf] }
 0x14d   : > { %1424 = vmatprep.mubr.bf16.mxu1 %v11562_v16  ;;  %8802 = vmatprep.subr.msk.bf16.mxu1 %vm1329_vm0, %v10314_v33  ;;  %v12010_v49 = vcombine.low %v825_v47, %v826_v48  ;;  %v836_v53 = vld [vmem:[%s11940_s25 + $0x30] sm:$0xf]  ;;  %v12022_v54 = vcombine.low %v827_v51, %v828_v52  ;;  %v10341_v55 = vld [vmem:[#allocation3 + $0x84] ss:$16 sps:$4 sm:$0xff]   ;;  %v10320_v57 = vld [vmem:[#allocation3 + $0x8] ss:$16 sps:$4 sm:$0xff]   ;;  %v8764_v8 = vcombine.low %v826_v48, %v827_v51 }
 0x14e   : > { %1585 = vmatprep.subr.bf16.mxu0 %v10326_v42  ;;  %v12027_v56 = vcombine.low %v835_v35, %v836_v53  ;;  %v10333_v58 = vld [vmem:[#allocation3 + $0x2c] ss:$16 sps:$4 sm:$0x3f]   ;;  %v10335_v59 = vld [vmem:[#allocation3 + $0x28] ss:$16 sps:$4 sm:$0x3f]  }
 0x14f   : > { %1586 = vmatpush1.bf16.msra.mxu0 %v10324_v41  ;;  %v838_v60 = vld [vmem:[%s11940_s25 + $0x38] sm:$0xf]  ;;  %v839_v61 = vld [vmem:[%s11940_s25 + $0x3c] sm:$0xf]  ;;  %v12039_v62 = vsel %vm1329_vm0, %v10335_v59, 0  ;;  %s9576_s18 = sshll.u32 %s12960_s21, 5 }
 0x150   : > { %1438 = vmatpush1.bf16.msra.mxu1 %v12000_v40  ;;  %8817 = vmatprep.subr.msk.bf16.mxu0 %vm1329_vm0, %v10327_v43  ;;  %v10344_v63 = vld [vmem:[#allocation3 + $0x8c] ss:$16 sps:$4 sm:$0xff]   ;;  %v12041_v0 = vcombine.low %v838_v60, %v839_v61  ;;  %v824_v1 = vld [vmem:[%s11940_s25] sm:$0xf]  ;;  %v10354_v6 = vld [vmem:[#allocation3 + $0xc4] ss:$16 sps:$4 sm:$0xff]   ;;  %s806_s12 = scalar_lea.vmem %s12950_s8, %s9576_s18 }
 0x151   : > { %1678 = vmatprep.subr.bf16.mxu1 %v10322_v39  ;;  %v8763_v2 = vcombine.low %v824_v1, %v825_v47  ;;  %v10339_v3 = vld [vmem:[#allocation3 + $0x80] ss:$16 sps:$4 sm:$0xff]   ;;  %v10345_v4 = vld [vmem:[#allocation3 + $0xa4] ss:$16 sps:$4 sm:$0x3f]   ;;  %vm11564_vm5 = vmmov 0  }
 0x152   : > { %v10347_v5 = vld [vmem:[#allocation3 + $0xa0] ss:$16 sps:$4 sm:$0x3f]   ;;  %v12065_v9 = vld [vmem:[%s11940_s25 + $0x14] sm:$0xf]  ;;  %s12865_s15 = sshll.u32 %s12960_s21, 3 }
 0x153   : > { %8797 = vmatmul.mubr.msk.bf16.gmra.mrb[4].mxu0 %vm1310_vm1, %v12002_v44  ;;  %8801 = vmatmul.mubr.msk.bf16.gmra.mrb[4].mxu1 %vm1310_vm1, %v12004_v45  ;;  %v12058_v7 = vsel %vm1329_vm0, %v10347_v5, 0  ;;  %v8765_v10 = vcombine.low %v828_v52, %v12065_v9  ;;  %v10342_v11 = vld [vmem:[#allocation3 + $0x88] ss:$16 sps:$4 sm:$0xff]   ;;  %v10348_v12 = vld [vmem:[#allocation3 + $0xac] ss:$16 sps:$4 sm:$0x3f]  }
 0x154   : > { %1394 = vmatprep.mubr.bf16.mxu0 %v11562_v16  ;;  %1467 = vmatprep.mubr.bf16.mxu1 %v11562_v16  ;;  %v10350_v13 = vld [vmem:[#allocation3 + $0xa8] ss:$16 sps:$4 sm:$0x3f]   ;;  %v10358_v14 = vld [vmem:[#allocation3 + $0xcc] ss:$16 sps:$4 sm:$0xff]   ;;  %s12951_s11 = sld [smem:[#allocation32_spill]] }
 0x155   : > { %1588 = vmatpush1.bf16.msra.mxu0 %v12013_v50  ;;  %v12088_v15 = vsel %vm1329_vm0, %v10350_v13, 0  ;;  %v10352_v17 = vld [vmem:[#allocation3 + $0xc0] ss:$16 sps:$4 sm:$0xff]   ;;  %v10360_v18 = vld [vmem:[#allocation3 + $0xe4] ss:$16 sps:$4 sm:$0x3f]  }
 0x156   : > { %1828 = vmatprep.subr.bf16.mxu0 %v10341_v55  ;;  %v10362_v19 = vld [vmem:[#allocation3 + $0xe0] ss:$16 sps:$4 sm:$0x3f]   ;;  %v10368_v20 = vld [vmem:[#allocation3 + $0x104] ss:$16 sps:$4 sm:$0xff]   ;;  %s12952_s30 = sld [smem:[#allocation33_spill]] }
 0x157   : > { %v12103_v21 = vsel %vm1329_vm0, %v10362_v19, 0  ;;  %v845_v22 = vld [vmem:[%s11940_s25 + $0x54] sm:$0xf]  ;;  %v846_v23 = vld [vmem:[%s11940_s25 + $0x58] sm:$0xf]  ;;  %s12953_s16 = sld [smem:[#allocation34_spill]] }
 0x158   : > { %v12120_v25 = vcombine.low %v845_v22, %v846_v23  ;;  %v847_v26 = vld [vmem:[%s11940_s25 + $0x5c] sm:$0xf]  ;;  %v848_v27 = vld [vmem:[%s11940_s25 + $0x60] sm:$0xf]  ;;  %v849_v34 = vld [vmem:[%s11940_s25 + $0x64] sm:$0xf] }
 0x159   : > { %v12130_v30 = vcombine.low %v847_v26, %v848_v27  ;;  %v10363_v31 = vld [vmem:[#allocation3 + $0xec] ss:$16 sps:$4 sm:$0x3f]   ;;  %v10365_v33 = vld [vmem:[#allocation3 + $0xe8] ss:$16 sps:$4 sm:$0x3f]  }
 0x15a   : > { %v850_v35 = vld [vmem:[%s11940_s25 + $0x68] sm:$0xf]  ;;  %v12138_v37 = vld [vmem:[#allocation3 + $0x10c] ss:$16 sps:$4 sm:$0xff]   ;;  %v12144_v38 = vsel %vm1329_vm0, %v10365_v33, 0  ;;  %s810_s23 = scalar_lea.vmem %s12951_s11, %s12865_s15  ;;  %s12954_s20 = sld [smem:[#allocation35_spill]] }
 0x15b   : > { %8798 = vmatmul.mubr.msk.bf16.gmra.mrb[8].mxu0 %vm1310_vm1, %v12027_v56  ;;  %8803 = vmatmul.mubr.msk.bf16.vlgmr.msra.gmra.mrb[8].mxu1 %vm1310_vm1, %v11978_v28  ;;  %v12146_v39 = vcombine.low %v849_v34, %v850_v35  ;;  %v12156_v41 = vld [vmem:[#allocation3 + $0x100] ss:$16 sps:$4 sm:$0xff]   ;;  %v12158_v42 = vld [vmem:[#allocation3 + $0x124] ss:$16 sps:$4 sm:$0x3f]  }
 0x15c   : > { %1679 = vmatpush1.bf16.msra.mxu1 %v10320_v57  ;;  %1404 = vmatprep.mubr.bf16.mxu0 %v11562_v16  ;;  %v10374_v43 = vld [vmem:[#allocation3 + $0x120] ss:$16 sps:$4 sm:$0x3f]   ;;  %v11184_v46 = vld [vmem:[#allocation3 + $0x44] ss:$16 sps:$4 sm:$0xff]   ;;  %s814_s21 = scalar_lea.vmem %s12952_s30, %s12865_s15 }
 0x15d   : > { %1477 = vmatprep.mubr.bf16.mxu1 %v11562_v16  ;;  %8824 = vmatprep.subr.msk.bf16.mxu1 %vm1329_vm0, %v10333_v58  ;;  %v12191_v47 = vld [vmem:[#allocation3 + $0x108] ss:$16 sps:$4 sm:$0xff]   ;;  %v12193_v48 = vld [vmem:[#allocation3 + $0x12c] ss:$16 sps:$4 sm:$0x3f]   ;;  %s818_s29 = scalar_lea.vmem %s12953_s16, %s12865_s15 }
 0x15e   : > { %v10377_v51 = vld [vmem:[#allocation3 + $0x128] ss:$16 sps:$4 sm:$0x3f]   ;;  %v11186_v57 = vld [vmem:[#allocation3 + $0x40] ss:$16 sps:$4 sm:$0xff]  }
 0x15f   : > { %v830_v52 = vld [vmem:[%s11940_s25 + $0x18] sm:$0xf]  ;;  %v12206_v53 = vsel %vm1329_vm0, %v10377_v51, 0  ;;  %v11187_v58 = vld [vmem:[#allocation3 + $0x64] ss:$16 sps:$4 sm:$0x3f]  }
 0x160   : > { %1681 = vmatpush1.bf16.msra.mxu1 %v12039_v62  ;;  %v12209_v55 = vcombine.low %v12065_v9, %v830_v52  ;;  %v11188_v59 = vld [vmem:[#allocation3 + $0x4] ss:$16 sps:$4 sm:$0xff]   ;;  %v11189_v60 = vld [vmem:[#allocation3 + $0x48] ss:$16 sps:$4 sm:$0xff]   ;;  %v11191_v1 = vld [vmem:[%s11940_s25 + $0x30] sm:$0xf]  ;;  %s822_s6 = scalar_lea.vmem %s12954_s20, %s12865_s15 }
 0x161   : > { %1921 = vmatprep.subr.bf16.mxu1 %v10344_v63  ;;  %v11190_v61 = vld [vmem:[#allocation3 + $0x6c] ss:$16 sps:$4 sm:$0x3f]   ;;  %v11195_v13 = vld [vmem:[#allocation3 + $0x84] ss:$16 sps:$4 sm:$0xff]  }
 0x162   : > { %v11201_v19 = vld [vmem:[#allocation3 + $0xc4] ss:$16 sps:$4 sm:$0xff]   ;;  %v11204_v22 = vld [vmem:[#allocation3 + $0xcc] ss:$16 sps:$4 sm:$0xff]   ;;  %v11210_v23 = vld [vmem:[%s11940_s25 + $0x40] sm:$0xf] }
 0x163   : > { %8799 = vmatmul.mubr.msk.bf16.gmra.mrb[12].mxu0 %vm1310_vm1, %v12041_v0  ;;  %8804 = vmatmul.mubr.msk.bf16.gmra.mrb[12].mxu1 %vm1310_vm1, %v12002_v44  ;;  %v11212_v33 = vld [vmem:[%s11940_s25 + $0x44] sm:$0xf]  ;;  %v11213_v34 = vld [vmem:[%s11940_s25 + $0x48] sm:$0xf] }
 0x164   : > { %1487 = vmatprep.mubr.bf16.mxu1 %v11562_v16  ;;  %1617 = vmatprep.mubr.bf16.mxu0 %v11562_v16  ;;  %v12437_v35 = vcombine.low %v11212_v33, %v11213_v34  ;;  %v11216_v33 = vld [vmem:[%s11940_s25 + $0x5c] sm:$0xf] }
 0x16b   : > { %8805 = vmatmul.mubr.msk.bf16.gmra.mrb[16].mxu1 %vm1310_vm1, %v12027_v56  ;;  %8818 = vmatmul.mubr.msk.bf16.vlgmr.msra.gmra.mrb[0].mxu0 %vm1310_vm1, %v8763_v2 }
 0x16c   : > { %1497 = vmatprep.mubr.bf16.mxu1 %v11562_v16  ;;  %1627 = vmatprep.mubr.bf16.mxu0 %v11562_v16 }
 0x16d   : > { %1829 = vmatpush1.bf16.msra.mxu0 %v10339_v3 }
 0x16e   : > { %8839 = vmatprep.subr.msk.bf16.mxu0 %vm1329_vm0, %v10345_v4 }
 0x171   : > { %1831 = vmatpush1.bf16.msra.mxu0 %v12058_v7 }
 0x172   : > { %2119 = vmatprep.subr.bf16.mxu0 %v10354_v6  ;;  %v11192_v6 = vld [vmem:[#allocation3 + $0xc] ss:$16 sps:$4 sm:$0xff]  }
 0x173   : > { %8806 = vmatmul.mubr.msk.bf16.gmra.mrb[20].mxu1 %vm1310_vm1, %v12041_v0  ;;  %8819 = vmatmul.mubr.msk.bf16.gmra.mrb[4].mxu0 %vm1310_vm1, %v8764_v8 }
 0x174   : > { %1507 = vmatprep.mubr.bf16.mxu1 %v11562_v16  ;;  %1637 = vmatprep.mubr.bf16.mxu0 %v11562_v16 }
 0x17b   : > { %8807 = vmatmul.mubr.msk.bf16.gmra.mrb[24].mxu1 %vm1310_vm1, %v11980_v29  ;;  %8820 = vmatmul.mubr.msk.bf16.gmra.mrb[8].mxu0 %vm1310_vm1, %v8765_v10 }
 0x17c   : > { %1517 = vmatprep.mubr.bf16.mxu1 %v11562_v16  ;;  %1647 = vmatprep.mubr.bf16.mxu0 %v11562_v16 }
 0x183   : > { %8808 = vmatmul.mubr.msk.bf16.gmra.mrb[28].mxu1 %vm1310_vm1, %v12004_v45  ;;  %8821 = vmatmul.mubr.msk.bf16.gmra.mrb[12].mxu0 %vm1310_vm1, %v11978_v28 }
 0x184   : > { %1657 = vmatprep.mubr.bf16.mxu0 %v11562_v16  ;;  %1710 = vmatprep.mubr.bf16.mxu1 %v11562_v16 }
 0x18b   : > { %8822 = vmatmul.mubr.msk.bf16.gmra.mrb[16].mxu0 %vm1310_vm1, %v12002_v44  ;;  %8825 = vmatmul.mubr.msk.bf16.vlgmr.msra.gmra.mrb[8].mxu1 %vm1310_vm1, %v8763_v2 }
 0x18c   : > { %1922 = vmatpush1.bf16.msra.mxu1 %v10342_v11  ;;  %1667 = vmatprep.mubr.bf16.mxu0 %v11562_v16  ;;  %v11193_v11 = vld [vmem:[#allocation3] ss:$16 sps:$4 sm:$0xff]  }
 0x18d   : > { %1720 = vmatprep.mubr.bf16.mxu1 %v11562_v16  ;;  %8846 = vmatprep.subr.msk.bf16.mxu1 %vm1329_vm0, %v10348_v12  ;;  %v11194_v12 = vld [vmem:[#allocation3 + $0x24] ss:$16 sps:$4 sm:$0x3f]  }
 0x190   : > { %1924 = vmatpush1.bf16.msra.mxu1 %v12088_v15 }
 0x191   : > { %2212 = vmatprep.subr.bf16.mxu1 %v10358_v14  ;;  %v11197_v14 = vld [vmem:[#allocation3 + $0x2c] ss:$16 sps:$4 sm:$0x3f]  }
 0x193   : > { %8823 = vmatmul.mubr.msk.bf16.gmra.mrb[20].mxu0 %vm1310_vm1, %v12027_v56  ;;  %8826 = vmatmul.mubr.msk.bf16.gmra.mrb[12].mxu1 %vm1310_vm1, %v8764_v8 }
 0x194   : > { %1730 = vmatprep.mubr.bf16.mxu1 %v11562_v16  ;;  %1860 = vmatprep.mubr.bf16.mxu0 %v11562_v16 }
 0x19b   : > { %8827 = vmatmul.mubr.msk.bf16.gmra.mrb[16].mxu1 %vm1310_vm1, %v8765_v10  ;;  %8840 = vmatmul.mubr.msk.bf16.vlgmr.msra.gmra.mrb[0].mxu0 %vm1310_vm1, %v12041_v0 }
 0x19c   : > { %1740 = vmatprep.mubr.bf16.mxu1 %v11562_v16  ;;  %1870 = vmatprep.mubr.bf16.mxu0 %v11562_v16 }
 0x19d   : > { %2120 = vmatpush1.bf16.msra.mxu0 %v10352_v17  ;;  %v11198_v17 = vld [vmem:[#allocation3 + $0x8c] ss:$16 sps:$4 sm:$0xff]  }
 0x19e   : > { %8861 = vmatprep.subr.msk.bf16.mxu0 %vm1329_vm0, %v10360_v18  ;;  %v11200_v18 = vld [vmem:[#allocation3 + $0xa4] ss:$16 sps:$4 sm:$0x3f]  }
 0x1a1   : > { %2122 = vmatpush1.bf16.msra.mxu0 %v12103_v21 }
 0x1a2   : > { %2410 = vmatprep.subr.bf16.mxu0 %v10368_v20  ;;  %v11203_v20 = vld [vmem:[#allocation3 + $0xac] ss:$16 sps:$4 sm:$0x3f]  }
 0x1a3   : > { %8828 = vmatmul.mubr.msk.bf16.gmra.mrb[20].mxu1 %vm1310_vm1, %v11978_v28  ;;  %8841 = vmatmul.mubr.msk.bf16.gmra.mrb[4].mxu0 %vm1310_vm1, %v11980_v29  ;;  %v10356_v28 = vld [vmem:[#allocation3 + $0xc8] ss:$16 sps:$4 sm:$0xff]  }
 0x1a4   : > { %1750 = vmatprep.mubr.bf16.mxu1 %v11562_v16  ;;  %1880 = vmatprep.mubr.bf16.mxu0 %v11562_v16 }
 0x1ab   : > { %8829 = vmatmul.mubr.msk.bf16.gmra.mrb[24].mxu1 %vm1310_vm1, %v12002_v44  ;;  %8842 = vmatmul.mubr.msk.bf16.gmra.mrb[8].mxu0 %vm1310_vm1, %v12004_v45  ;;  %v12170_v44 = vsel %vm1329_vm0, %v10374_v43, 0  ;;  %v11214_v43 = vld [vmem:[%s11940_s25 + $0x4c] sm:$0xf] }
 0x1ac   : > { %1760 = vmatprep.mubr.bf16.mxu1 %v11562_v16  ;;  %1890 = vmatprep.mubr.bf16.mxu0 %v11562_v16 }
 0x1b3   : > { %8830 = vmatmul.mubr.msk.bf16.gmra.mrb[28].mxu1 %vm1310_vm1, %v12027_v56  ;;  %8843 = vmatmul.mubr.msk.bf16.gmra.mrb[12].mxu0 %vm1310_vm1, %v12120_v25  ;;  %v11185_v56 = vld [vmem:[#allocation3 + $0x4c] ss:$16 sps:$4 sm:$0xff]  }
 0x1b4   : > { %1900 = vmatprep.mubr.bf16.mxu0 %v11562_v16  ;;  %1953 = vmatprep.mubr.bf16.mxu1 %v11562_v16 }
 0x1bb   : > { %8844 = vmatmul.mubr.msk.bf16.gmra.mrb[16].mxu0 %vm1310_vm1, %v12130_v30  ;;  %8847 = vmatmul.mubr.msk.bf16.vlgmr.msra.gmra.mrb[8].mxu1 %vm1310_vm1, %v12041_v0 }
 0x1bc   : > { %2213 = vmatpush1.bf16.msra.mxu1 %v10356_v28  ;;  %1910 = vmatprep.mubr.bf16.mxu0 %v11562_v16 }
 0x1bd   : > { %1963 = vmatprep.mubr.bf16.mxu1 %v11562_v16  ;;  %8868 = vmatprep.subr.msk.bf16.mxu1 %vm1329_vm0, %v10363_v31 }
 0x1c0   : > { %2215 = vmatpush1.bf16.msra.mxu1 %v12144_v38 }
 0x1c1   : > { %2503 = vmatprep.subr.bf16.mxu1 %v12138_v37 }
 0x1c3   : > { %8845 = vmatmul.mubr.msk.bf16.gmra.mrb[20].mxu0 %vm1310_vm1, %v12146_v39  ;;  %8848 = vmatmul.mubr.msk.bf16.gmra.mrb[12].mxu1 %vm1310_vm1, %v11980_v29 }
 0x1c4   : > { %1973 = vmatprep.mubr.bf16.mxu1 %v11562_v16  ;;  %2151 = vmatprep.mubr.bf16.mxu0 %v11562_v16 }
 0x1cb   : > { %8849 = vmatmul.mubr.msk.bf16.gmra.mrb[16].mxu1 %vm1310_vm1, %v12004_v45  ;;  %8862 = vmatmul.mubr.msk.bf16.vlgmr.msra.gmra.mrb[0].mxu0 %vm1310_vm1, %v12120_v25 }
 0x1cc   : > { %1983 = vmatprep.mubr.bf16.mxu1 %v11562_v16  ;;  %2161 = vmatprep.mubr.bf16.mxu0 %v11562_v16 }
 0x1cd   : > { %2411 = vmatpush1.bf16.msra.mxu0 %v12156_v41 }
 0x1ce   : > { %8883 = vmatprep.subr.msk.bf16.mxu0 %vm1329_vm0, %v12158_v42 }
 0x1d1   : > { %2413 = vmatpush1.bf16.msra.mxu0 %v12170_v44 }
 0x1d2   : > { %2721 = vmatprep.subr.bf16.mxu0 %v11184_v46 }
 0x1d3   : > { %8850 = vmatmul.mubr.msk.bf16.gmra.mrb[20].mxu1 %vm1310_vm1, %v12120_v25  ;;  %8863 = vmatmul.mubr.msk.bf16.gmra.mrb[4].mxu0 %vm1310_vm1, %v12130_v30 }
 0x1d4   : > { %1993 = vmatprep.mubr.bf16.mxu1 %v11562_v16  ;;  %2171 = vmatprep.mubr.bf16.mxu0 %v11562_v16 }
 0x1db   : > { %8851 = vmatmul.mubr.msk.bf16.gmra.mrb[24].mxu1 %vm1310_vm1, %v12130_v30  ;;  %8864 = vmatmul.mubr.msk.bf16.gmra.mrb[8].mxu0 %vm1310_vm1, %v12146_v39 }
 0x1dc   : > { %2003 = vmatprep.mubr.bf16.mxu1 %v11562_v16  ;;  %2181 = vmatprep.mubr.bf16.mxu0 %v11562_v16 }
 0x1e3   : > { %8852 = vmatmul.mubr.msk.bf16.gmra.mrb[28].mxu1 %vm1310_vm1, %v12146_v39  ;;  %8865 = vmatmul.mubr.msk.bf16.gmra.mrb[12].mxu0 %vm1310_vm1, %v12010_v49 }
 0x1e4   : > { %2191 = vmatprep.mubr.bf16.mxu0 %v11562_v16  ;;  %2244 = vmatprep.mubr.bf16.mxu1 %v11562_v16 }
 0x1eb   : > { %8866 = vmatmul.mubr.msk.bf16.gmra.mrb[16].mxu0 %vm1310_vm1, %v12022_v54  ;;  %8869 = vmatmul.mubr.msk.bf16.vlgmr.msra.gmra.mrb[8].mxu1 %vm1310_vm1, %v12120_v25 }
 0x1ec   : > { %2504 = vmatpush1.bf16.msra.mxu1 %v12191_v47  ;;  %2201 = vmatprep.mubr.bf16.mxu0 %v11562_v16 }
 0x1ed   : > { %2254 = vmatprep.mubr.bf16.mxu1 %v11562_v16  ;;  %8890 = vmatprep.subr.msk.bf16.mxu1 %vm1329_vm0, %v12193_v48 }
 0x1f0   : > { %2506 = vmatpush1.bf16.msra.mxu1 %v12206_v53 }
 0x1f1   : > { %2814 = vmatprep.subr.bf16.mxu1 %v11185_v56 }
 0x1f3   : > { %8867 = vmatmul.mubr.msk.bf16.gmra.mrb[20].mxu0 %vm1310_vm1, %v12209_v55  ;;  %8870 = vmatmul.mubr.msk.bf16.gmra.mrb[12].mxu1 %vm1310_vm1, %v12130_v30 }
 0x1f4   : > { %2264 = vmatprep.mubr.bf16.mxu1 %v11562_v16  ;;  %2442 = vmatprep.mubr.bf16.mxu0 %v11562_v16 }
 0x1fb   : > { %8871 = vmatmul.mubr.msk.bf16.gmra.mrb[16].mxu1 %vm1310_vm1, %v12146_v39  ;;  %8884 = vmatmul.mubr.msk.bf16.vlgmr.msra.gmra.mrb[0].mxu0 %vm1310_vm1, %v12010_v49 }
 0x1fc   : > { %2274 = vmatprep.mubr.bf16.mxu1 %v11562_v16  ;;  %2452 = vmatprep.mubr.bf16.mxu0 %v11562_v16 }
 0x1fd   : > { %2722 = vmatpush1.bf16.msra.mxu0 %v11186_v57 }
 0x1fe   : > { %8897 = vmatprep.subr.msk.bf16.mxu0 %vm1329_vm0, %v11187_v58 }
 0x201   : > { %2724 = vmatpush1.bf16.msra.mxu0 %v11974_v24  ;;  %v837_v24 = vld [vmem:[%s11940_s25 + $0x34] sm:$0xf] }
 0x202   : > { %2907 = vmatprep.subr.bf16.mxu0 %v11188_v59  ;;  %v12255_v2 = vcombine.low %v11191_v1, %v837_v24 }
 0x203   : > { %8872 = vmatmul.mubr.msk.bf16.gmra.mrb[20].mxu1 %vm1310_vm1, %v12010_v49  ;;  %8885 = vmatmul.mubr.msk.bf16.gmra.mrb[4].mxu0 %vm1310_vm1, %v12022_v54 }
 0x204   : > { %2284 = vmatprep.mubr.bf16.mxu1 %v11562_v16  ;;  %2462 = vmatprep.mubr.bf16.mxu0 %v11562_v16 }
 0x20b   : > { %8873 = vmatmul.mubr.msk.bf16.gmra.mrb[24].mxu1 %vm1310_vm1, %v12022_v54  ;;  %8886 = vmatmul.mubr.msk.bf16.gmra.mrb[8].mxu0 %vm1310_vm1, %v12209_v55 }
 0x20c   : > { %2294 = vmatprep.mubr.bf16.mxu1 %v11562_v16  ;;  %2472 = vmatprep.mubr.bf16.mxu0 %v11562_v16 }
 0x213   : > { %8874 = vmatmul.mubr.msk.bf16.gmra.mrb[28].mxu1 %vm1310_vm1, %v12209_v55  ;;  %8887 = vmatmul.mubr.msk.bf16.gmra.mrb[12].mxu0 %vm1310_vm1, %v11983_v32 }
 0x214   : > { %2482 = vmatprep.mubr.bf16.mxu0 %v11562_v16  ;;  %2535 = vmatprep.mubr.bf16.mxu1 %v11562_v16 }
 0x21b   : > { %8888 = vmatmul.mubr.msk.bf16.gmra.mrb[16].mxu0 %vm1310_vm1, %v11988_v36  ;;  %8891 = vmatmul.mubr.msk.bf16.vlgmr.msra.gmra.mrb[8].mxu1 %vm1310_vm1, %v12010_v49 }
 0x21c   : > { %2815 = vmatpush1.bf16.msra.mxu1 %v11189_v60  ;;  %2492 = vmatprep.mubr.bf16.mxu0 %v11562_v16 }
 0x21d   : > { %2545 = vmatprep.mubr.bf16.mxu1 %v11562_v16  ;;  %8904 = vmatprep.subr.msk.bf16.mxu1 %vm1329_vm0, %v11190_v61 }
 0x21e   : > { %v12252_v63 = vpop.f32.mrb[0].mxu1 }
 0x21f   : > { %v12257_v3 = vpop.f32.mrb[1].mxu1 }
 0x220   : > { %v12259_v4 = vpop.f32.mrb[2].mxu1  ;;  %2817 = vmatpush1.bf16.msra.mxu1 %v12000_v40 }
 0x221   : > { %v12262_v5 = vpop.f32.mrb[3].mxu1  ;;  %3000 = vmatprep.subr.bf16.mxu1 %v11192_v6 }
 0x223   : > { %8889 = vmatmul.mubr.msk.bf16.gmra.mrb[20].mxu0 %vm1310_vm1, %v12255_v2  ;;  %8892 = vmatmul.mubr.msk.bf16.gmra.mrb[12].mxu1 %vm1310_vm1, %v12022_v54 }
 0x224   : > { %2555 = vmatprep.mubr.bf16.mxu1 %v11562_v16  ;;  %2753 = vmatprep.mubr.bf16.mxu0 %v11562_v16 }
 0x226   : > { %v12270_v8 = vpop.f32.mrb[4].mxu1 }
 0x227   : > { %v12272_v9 = vpop.f32.mrb[5].mxu1 }
 0x228   : > { %v12274_v10 = vpop.f32.mrb[6].mxu1 }
 0x229   : > { %v12276_v40 = vpop.f32.mrb[7].mxu1 }
 0x22b   : > { %8893 = vmatmul.mubr.msk.bf16.gmra.mrb[16].mxu1 %vm1310_vm1, %v12209_v55  ;;  %8898 = vmatmul.mubr.msk.bf16.vlgmr.msra.gmra.mrb[24].mxu0 %vm1310_vm1, %v12120_v25 }
 0x22c   : > { %2565 = vmatprep.mubr.bf16.mxu1 %v11562_v16  ;;  %2763 = vmatprep.mubr.bf16.mxu0 %v11562_v16 }
 0x22d   : > { %2908 = vmatpush1.bf16.msra.mxu0 %v11193_v11 }
 0x22e   : > { %8911 = vmatprep.subr.msk.bf16.mxu0 %vm1329_vm0, %v11194_v12 }
 0x231   : > { %2910 = vmatpush1.bf16.msra.mxu0 %v12013_v50  ;;  %v11196_v50 = vld [vmem:[#allocation3 + $0x8] ss:$16 sps:$4 sm:$0xff]  }
 0x232   : > { %3093 = vmatprep.subr.bf16.mxu0 %v11195_v13 }
 0x233   : > { %8894 = vmatmul.mubr.msk.bf16.gmra.mrb[20].mxu1 %vm1310_vm1, %v11983_v32  ;;  %8899 = vmatmul.mubr.msk.bf16.gmra.mrb[28].mxu0 %vm1310_vm1, %v12130_v30 }
 0x234   : > { %2575 = vmatprep.mubr.bf16.mxu1 %v11562_v16  ;;  %2773 = vmatprep.mubr.bf16.mxu0 %v11562_v16 }
 0x23b   : > { %8895 = vmatmul.mubr.msk.bf16.gmra.mrb[24].mxu1 %vm1310_vm1, %v11988_v36  ;;  %8900 = vmatmul.mubr.msk.bf16.gmra.mrb[32].mxu0 %vm1310_vm1, %v12146_v39 }
 0x23c   : > { %2585 = vmatprep.mubr.bf16.mxu1 %v11562_v16  ;;  %2783 = vmatprep.mubr.bf16.mxu0 %v11562_v16 }
 0x243   : > { %8896 = vmatmul.mubr.msk.bf16.gmra.mrb[28].mxu1 %vm1310_vm1, %v12255_v2  ;;  %8901 = vmatmul.mubr.msk.bf16.gmra.mrb[36].mxu0 %vm1310_vm1, %v12010_v49 }
 0x244   : > { %2793 = vmatprep.mubr.bf16.mxu0 %v11562_v16  ;;  %2846 = vmatprep.mubr.bf16.mxu1 %v11562_v16 }
 0x24b   : > { %8902 = vmatmul.mubr.msk.bf16.gmra.mrb[40].mxu0 %vm1310_vm1, %v12022_v54  ;;  %8905 = vmatmul.mubr.msk.bf16.vlgmr.msra.gmra.mrb[32].mxu1 %vm1310_vm1, %v12120_v25 }
 0x24c   : > { %3001 = vmatpush1.bf16.msra.mxu1 %v11196_v50  ;;  %2803 = vmatprep.mubr.bf16.mxu0 %v11562_v16 }
 0x24d   : > { %2856 = vmatprep.mubr.bf16.mxu1 %v11562_v16  ;;  %8918 = vmatprep.subr.msk.bf16.mxu1 %vm1329_vm0, %v11197_v14 }
 0x250   : > { %3003 = vmatpush1.bf16.msra.mxu1 %v12039_v62  ;;  %v11199_v62 = vld [vmem:[#allocation3 + $0x80] ss:$16 sps:$4 sm:$0xff]  }
 0x251   : > { %3186 = vmatprep.subr.bf16.mxu1 %v11198_v17 }
 0x253   : > { %8903 = vmatmul.mubr.msk.bf16.gmra.mrb[44].mxu0 %vm1310_vm1, %v12209_v55  ;;  %8906 = vmatmul.mubr.msk.bf16.gmra.mrb[36].mxu1 %vm1310_vm1, %v12130_v30 }
 0x254   : > { %2866 = vmatprep.mubr.bf16.mxu1 %v11562_v16  ;;  %2939 = vmatprep.mubr.bf16.mxu0 %v11562_v16 }
 0x25b   : > { %8907 = vmatmul.mubr.msk.bf16.gmra.mrb[40].mxu1 %vm1310_vm1, %v12146_v39  ;;  %8912 = vmatmul.mubr.msk.bf16.vlgmr.msra.gmra.mrb[24].mxu0 %vm1310_vm1, %v12041_v0 }
 0x25c   : > { %2876 = vmatprep.mubr.bf16.mxu1 %v11562_v16  ;;  %2949 = vmatprep.mubr.bf16.mxu0 %v11562_v16 }
 0x25d   : > { %3094 = vmatpush1.bf16.msra.mxu0 %v11199_v62 }
 0x25e   : > { %8925 = vmatprep.subr.msk.bf16.mxu0 %vm1329_vm0, %v11200_v18 }
 0x261   : > { %3096 = vmatpush1.bf16.msra.mxu0 %v12058_v7  ;;  %v11202_v7 = vld [vmem:[#allocation3 + $0x88] ss:$16 sps:$4 sm:$0xff]  }
 0x262   : > { %3336 = vmatprep.subr.bf16.mxu0 %v11201_v19 }
 0x263   : > { %8908 = vmatmul.mubr.msk.bf16.gmra.mrb[44].mxu1 %vm1310_vm1, %v12010_v49  ;;  %8913 = vmatmul.mubr.msk.bf16.gmra.mrb[28].mxu0 %vm1310_vm1, %v11980_v29 }
 0x264   : > { %2886 = vmatprep.mubr.bf16.mxu1 %v11562_v16  ;;  %2959 = vmatprep.mubr.bf16.mxu0 %v11562_v16 }
 0x26b   : > { %8909 = vmatmul.mubr.msk.bf16.gmra.mrb[48].mxu1 %vm1310_vm1, %v12022_v54  ;;  %8914 = vmatmul.mubr.msk.bf16.gmra.mrb[32].mxu0 %vm1310_vm1, %v12004_v45 }
 0x26c   : > { %2896 = vmatprep.mubr.bf16.mxu1 %v11562_v16  ;;  %2969 = vmatprep.mubr.bf16.mxu0 %v11562_v16 }
 0x273   : > { %8910 = vmatmul.mubr.msk.bf16.gmra.mrb[52].mxu1 %vm1310_vm1, %v12209_v55  ;;  %8915 = vmatmul.mubr.msk.bf16.gmra.mrb[36].mxu0 %vm1310_vm1, %v12120_v25 }
 0x274   : > { %2979 = vmatprep.mubr.bf16.mxu0 %v11562_v16  ;;  %3032 = vmatprep.mubr.bf16.mxu1 %v11562_v16 }
 0x27b   : > { %8916 = vmatmul.mubr.msk.bf16.gmra.mrb[40].mxu0 %vm1310_vm1, %v12130_v30  ;;  %8919 = vmatmul.mubr.msk.bf16.vlgmr.msra.gmra.mrb[32].mxu1 %vm1310_vm1, %v12041_v0  ;;  %v11205_v0 = vld [vmem:[#allocation3 + $0xc0] ss:$16 sps:$4 sm:$0xff]  }
 0x27c   : > { %3187 = vmatpush1.bf16.msra.mxu1 %v11202_v7  ;;  %2989 = vmatprep.mubr.bf16.mxu0 %v11562_v16 }
 0x27d   : > { %3042 = vmatprep.mubr.bf16.mxu1 %v11562_v16  ;;  %8932 = vmatprep.subr.msk.bf16.mxu1 %vm1329_vm0, %v11203_v20 }
 0x280   : > { %3189 = vmatpush1.bf16.msra.mxu1 %v12088_v15  ;;  %v11206_v15 = vld [vmem:[#allocation3 + $0xe4] ss:$16 sps:$4 sm:$0x3f]  }
 0x281   : > { %3429 = vmatprep.subr.bf16.mxu1 %v11204_v22 }
 0x283   : > { %8917 = vmatmul.mubr.msk.bf16.gmra.mrb[44].mxu0 %vm1310_vm1, %v12146_v39  ;;  %8920 = vmatmul.mubr.msk.bf16.gmra.mrb[36].mxu1 %vm1310_vm1, %v11980_v29  ;;  %v11207_v29 = vld [vmem:[#allocation3 + $0x104] ss:$16 sps:$4 sm:$0xff]  }
 0x284   : > { %3052 = vmatprep.mubr.bf16.mxu1 %v11562_v16  ;;  %3125 = vmatprep.mubr.bf16.mxu0 %v11562_v16 }
 0x28b   : > { %8921 = vmatmul.mubr.msk.bf16.gmra.mrb[40].mxu1 %vm1310_vm1, %v12004_v45  ;;  %8926 = vmatmul.mubr.msk.bf16.vlgmr.msra.gmra.mrb[24].mxu0 %vm1310_vm1, %v12010_v49  ;;  %v11208_v45 = vld [vmem:[#allocation3 + $0xc8] ss:$16 sps:$4 sm:$0xff]  }
 0x28c   : > { %3062 = vmatprep.mubr.bf16.mxu1 %v11562_v16  ;;  %3135 = vmatprep.mubr.bf16.mxu0 %v11562_v16 }
 0x28d   : > { %3337 = vmatpush1.bf16.msra.mxu0 %v11205_v0 }
 0x28e   : > { %8939 = vmatprep.subr.msk.bf16.mxu0 %vm1329_vm0, %v11206_v15 }
 0x291   : > { %3339 = vmatpush1.bf16.msra.mxu0 %v12103_v21  ;;  %v11209_v21 = vld [vmem:[#allocation3 + $0xec] ss:$16 sps:$4 sm:$0x3f]  }
 0x292   : > { %3579 = vmatprep.subr.bf16.mxu0 %v11207_v29 }
 0x293   : > { %8922 = vmatmul.mubr.msk.bf16.gmra.mrb[44].mxu1 %vm1310_vm1, %v12120_v25  ;;  %8927 = vmatmul.mubr.msk.bf16.gmra.mrb[28].mxu0 %vm1310_vm1, %v12022_v54  ;;  %v11211_v25 = vld [vmem:[%s11940_s25 + $0x3c] sm:$0xf] }
 0x294   : > { %3072 = vmatprep.mubr.bf16.mxu1 %v11562_v16  ;;  %3145 = vmatprep.mubr.bf16.mxu0 %v11562_v16  ;;  %v12423_v26 = vcombine.low %v11211_v25, %v11210_v23 }
 0x29b   : > { %8923 = vmatmul.mubr.msk.bf16.gmra.mrb[48].mxu1 %vm1310_vm1, %v12130_v30  ;;  %8928 = vmatmul.mubr.msk.bf16.gmra.mrb[32].mxu0 %vm1310_vm1, %v12209_v55 }
 0x29c   : > { %3082 = vmatprep.mubr.bf16.mxu1 %v11562_v16  ;;  %3155 = vmatprep.mubr.bf16.mxu0 %v11562_v16 }
 0x2a3   : > { %8924 = vmatmul.mubr.msk.bf16.gmra.mrb[52].mxu1 %vm1310_vm1, %v12146_v39  ;;  %8929 = vmatmul.mubr.msk.bf16.gmra.mrb[36].mxu0 %vm1310_vm1, %v11983_v32  ;;  %v844_v39 = vld [vmem:[%s11940_s25 + $0x50] sm:$0xf] }
 0x2a4   : > { %3165 = vmatprep.mubr.bf16.mxu0 %v11562_v16  ;;  %3218 = vmatprep.mubr.bf16.mxu1 %v11562_v16 }
 0x2ab   : > { %8930 = vmatmul.mubr.msk.bf16.gmra.mrb[40].mxu0 %vm1310_vm1, %v11988_v36  ;;  %8933 = vmatmul.mubr.msk.bf16.vlgmr.msra.gmra.mrb[32].mxu1 %vm1310_vm1, %v12010_v49 }
 0x2ac   : > { %3430 = vmatpush1.bf16.msra.mxu1 %v11208_v45  ;;  %3175 = vmatprep.mubr.bf16.mxu0 %v11562_v16 }
 0x2ad   : > { %3228 = vmatprep.mubr.bf16.mxu1 %v11562_v16  ;;  %8946 = vmatprep.subr.msk.bf16.mxu1 %vm1329_vm0, %v11209_v21 }
 0x2b0   : > { %3432 = vmatpush1.bf16.msra.mxu1 %v12144_v38 }
 0x2b1   : > { %3672 = vmatprep.subr.bf16.mxu1 %v12138_v37 }
 0x2b3   : > { %8931 = vmatmul.mubr.msk.bf16.gmra.mrb[44].mxu0 %vm1310_vm1, %v12255_v2  ;;  %8934 = vmatmul.mubr.msk.bf16.gmra.mrb[36].mxu1 %vm1310_vm1, %v12022_v54 }
 0x2b4   : > { %3238 = vmatprep.mubr.bf16.mxu1 %v11562_v16  ;;  %3368 = vmatprep.mubr.bf16.mxu0 %v11562_v16 }
 0x2bb   : > { %8935 = vmatmul.mubr.msk.bf16.gmra.mrb[40].mxu1 %vm1310_vm1, %v12209_v55  ;;  %8940 = vmatmul.mubr.msk.bf16.vlgmr.msra.gmra.mrb[24].mxu0 %vm1310_vm1, %v11983_v32 }
 0x2bc   : > { %3248 = vmatprep.mubr.bf16.mxu1 %v11562_v16  ;;  %3378 = vmatprep.mubr.bf16.mxu0 %v11562_v16 }
 0x2bd   : > { %3580 = vmatpush1.bf16.msra.mxu0 %v12156_v41 }
 0x2be   : > { %8953 = vmatprep.subr.msk.bf16.mxu0 %vm1329_vm0, %v12158_v42 }
 0x2c1   : > { %3582 = vmatpush1.bf16.msra.mxu0 %v12170_v44  ;;  %v12458_v44 = vcombine.low %v11214_v43, %v844_v39 }
 0x2c3   : > { %8936 = vmatmul.mubr.msk.bf16.gmra.mrb[44].mxu1 %vm1310_vm1, %v11983_v32  ;;  %8941 = vmatmul.mubr.msk.bf16.gmra.mrb[28].mxu0 %vm1310_vm1, %v11988_v36 }
 0x2c4   : > { %3258 = vmatprep.mubr.bf16.mxu1 %v11562_v16  ;;  %3388 = vmatprep.mubr.bf16.mxu0 %v11562_v16 }
 0x2cb   : > { %8937 = vmatmul.mubr.msk.bf16.gmra.mrb[48].mxu1 %vm1310_vm1, %v11988_v36  ;;  %8942 = vmatmul.mubr.msk.bf16.gmra.mrb[32].mxu0 %vm1310_vm1, %v12255_v2 }
 0x2cc   : > { %3268 = vmatprep.mubr.bf16.mxu1 %v11562_v16  ;;  %3398 = vmatprep.mubr.bf16.mxu0 %v11562_v16 }
 0x2ce   : > { %v2444_v49 = vpop.f32.mrb[0].mxu0 }
 0x2cf   : > { %v2446_v54 = vpop.f32.mrb[1].mxu0 }
 0x2d0   : > { %v2448_v27 = vpop.f32.mrb[2].mxu0 }
 0x2d1   : > { %v2450_v28 = vpop.f32.mrb[3].mxu0 }
 0x2d3   : > { %8938 = vmatmul.mubr.msk.bf16.gmra.mrb[52].mxu1 %vm1310_vm1, %v12255_v2  ;;  %8943 = vmatmul.mubr.msk.bf16.gmra.mrb[36].mxu0 %vm1310_vm1, %v12423_v26 }
 0x2d4   : > { %3408 = vmatprep.mubr.bf16.mxu0 %v11562_v16  ;;  %3461 = vmatprep.mubr.bf16.mxu1 %v11562_v16 }
 0x2d6   : > { %v12431_v30 = vpop.f32.mrb[4].mxu0 }
 0x2d7   : > { %v12433_v31 = vpop.f32.mrb[5].mxu0 }
 0x2d8   : > { %v12439_v37 = vpop.f32.mrb[6].mxu0 }
 0x2d9   : > { %v12441_v38 = vpop.f32.mrb[7].mxu0 }
 0x2db   : > { %8944 = vmatmul.mubr.msk.bf16.gmra.mrb[40].mxu0 %vm1310_vm1, %v12437_v35  ;;  %8947 = vmatmul.mubr.msk.bf16.vlgmr.msra.gmra.mrb[32].mxu1 %vm1310_vm1, %v11983_v32 }
 0x2dc   : > { %3673 = vmatpush1.bf16.msra.mxu1 %v12191_v47  ;;  %3418 = vmatprep.mubr.bf16.mxu0 %v11562_v16 }
 0x2dd   : > { %3471 = vmatprep.mubr.bf16.mxu1 %v11562_v16  ;;  %8960 = vmatprep.subr.msk.bf16.mxu1 %vm1329_vm0, %v12193_v48 }
 0x2de   : > { %v12453_v41 = vpop.f32.mrb[8].mxu0 }
 0x2df   : > { %v12455_v42 = vpop.f32.mrb[9].mxu0 }
 0x2e0   : > { %v12460_v46 = vpop.f32.mrb[10].mxu0  ;;  %3675 = vmatpush1.bf16.msra.mxu1 %v12206_v53 }
 0x2e1   : > { %v12463_v32 = vpop.f32.mrb[11].mxu0 }
 0x2e3   : > { %8945 = vmatmul.mubr.msk.bf16.gmra.mrb[44].mxu0 %vm1310_vm1, %v12458_v44  ;;  %8948 = vmatmul.mubr.msk.bf16.gmra.mrb[36].mxu1 %vm1310_vm1, %v11988_v36 }
 0x2e4   : > { %3481 = vmatprep.mubr.bf16.mxu1 %v11562_v16  ;;  %3611 = vmatprep.mubr.bf16.mxu0 %v11562_v16 }
 0x2e6   : > { %v2474_v47 = vpop.f32.mrb[12].mxu0 }
 0x2e7   : > { %v2476_v48 = vpop.f32.mrb[13].mxu0 }
 0x2e8   : > { %v2478_v51 = vpop.f32.mrb[14].mxu0 }
 0x2e9   : > { %v2480_v52 = vpop.f32.mrb[15].mxu0 }
 0x2eb   : > { %8949 = vmatmul.mubr.msk.bf16.gmra.mrb[40].mxu1 %vm1310_vm1, %v12255_v2  ;;  %8954 = vmatmul.mubr.msk.bf16.vlgmr.msra.gmra.mrb[24].mxu0 %vm1310_vm1, %v12423_v26 }
 0x2ec   : > { %3491 = vmatprep.mubr.bf16.mxu1 %v11562_v16  ;;  %3621 = vmatprep.mubr.bf16.mxu0 %v11562_v16 }
 0x2ee   : > { %v2484_v53 = vpop.f32.mrb[16].mxu0  ;;  %v2537_v36 = vpop.f32.mrb[8].mxu1 }
 0x2ef   : > { %v9654_v55 = vadd.f32 %v2484_v53, %v12252_v63  ;;  %v2644_v56 = vmax.f32 %v2444_v49, %v2537_v36  ;;  %v2486_v57 = vpop.f32.mrb[17].mxu0  ;;  %v2539_v58 = vpop.f32.mrb[9].mxu1  ;;  %v2681_v49 = vlaneseq }
 0x2f0   : > { %v9655_v59 = vadd.f32 %v2486_v57, %v12257_v3  ;;  %v2645_v24 = vmax.f32 %v2446_v54, %v2539_v58  ;;  %v2488_v60 = vpop.f32.mrb[18].mxu0  ;;  %v2541_v61 = vpop.f32.mrb[10].mxu1  ;;  %v11217_v58 = vld [vmem:[%s11940_s25 + $0x60] sm:$0xf] }
 0x2f1   : > { %v9656_v1 = vadd.f32 %v2488_v60, %v12259_v4  ;;  %v2646_v2 = vmax.f32 %v2448_v27, %v2541_v61  ;;  %v2490_v6 = vpop.f32.mrb[19].mxu0  ;;  %v2543_v11 = vpop.f32.mrb[11].mxu1  ;;  %v12480_v12 = vmax.f32 %v2644_v56, %v2474_v47 }
 0x2f2   : > { %v9657_v13 = vadd.f32 %v2490_v6, %v12262_v5  ;;  %v2647_v50 = vmax.f32 %v2450_v28, %v2543_v11  ;;  %v12483_v14 = vmax.f32 %v2645_v24, %v2476_v48 }
 0x2f3   : > { %8950 = vmatmul.mubr.msk.bf16.gmra.mrb[44].mxu1 %vm1310_vm1, %v12423_v26  ;;  %8955 = vmatmul.mubr.msk.bf16.gmra.mrb[28].mxu0 %vm1310_vm1, %v12437_v35  ;;  %v12489_v63 = vmax.f32 %v2646_v2, %v2478_v51 }
 0x2f4   : > { %3501 = vmatprep.mubr.bf16.mxu1 %v11562_v16  ;;  %3631 = vmatprep.mubr.bf16.mxu0 %v11562_v16  ;;  %v12493_v3 = vmax.f32 %v2647_v50, %v2480_v52 }
 0x2f6   : > { %v2494_v4 = vpop.f32.mrb[20].mxu0  ;;  %v2547_v17 = vpop.f32.mrb[12].mxu1 }
 0x2f7   : > { %v9658_v5 = vadd.f32 %v2494_v4, %v12270_v8  ;;  %v2648_v62 = vmax.f32 %v12431_v30, %v2547_v17  ;;  %v2496_v18 = vpop.f32.mrb[21].mxu0  ;;  %v2549_v19 = vpop.f32.mrb[13].mxu1 }
 0x2f8   : > { %v9659_v7 = vadd.f32 %v2496_v18, %v12272_v9  ;;  %v2649_v20 = vmax.f32 %v12433_v31, %v2549_v19  ;;  %v2498_v22 = vpop.f32.mrb[22].mxu0  ;;  %v2551_v0 = vpop.f32.mrb[14].mxu1  ;;  %v11215_v31 = vld [vmem:[%s11940_s25 + $0x58] sm:$0xf] }
 0x2f9   : > { %v9660_v15 = vadd.f32 %v2498_v22, %v12274_v10  ;;  %v2650_v29 = vmax.f32 %v12439_v37, %v2551_v0  ;;  %v2500_v45 = vpop.f32.mrb[23].mxu0  ;;  %v2553_v21 = vpop.f32.mrb[15].mxu1  ;;  %v12501_v8 = vmax.f32 %v2648_v62, %v9654_v55  ;;  %v12523_v34 = vcombine.low %v11215_v31, %v11216_v33 }
 0x2fa   : > { %v9661_v54 = vadd.f32 %v2500_v45, %v12276_v40  ;;  %v2651_v23 = vmax.f32 %v12441_v38, %v2553_v21  ;;  %v12505_v9 = vmax.f32 %v2649_v20, %v9655_v59  ;;  %v12518_v40 = vshrl.u32 %v2681_v49, 7  ;;  %v11218_v59 = vld [vmem:[%s11940_s25 + $0x64] sm:$0xf] }
 0x2fb   : > { %8951 = vmatmul.mubr.msk.bf16.gmra.mrb[48].mxu1 %vm1310_vm1, %v12437_v35  ;;  %8956 = vmatmul.mubr.msk.bf16.gmra.mrb[32].mxu0 %vm1310_vm1, %v12458_v44  ;;  %v12511_v10 = vmax.f32 %v2650_v29, %v9656_v1  ;;  %v12557_v24 = vcombine.low %v11217_v58, %v11218_v59 }
 0x2fc   : > { %3511 = vmatprep.mubr.bf16.mxu1 %v11562_v16  ;;  %3641 = vmatprep.mubr.bf16.mxu0 %v11562_v16  ;;  %v12515_v25 = vmax.f32 %v2651_v23, %v9657_v13  ;;  %v12528_v47 = vsub.s32 0, %v12518_v40  ;;  %v12534_v52 = vsub.s32 1, %v12518_v40 }
 0x2fe   : > { %v2557_v27 = vpop.f32.mrb[16].mxu1 }
 0x2ff   : > { %v2652_v28 = vmax.f32 %v12453_v41, %v2557_v27  ;;  %v2559_v30 = vpop.f32.mrb[17].mxu1  ;;  %v1192_v41 = vld [vmem:[#allocation5] sm:$0x3] }
 0x300   : > { %v2653_v37 = vmax.f32 %v12455_v42, %v2559_v30  ;;  %v2561_v38 = vpop.f32.mrb[18].mxu1  ;;  %v12552_v55 = vrot.slane %v1192_v41, %v12534_v52 }
 0x301   : > { %v2654_v39 = vmax.f32 %v12460_v46, %v2561_v38  ;;  %v2563_v43 = vpop.f32.mrb[19].mxu1  ;;  %v12530_v48 = vmax.f32 %v2652_v28, %v9658_v5 }
 0x302   : > { %v2655_v51 = vmax.f32 %v12463_v32, %v2563_v43  ;;  %v12536_v53 = vmax.f32 %v2653_v37, %v9659_v7  ;;  %v12549_v32 = vrot.slane %v1192_v41, %v12528_v47  ;;  %v11219_v7 = vld [vmem:[%s11940_s25 + $0x68] sm:$0xf] }
 0x303   : > { %8952 = vmatmul.mubr.msk.bf16.gmra.mrb[52].mxu1 %vm1310_vm1, %v12458_v44  ;;  %8957 = vmatmul.mubr.msk.bf16.gmra.mrb[36].mxu0 %vm1310_vm1, %v12523_v34  ;;  %v12542_v42 = vmax.f32 %v2654_v39, %v9660_v15 }
 0x304   : > { %3651 = vmatprep.mubr.bf16.mxu0 %v11562_v16  ;;  %3704 = vmatprep.mubr.bf16.mxu1 %v11562_v16  ;;  %v12546_v46 = vmax.f32 %v2655_v51, %v9661_v54 }
 0x306   : > { %v2567_v36 = vpop.f32.mrb[20].mxu1 }
 0x307   : > { %v2668_v56 = vmax.f32 %v12480_v12, %v2567_v36  ;;  %v2569_v57 = vpop.f32.mrb[21].mxu1 }
 0x308   : > { %v2669_v60 = vmax.f32 %v12483_v14, %v2569_v57  ;;  %v2571_v61 = vpop.f32.mrb[22].mxu1  ;;  %v851_v14 = vld [vmem:[%s11940_s25 + $0x6c] sm:$0xf] }
 0x309   : > { %v2691_v1 = vadd.f32 %v12549_v32, %v2668_v56  ;;  %v2670_v2 = vmax.f32 %v12489_v63, %v2571_v61  ;;  %v2573_v6 = vpop.f32.mrb[23].mxu1  ;;  %v8786_v20 = vcombine.low %v11219_v7, %v851_v14  ;;  %v10384_v61 = vld [vmem:[#allocation7 + $0x1e0] ss:$16 sps:$4 sm:$0xff]   ;;  %v10407_v14 = vld [vmem:[#allocation7 + $0x24c] ss:$16 sps:$4 sm:$0xff]  }
 0x30a   : > { %v2692_v11 = vadd.f32 %v12552_v55, %v2669_v60  ;;  %v2671_v13 = vmax.f32 %v12493_v3, %v2573_v6  ;;  %v10395_v6 = vld [vmem:[#allocation7 + $0x20c] ss:$16 sps:$4 sm:$0xff]  }
 0x30b   : > { %v2693_v12 = vadd.f32 %v12549_v32, %v2670_v2  ;;  %8958 = vmatmul.mubr.msk.bf16.gmra.mrb[40].mxu0 %vm1310_vm1, %v12557_v24  ;;  %8961 = vmatmul.mubr.msk.bf16.vlgmr.msra.gmra.mrb[32].mxu1 %vm1310_vm1, %v12423_v26  ;;  %v2703_v63 = vmax.f32 %v2691_v1, 0.0  ;;  %v10387_v1 = vld [vmem:[#allocation7 + $0x1e8] ss:$16 sps:$4 sm:$0xff]   ;;  %v10392_v2 = vld [vmem:[#allocation7 + $0x204] ss:$16 sps:$4 sm:$0xff]  }
 0x30c   : > { %v2694_v50 = vadd.f32 %v12552_v55, %v2671_v13  ;;  %3661 = vmatprep.mubr.bf16.mxu0 %v11562_v16  ;;  %3714 = vmatprep.mubr.bf16.mxu1 %v11562_v16  ;;  %v2704_v17 = vmax.f32 %v2692_v11, 0.0  ;;  %v10393_v11 = vld [vmem:[#allocation7 + $0x208] ss:$16 sps:$4 sm:$0xff]   ;;  %v10396_v13 = vld [vmem:[#allocation7 + $0x220] ss:$16 sps:$4 sm:$0xff]  }
 0x30d   : > { %v2705_v4 = vmax.f32 %v2693_v12, 0.0  ;;  %v10399_v12 = vld [vmem:[#allocation7 + $0x228] ss:$16 sps:$4 sm:$0xff]   ;;  %v10419_v7 = vld [vmem:[#allocation7 + $0x28c] ss:$16 sps:$4 sm:$0xff]  }
 0x30e   : > { %v2706_v3 = vmax.f32 %v2694_v50, 0.0  ;;  %v2577_v5 = vpop.f32.mrb[24].mxu1  ;;  %v10404_v50 = vld [vmem:[#allocation7 + $0x244] ss:$16 sps:$4 sm:$0xff]  }
 0x30f   : > { %v12573_v62 = vpack.c.bf16 %v2705_v4, %v2703_v63  ;;  %v2672_v18 = vmax.f32 %v12501_v8, %v2577_v5  ;;  %v2579_v19 = vpop.f32.mrb[25].mxu1  ;;  %v10402_v63 = vld [vmem:[#allocation7 + $0x240] ss:$16 sps:$4 sm:$0xff]   ;;  %v10405_v4 = vld [vmem:[#allocation7 + $0x248] ss:$16 sps:$4 sm:$0xff]  }
 0x310   : > { %v12577_v26 = vpack.c.bf16 %v2706_v3, %v2704_v17  ;;  %v2673_v22 = vmax.f32 %v12505_v9, %v2579_v19  ;;  %v2581_v0 = vpop.f32.mrb[26].mxu1  ;;  %v10410_v17 = vld [vmem:[#allocation7 + $0x264] ss:$16 sps:$4 sm:$0xff]   ;;  %v10413_v3 = vld [vmem:[#allocation7 + $0x26c] ss:$16 sps:$4 sm:$0xff]  }
 0x311   : > { %v2695_v15 = vadd.f32 %v12549_v32, %v2672_v18  ;;  %v2674_v29 = vmax.f32 %v12511_v10, %v2581_v0  ;;  %v2583_v45 = vpop.f32.mrb[27].mxu1  ;;  %v10408_v5 = vld [vmem:[#allocation7 + $0x260] ss:$16 sps:$4 sm:$0xff]   ;;  %v10411_v18 = vld [vmem:[#allocation7 + $0x268] ss:$16 sps:$4 sm:$0xff]  }
 0x312   : > { %v2696_v21 = vadd.f32 %v12552_v55, %v2673_v22  ;;  %v2675_v54 = vmax.f32 %v12515_v25, %v2583_v45  ;;  %v10416_v19 = vld [vmem:[#allocation7 + $0x284] ss:$16 sps:$4 sm:$0xff]   ;;  %v10417_v22 = vld [vmem:[#allocation7 + $0x288] ss:$16 sps:$4 sm:$0xff]  }
 0x313   : > { %v2697_v23 = vadd.f32 %v12549_v32, %v2674_v29  ;;  %8959 = vmatmul.mubr.msk.bf16.gmra.mrb[44].mxu0 %vm1310_vm1, %v8786_v20  ;;  %8962 = vmatmul.mubr.msk.bf16.gmra.mrb[36].mxu1 %vm1310_vm1, %v12437_v35  ;;  %v2707_v9 = vmax.f32 %v2695_v15, 0.0  ;;  %v10422_v0 = vld [vmem:[#allocation7 + $0x2a4] ss:$16 sps:$4 sm:$0xff]   ;;  %v10425_v15 = vld [vmem:[#allocation7 + $0x2ac] ss:$16 sps:$4 sm:$0xff]  }
 0x314   : > { %v2698_v8 = vadd.f32 %v12552_v55, %v2675_v54  ;;  %3724 = vmatprep.mubr.bf16.mxu1 %v11562_v16  ;;  %v2708_v28 = vmax.f32 %v2696_v21, 0.0  ;;  %v10420_v29 = vld [vmem:[#allocation7 + $0x2a0] ss:$16 sps:$4 sm:$0xff]   ;;  %v10423_v45 = vld [vmem:[#allocation7 + $0x2a8] ss:$16 sps:$4 sm:$0xff]  }
 0x315   : > { %v2709_v27 = vmax.f32 %v2697_v23, 0.0  ;;  %v10428_v21 = vld [vmem:[#allocation7 + $0x2c4] ss:$16 sps:$4 sm:$0xff]   ;;  %v10431_v54 = vld [vmem:[#allocation7 + $0x2cc] ss:$16 sps:$4 sm:$0xff]  }
 0x316   : > { %v2710_v10 = vmax.f32 %v2698_v8, 0.0  ;;  %v2587_v30 = vpop.f32.mrb[28].mxu1  ;;  %v10426_v23 = vld [vmem:[#allocation7 + $0x2c0] ss:$16 sps:$4 sm:$0xff]   ;;  %v10429_v8 = vld [vmem:[#allocation7 + $0x2c8] ss:$16 sps:$4 sm:$0xff]  }
 0x317   : > { %v12590_v31 = vpack.c.bf16 %v2709_v27, %v2707_v9  ;;  %v2676_v25 = vmax.f32 %v12530_v48, %v2587_v30  ;;  %v2589_v33 = vpop.f32.mrb[29].mxu1  ;;  %v10434_v9 = vld [vmem:[#allocation7 + $0x2e4] ss:$16 sps:$4 sm:$0xff]   ;;  %v10437_v27 = vld [vmem:[#allocation7 + $0x2ec] ss:$16 sps:$4 sm:$0xff]  }
 0x318   : > { %v12593_v37 = vpack.c.bf16 %v2710_v10, %v2708_v28  ;;  %v2677_v38 = vmax.f32 %v12536_v53, %v2589_v33  ;;  %v2591_v39 = vpop.f32.mrb[30].mxu1  ;;  %v10432_v28 = vld [vmem:[#allocation7 + $0x2e0] ss:$16 sps:$4 sm:$0xff]   ;;  %v10435_v10 = vld [vmem:[#allocation7 + $0x2e8] ss:$16 sps:$4 sm:$0xff]  }
 0x319   : > { %v2699_v35 = vadd.f32 %v12549_v32, %v2676_v25  ;;  %v2678_v43 = vmax.f32 %v12542_v42, %v2591_v39  ;;  %v2593_v51 = vpop.f32.mrb[31].mxu1  ;;  %v10440_v30 = vld [vmem:[#allocation7 + $0x304] ss:$16 sps:$4 sm:$0xff]   ;;  %v10443_v25 = vld [vmem:[#allocation7 + $0x30c] ss:$16 sps:$4 sm:$0xff]  }
 0x31a   : > { %v2700_v41 = vadd.f32 %v12552_v55, %v2677_v38  ;;  %v2679_v36 = vmax.f32 %v12546_v46, %v2593_v51  ;;  %v10389_v46 = vld [vmem:[#allocation7 + $0x1ec] ss:$16 sps:$4 sm:$0xff]   ;;  %v10438_v33 = vld [vmem:[#allocation7 + $0x300] ss:$16 sps:$4 sm:$0xff]   ;;  %v10441_v38 = vld [vmem:[#allocation7 + $0x308] ss:$16 sps:$4 sm:$0xff]  }
 0x31b   : > { %v2701_v56 = vadd.f32 %v12549_v32, %v2678_v43  ;;  %8963 = vmatmul.mubr.msk.bf16.gmra.mrb[40].mxu1 %vm1310_vm1, %v12458_v44  ;;  %v2711_v53 = vmax.f32 %v2699_v35, 0.0  ;;  %v10386_v44 = vld [vmem:[#allocation7 + $0x1e4] ss:$16 sps:$4 sm:$0xff]   ;;  %4302 = vmatprep.subr.bf16.mxu1 %v10389_v46  ;;  %v10449_v35 = vld [vmem:[#allocation7 + $0x32c] ss:$16 sps:$4 sm:$0xff]  }
 0x31c   : > { %v2702_v48 = vadd.f32 %v12552_v55, %v2679_v36  ;;  %3734 = vmatprep.mubr.bf16.mxu1 %v11562_v16  ;;  %v2712_v58 = vmax.f32 %v2700_v41, 0.0  ;;  %4229 = vmatprep.subr.bf16.mxu0 %v10386_v44  ;;  %v10446_v39 = vld [vmem:[#allocation7 + $0x324] ss:$16 sps:$4 sm:$0xff]   ;;  %v10444_v43 = vld [vmem:[#allocation7 + $0x320] ss:$16 sps:$4 sm:$0xff]  }
 0x31d   : > { %v2713_v57 = vmax.f32 %v2701_v56, 0.0  ;;  %4230 = vmatpush1.bf16.msra.mxu0 %v10384_v61  ;;  %4303 = vmatpush1.bf16.msra.mxu1 %v10387_v1  ;;  %v10447_v51 = vld [vmem:[#allocation7 + $0x328] ss:$16 sps:$4 sm:$0xff]   ;;  %v10452_v41 = vld [vmem:[#allocation7 + $0x344] ss:$16 sps:$4 sm:$0xff]  }
 0x31e   : > { %v2714_v59 = vmax.f32 %v2702_v48, 0.0  ;;  %4231 = vmatprep.subr.bf16.mxu0 %v10392_v2  ;;  %4304 = vmatprep.subr.bf16.mxu1 %v10395_v6  ;;  %v10455_v36 = vld [vmem:[#allocation7 + $0x34c] ss:$16 sps:$4 sm:$0xff]   ;;  %v10450_v56 = vld [vmem:[#allocation7 + $0x340] ss:$16 sps:$4 sm:$0xff]  }
 0x31f   : > { %v12605_v60 = vpack.c.bf16 %v2713_v57, %v2711_v53  ;;  %v10453_v48 = vld [vmem:[#allocation7 + $0x348] ss:$16 sps:$4 sm:$0xff]   ;;  %v10458_v53 = vld [vmem:[#allocation7 + $0x364] ss:$16 sps:$4 sm:$0xff]   ;;  %v10461_v57 = vld [vmem:[#allocation7 + $0x36c] ss:$16 sps:$4 sm:$0xff]  }
 0x320   : > { %v12607_v42 = vpack.c.bf16 %v2714_v59, %v2712_v58  ;;  %v10456_v58 = vld [vmem:[#allocation7 + $0x360] ss:$16 sps:$4 sm:$0xff]   ;;  %v10459_v59 = vld [vmem:[#allocation7 + $0x368] ss:$16 sps:$4 sm:$0xff]   ;;  %v10464_v44 = vld [vmem:[#allocation7 + $0x384] ss:$16 sps:$4 sm:$0xff]  }
 0x321   : > { %4305 = vmatpush1.bf16.msra.mxu1 %v10393_v11  ;;  %v10467_v46 = vld [vmem:[#allocation7 + $0x38c] ss:$16 sps:$4 sm:$0xff]   ;;  %v10462_v61 = vld [vmem:[#allocation7 + $0x380] ss:$16 sps:$4 sm:$0xff]   ;;  %v10465_v1 = vld [vmem:[#allocation7 + $0x388] ss:$16 sps:$4 sm:$0xff]  }
 0x322   : > { %v10470_v2 = vld [vmem:[#allocation7 + $0x3a4] ss:$16 sps:$4 sm:$0xff]   ;;  %v10473_v6 = vld [vmem:[#allocation7 + $0x3ac] ss:$16 sps:$4 sm:$0xff]   ;;  %v10471_v11 = vld [vmem:[#allocation7 + $0x3a8] ss:$16 sps:$4 sm:$0xff]  }
 0x323   : > { %8964 = vmatmul.mubr.msk.bf16.gmra.mrb[44].mxu1 %vm1310_vm1, %v12523_v34  ;;  %v10390_v34 = vld [vmem:[#allocation7 + $0x200] ss:$16 sps:$4 sm:$0xff]  }
 0x324   : > { %3744 = vmatprep.mubr.bf16.mxu1 %v11562_v16  ;;  %4232 = vmatpush1.bf16.msra.mxu0 %v10390_v34  ;;  %v10468_v34 = vld [vmem:[#allocation7 + $0x3a0] ss:$16 sps:$4 sm:$0xff]  }
 0x32b   : > { %8965 = vmatmul.mubr.msk.bf16.gmra.mrb[48].mxu1 %vm1310_vm1, %v12557_v24  ;;  %v10398_v24 = vld [vmem:[#allocation7 + $0x224] ss:$16 sps:$4 sm:$0xff]  }
 0x32c   : > { %3754 = vmatprep.mubr.bf16.mxu1 %v11562_v16  ;;  %v10401_v16 = vld [vmem:[#allocation7 + $0x22c] ss:$16 sps:$4 sm:$0xff]   ;;  %4233 = vmatprep.subr.bf16.mxu0 %v10398_v24  ;;  %v10476_v24 = vld [vmem:[#allocation7 + $0x4] ss:$16 sps:$4 sm:$0xff]  }
 0x32d   : > { %4306 = vmatprep.subr.bf16.mxu1 %v10401_v16  ;;  %4234 = vmatpush1.bf16.msra.mxu0 %v10396_v13  ;;  %v10479_v16 = vld [vmem:[#allocation7 + $0xc] ss:$16 sps:$4 sm:$0xff]  }
 0x32e   : > { %4307 = vmatpush1.bf16.msra.mxu1 %v10399_v12  ;;  %4235 = vmatprep.subr.bf16.mxu0 %v10404_v50 }
 0x32f   : > { %4308 = vmatprep.subr.bf16.mxu1 %v10407_v14 }
 0x331   : > { %4236 = vmatpush1.bf16.msra.mxu0 %v10402_v63 }
 0x332   : > { %4309 = vmatpush1.bf16.msra.mxu1 %v10405_v4  ;;  %4237 = vmatprep.subr.bf16.mxu0 %v10410_v17 }
 0x333   : > { %8966 = vmatmul.mubr.msk.bf16.gmra.mrb[52].mxu1 %vm1310_vm1, %v8786_v20  ;;  %4310 = vmatprep.subr.bf16.mxu1 %v10413_v3  ;;  %v10414_v20 = vld [vmem:[#allocation7 + $0x280] ss:$16 sps:$4 sm:$0xff]  }
 0x335   : > { %4238 = vmatpush1.bf16.msra.mxu0 %v10408_v5 }
 0x336   : > { %4311 = vmatpush1.bf16.msra.mxu1 %v10411_v18  ;;  %4239 = vmatprep.subr.bf16.mxu0 %v10416_v19 }
 0x337   : > { %4312 = vmatprep.subr.bf16.mxu1 %v10419_v7 }
 0x339   : > { %4240 = vmatpush1.bf16.msra.mxu0 %v10414_v20 }
 0x33a   : > { %4313 = vmatpush1.bf16.msra.mxu1 %v10417_v22  ;;  %4241 = vmatprep.subr.bf16.mxu0 %v10422_v0 }
 0x33b   : > { %4314 = vmatprep.subr.bf16.mxu1 %v10425_v15 }
 0x33d   : > { %4242 = vmatpush1.bf16.msra.mxu0 %v10420_v29 }
 0x33e   : > { %4315 = vmatpush1.bf16.msra.mxu1 %v10423_v45  ;;  %4243 = vmatprep.subr.bf16.mxu0 %v10428_v21 }
 0x33f   : > { %4316 = vmatprep.subr.bf16.mxu1 %v10431_v54 }
 0x341   : > { %4244 = vmatpush1.bf16.msra.mxu0 %v10426_v23 }
 0x342   : > { %4317 = vmatpush1.bf16.msra.mxu1 %v10429_v8  ;;  %4245 = vmatprep.subr.bf16.mxu0 %v10434_v9 }
 0x343   : > { %4318 = vmatprep.subr.bf16.mxu1 %v10437_v27 }
 0x345   : > { %4246 = vmatpush1.bf16.msra.mxu0 %v10432_v28 }
 0x346   : > { %4319 = vmatpush1.bf16.msra.mxu1 %v10435_v10  ;;  %4247 = vmatprep.subr.bf16.mxu0 %v10440_v30 }
 0x347   : > { %4320 = vmatprep.subr.bf16.mxu1 %v10443_v25 }
 0x349   : > { %4248 = vmatpush1.bf16.msra.mxu0 %v10438_v33 }
 0x34a   : > { %4321 = vmatpush1.bf16.msra.mxu1 %v10441_v38  ;;  %4249 = vmatprep.subr.bf16.mxu0 %v10446_v39 }
 0x34b   : > { %4322 = vmatprep.subr.bf16.mxu1 %v10449_v35 }
 0x34d   : > { %4250 = vmatpush1.bf16.msra.mxu0 %v10444_v43 }
 0x34e   : > { %4323 = vmatpush1.bf16.msra.mxu1 %v10447_v51  ;;  %4251 = vmatprep.subr.bf16.mxu0 %v10452_v41 }
 0x34f   : > { %4324 = vmatprep.subr.bf16.mxu1 %v10455_v36 }
 0x351   : > { %4252 = vmatpush1.bf16.msra.mxu0 %v10450_v56 }
 0x352   : > { %4325 = vmatpush1.bf16.msra.mxu1 %v10453_v48  ;;  %4253 = vmatprep.subr.bf16.mxu0 %v10458_v53 }
 0x353   : > { %4326 = vmatprep.subr.bf16.mxu1 %v10461_v57 }
 0x355   : > { %4254 = vmatpush1.bf16.msra.mxu0 %v10456_v58 }
 0x356   : > { %4327 = vmatpush1.bf16.msra.mxu1 %v10459_v59  ;;  %4255 = vmatprep.subr.bf16.mxu0 %v10464_v44 }
 0x357   : > { %4328 = vmatprep.subr.bf16.mxu1 %v10467_v46 }
 0x359   : > { %4256 = vmatpush1.bf16.msra.mxu0 %v10462_v61 }
 0x35a   : > { %4329 = vmatpush1.bf16.msra.mxu1 %v10465_v1  ;;  %4257 = vmatprep.subr.bf16.mxu0 %v10470_v2 }
 0x35b   : > { %4330 = vmatprep.subr.bf16.mxu1 %v10473_v6 }
 0x35d   : > { %4258 = vmatpush1.bf16.msra.mxu0 %v10468_v34 }
 0x35e   : > { %4331 = vmatpush1.bf16.msra.mxu1 %v10471_v11  ;;  %4681 = vmatprep.subr.bf16.mxu0 %v10476_v24 }
 0x35f   : > { %4754 = vmatprep.subr.bf16.mxu1 %v10479_v16 }
 0x3be   : > { %v3613_v13 = vpop.f32.mrb[24].mxu0 }
 0x3bf   : > { %v3615_v12 = vpop.f32.mrb[25].mxu0 }
 0x3c0   : > { %v3617_v50 = vpop.f32.mrb[26].mxu0 }
 0x3c1   : > { %v3619_v14 = vpop.f32.mrb[27].mxu0 }
 0x3c6   : > { %v3623_v63 = vpop.f32.mrb[28].mxu0 }
 0x3c7   : > { %v3625_v4 = vpop.f32.mrb[29].mxu0 }
 0x3c8   : > { %v3627_v17 = vpop.f32.mrb[30].mxu0 }
 0x3c9   : > { %v3629_v3 = vpop.f32.mrb[31].mxu0 }
 0x3ce   : > { %v3633_v5 = vpop.f32.mrb[32].mxu0 }
 0x3cf   : > { %v3635_v18 = vpop.f32.mrb[33].mxu0 }
 0x3d0   : > { %v3637_v19 = vpop.f32.mrb[34].mxu0 }
 0x3d1   : > { %v3639_v7 = vpop.f32.mrb[35].mxu0 }
 0x3d6   : > { %v3643_v20 = vpop.f32.mrb[36].mxu0 }
 0x3d7   : > { %v3645_v22 = vpop.f32.mrb[37].mxu0 }
 0x3d8   : > { %v3647_v0 = vpop.f32.mrb[38].mxu0 }
 0x3d9   : > { %v3649_v15 = vpop.f32.mrb[39].mxu0 }
 0x3de   : > { %v3653_v29 = vpop.f32.mrb[40].mxu0  ;;  %v3706_v45 = vpop.f32.mrb[32].mxu1 }
 0x3df   : > { %v3813_v21 = vmax.f32 %v3613_v13, %v3706_v45  ;;  %v3655_v54 = vpop.f32.mrb[41].mxu0  ;;  %v3708_v23 = vpop.f32.mrb[33].mxu1 }
 0x3e0   : > { %v3814_v8 = vmax.f32 %v3615_v12, %v3708_v23  ;;  %v3657_v9 = vpop.f32.mrb[42].mxu0  ;;  %v3710_v27 = vpop.f32.mrb[34].mxu1 }
 0x3e1   : > { %v3815_v28 = vmax.f32 %v3617_v50, %v3710_v27  ;;  %v3659_v10 = vpop.f32.mrb[43].mxu0  ;;  %v3712_v30 = vpop.f32.mrb[35].mxu1  ;;  %v3825_v25 = vmax.f32 %v3813_v21, %v3643_v20 }
 0x3e2   : > { %v3816_v33 = vmax.f32 %v3619_v14, %v3712_v30  ;;  %v3826_v38 = vmax.f32 %v3814_v8, %v3645_v22 }
 0x3e3   : > { %v3827_v39 = vmax.f32 %v3815_v28, %v3647_v0 }
 0x3e4   : > { %v3828_v35 = vmax.f32 %v3816_v33, %v3649_v15 }
 0x3e6   : > { %v3663_v43 = vpop.f32.mrb[44].mxu0  ;;  %v3716_v51 = vpop.f32.mrb[36].mxu1 }
 0x3e7   : > { %v3817_v41 = vmax.f32 %v3623_v63, %v3716_v51  ;;  %v3665_v36 = vpop.f32.mrb[45].mxu0  ;;  %v3718_v56 = vpop.f32.mrb[37].mxu1 }
 0x3e8   : > { %v3818_v48 = vmax.f32 %v3625_v4, %v3718_v56  ;;  %v3667_v53 = vpop.f32.mrb[46].mxu0  ;;  %v3720_v57 = vpop.f32.mrb[38].mxu1  ;;  %v10482_v56 = vld [vmem:[#allocation7 + $0x24] ss:$16 sps:$4 sm:$0xff]  }
 0x3e9   : > { %v3819_v58 = vmax.f32 %v3627_v17, %v3720_v57  ;;  %v3669_v59 = vpop.f32.mrb[47].mxu0  ;;  %v3722_v44 = vpop.f32.mrb[39].mxu1  ;;  %v3829_v46 = vmax.f32 %v3817_v41, %v3653_v29 }
 0x3ea   : > { %v3820_v61 = vmax.f32 %v3629_v3, %v3722_v44  ;;  %v3830_v1 = vmax.f32 %v3818_v48, %v3655_v54  ;;  %v10485_v48 = vld [vmem:[#allocation7 + $0x2c] ss:$16 sps:$4 sm:$0xff]   ;;  %v10480_v44 = vld [vmem:[#allocation7 + $0x20] ss:$16 sps:$4 sm:$0xff]  }
 0x3eb   : > { %v3831_v2 = vmax.f32 %v3819_v58, %v3657_v9 }
 0x3ec   : > { %v3832_v6 = vmax.f32 %v3820_v61, %v3659_v10 }
 0x3ee   : > { %v3726_v34 = vpop.f32.mrb[40].mxu1 }
 0x3ef   : > { %v3821_v11 = vmax.f32 %v3633_v5, %v3726_v34  ;;  %v3728_v24 = vpop.f32.mrb[41].mxu1 }
 0x3f0   : > { %v3822_v16 = vmax.f32 %v3635_v18, %v3728_v24  ;;  %v3730_v13 = vpop.f32.mrb[42].mxu1 }
 0x3f1   : > { %v3823_v12 = vmax.f32 %v3637_v19, %v3730_v13  ;;  %v3732_v50 = vpop.f32.mrb[43].mxu1  ;;  %v12616_v14 = vmax.f32 %v3821_v11, %v3663_v43  ;;  %v10474_v43 = vld [vmem:[#allocation7] ss:$16 sps:$4 sm:$0xff]  }
 0x3f2   : > { %v3824_v63 = vmax.f32 %v3639_v7, %v3732_v50  ;;  %v12618_v4 = vmax.f32 %v3822_v16, %v3665_v36 }
 0x3f3   : > { %v12620_v17 = vmax.f32 %v3823_v12, %v3667_v53 }
 0x3f4   : > { %v12622_v20 = vmax.f32 %v3824_v63, %v3669_v59 }
 0x3f6   : > { %v3736_v3 = vpop.f32.mrb[44].mxu1 }
 0x3f7   : > { %v3837_v22 = vmax.f32 %v3825_v25, %v3736_v3  ;;  %v3738_v0 = vpop.f32.mrb[45].mxu1 }
 0x3f8   : > { %v3838_v15 = vmax.f32 %v3826_v38, %v3738_v0  ;;  %v3740_v29 = vpop.f32.mrb[46].mxu1  ;;  %v10489_v0 = vld [vmem:[#allocation7 + $0x48] ss:$16 sps:$4 sm:$0xff]  }
 0x3f9   : > { %v3849_v5 = vadd.f32 %v3837_v22, %v12549_v32  ;;  %v3839_v18 = vmax.f32 %v3827_v39, %v3740_v29  ;;  %v3742_v45 = vpop.f32.mrb[47].mxu1  ;;  %v10486_v22 = vld [vmem:[#allocation7 + $0x40] ss:$16 sps:$4 sm:$0xff]  }
 0x3fa   : > { %v3850_v19 = vadd.f32 %v3838_v15, %v12552_v55  ;;  %v3840_v21 = vmax.f32 %v3828_v35, %v3742_v45  ;;  %v10477_v35 = vld [vmem:[#allocation7 + $0x8] ss:$16 sps:$4 sm:$0xff]   ;;  %v3890_v15 = vrot.slane %v12593_v37, 4 }
 0x3fb   : > { %v3851_v7 = vadd.f32 %v3839_v18, %v12549_v32  ;;  %v3861_v23 = vmax.f32 %v3849_v5, 0.0 }
 0x3fc   : > { %v3852_v54 = vadd.f32 %v3840_v21, %v12552_v55  ;;  %v3862_v9 = vmax.f32 %v3850_v19, 0.0  ;;  %v10494_v19 = vld [vmem:[#allocation7 + $0x64] ss:$16 sps:$4 sm:$0xff]   ;;  %v10497_v21 = vld [vmem:[#allocation7 + $0x6c] ss:$16 sps:$4 sm:$0xff]  }
 0x3fd   : > { %v3863_v8 = vmax.f32 %v3851_v7, 0.0 }
 0x3fe   : > { %v3864_v27 = vmax.f32 %v3852_v54, 0.0  ;;  %v3746_v28 = vpop.f32.mrb[48].mxu1  ;;  %v10492_v54 = vld [vmem:[#allocation7 + $0x60] ss:$16 sps:$4 sm:$0xff]  }
 0x3ff   : > { %v12628_v10 = vpack.c.bf16 %v3863_v8, %v3861_v23  ;;  %v3841_v30 = vmax.f32 %v3829_v46, %v3746_v28  ;;  %v3748_v25 = vpop.f32.mrb[49].mxu1  ;;  %v10483_v46 = vld [vmem:[#allocation7 + $0x28] ss:$16 sps:$4 sm:$0xff]  }
 0x400   : > { %v12630_v33 = vpack.c.bf16 %v3864_v27, %v3862_v9  ;;  %v3842_v38 = vmax.f32 %v3830_v1, %v3748_v25  ;;  %v3750_v39 = vpop.f32.mrb[50].mxu1  ;;  %v10495_v23 = vld [vmem:[#allocation7 + $0x68] ss:$16 sps:$4 sm:$0xff]   ;;  %v10503_v27 = vld [vmem:[#allocation7 + $0x8c] ss:$16 sps:$4 sm:$0xff]  }
 0x401   : > { %v3853_v51 = vadd.f32 %v3841_v30, %v12549_v32  ;;  %v3843_v41 = vmax.f32 %v3831_v2, %v3750_v39  ;;  %v3752_v36 = vpop.f32.mrb[51].mxu1  ;;  %v10488_v2 = vld [vmem:[#allocation7 + $0x44] ss:$16 sps:$4 sm:$0xff]   ;;  %v10498_v39 = vld [vmem:[#allocation7 + $0x80] ss:$16 sps:$4 sm:$0xff]  }
 0x402   : > { %v3854_v53 = vadd.f32 %v3842_v38, %v12552_v55  ;;  %v3844_v57 = vmax.f32 %v3832_v6, %v3752_v36  ;;  %9027 = vmatprep.mubr.msk.bf16.mxu0 %vm4216_vm2, %v12630_v33  ;;  %9031 = vmatprep.mubr.msk.bf16.mxu1 %vm4216_vm2, %v12630_v33  ;;  %v10491_v6 = vld [vmem:[#allocation7 + $0x4c] ss:$16 sps:$4 sm:$0xff]   ;;  %v10506_v36 = vld [vmem:[#allocation7 + $0xa4] ss:$16 sps:$4 sm:$0xff]  }
 0x403   : > { %v3855_v58 = vadd.f32 %v3843_v41, %v12549_v32  ;;  %4262 = vmatmul.mubr.bf16.vlgmr.msra.gmra.mrb[48].mxu0 %v12628_v10  ;;  %4335 = vmatmul.mubr.bf16.vlgmr.msra.gmra.mrb[56].mxu1 %v12628_v10  ;;  %v3865_v61 = vmax.f32 %v3853_v51, 0.0  ;;  %v3894_v51 = vrot.slane %v12607_v42, 4 }
 0x404   : > { %v3856_v59 = vadd.f32 %v3844_v57, %v12552_v55  ;;  %4682 = vmatpush1.bf16.msra.mxu0 %v10474_v43  ;;  %4755 = vmatpush1.bf16.msra.mxu1 %v10477_v35  ;;  %v3866_v34 = vmax.f32 %v3854_v53, 0.0  ;;  %v10501_v43 = vld [vmem:[#allocation7 + $0x88] ss:$16 sps:$4 sm:$0xff]   ;;  %v3886_v35 = vrot.slane %v12573_v62, 4  ;;  %v10504_v53 = vld [vmem:[#allocation7 + $0xa0] ss:$16 sps:$4 sm:$0xff]  }
 0x405   : > { %v3867_v1 = vmax.f32 %v3855_v58, 0.0  ;;  %4683 = vmatprep.subr.bf16.mxu0 %v10482_v56  ;;  %4756 = vmatprep.subr.bf16.mxu1 %v10485_v48  ;;  %v10509_v56 = vld [vmem:[#allocation7 + $0xac] ss:$16 sps:$4 sm:$0xff]   ;;  %v12682_v48 = vsel %vm3885_vm3, %v3890_v15, %v3894_v51  ;;  %v10507_v57 = vld [vmem:[#allocation7 + $0xa8] ss:$16 sps:$4 sm:$0xff]  }
 0x406   : > { %v3868_v11 = vmax.f32 %v3856_v59, 0.0  ;;  %v3756_v24 = vpop.f32.mrb[52].mxu1  ;;  %v10512_v58 = vld [vmem:[#allocation7 + $0xc4] ss:$16 sps:$4 sm:$0xff]   ;;  %v10515_v59 = vld [vmem:[#allocation7 + $0xcc] ss:$16 sps:$4 sm:$0xff]  }
 0x407   : > { %v12642_v16 = vpack.c.bf16 %v3867_v1, %v3865_v61  ;;  %v3845_v13 = vmax.f32 %v12616_v14, %v3756_v24  ;;  %v3758_v12 = vpop.f32.mrb[53].mxu1  ;;  %v10513_v61 = vld [vmem:[#allocation7 + $0xc8] ss:$16 sps:$4 sm:$0xff]   ;;  %v10524_v24 = vld [vmem:[#allocation7 + $0x104] ss:$16 sps:$4 sm:$0xff]  }
 0x408   : > { %v12645_v50 = vpack.c.bf16 %v3868_v11, %v3866_v34  ;;  %v3846_v63 = vmax.f32 %v12618_v4, %v3758_v12  ;;  %4684 = vmatpush1.bf16.msra.mxu0 %v10480_v44  ;;  %4757 = vmatpush1.bf16.msra.mxu1 %v10483_v46  ;;  %v3760_v3 = vpop.f32.mrb[54].mxu1  ;;  %v3889_v4 = vrot.slane %v12577_v26, 4  ;;  %v3892_v44 = vrot.slane %v12605_v60, 4  ;;  %v10510_v46 = vld [vmem:[#allocation7 + $0xc0] ss:$16 sps:$4 sm:$0xff]  }
 0x409   : > { %v3857_v29 = vadd.f32 %v3845_v13, %v12549_v32  ;;  %v3847_v5 = vmax.f32 %v12620_v17, %v3760_v3  ;;  %v3762_v18 = vpop.f32.mrb[55].mxu1  ;;  %4685 = vmatprep.subr.bf16.mxu0 %v10488_v2  ;;  %4758 = vmatprep.subr.bf16.mxu1 %v10491_v6  ;;  %v10518_v2 = vld [vmem:[#allocation7 + $0xe4] ss:$16 sps:$4 sm:$0xff]   ;;  %v10521_v6 = vld [vmem:[#allocation7 + $0xec] ss:$16 sps:$4 sm:$0xff]  }
 0x40a   : > { %v3858_v14 = vadd.f32 %v3846_v63, %v12552_v55  ;;  %v3848_v45 = vmax.f32 %v12622_v20, %v3762_v18  ;;  %9028 = vmatprep.mubr.msk.bf16.mxu0 %vm4216_vm2, %v12645_v50  ;;  %9032 = vmatprep.mubr.msk.bf16.mxu1 %vm4216_vm2, %v12645_v50  ;;  %v12663_v20 = vsel %vm3885_vm3, %v3889_v4, %v3890_v15  ;;  %v10516_v34 = vld [vmem:[#allocation7 + $0xe0] ss:$16 sps:$4 sm:$0xff]   ;;  %v10519_v11 = vld [vmem:[#allocation7 + $0xe8] ss:$16 sps:$4 sm:$0xff]   ;;  %v10527_v13 = vld [vmem:[#allocation7 + $0x10c] ss:$16 sps:$4 sm:$0xff]  }
 0x40b   : > { %v3859_v17 = vadd.f32 %v3847_v5, %v12549_v32  ;;  %4272 = vmatmul.mubr.bf16.gmra.mrb[52].mxu0 %v12642_v16  ;;  %4345 = vmatmul.mubr.bf16.gmra.mrb[60].mxu1 %v12642_v16  ;;  %v3869_v8 = vmax.f32 %v3857_v29, 0.0  ;;  %v10500_v32 = vld [vmem:[#allocation7 + $0x84] ss:$16 sps:$4 sm:$0xff]   ;;  %v10522_v12 = vld [vmem:[#allocation7 + $0x100] ss:$16 sps:$4 sm:$0xff]  }
 0x40c   : > { %v3860_v7 = vadd.f32 %v3848_v45, %v12552_v55  ;;  %4686 = vmatpush1.bf16.msra.mxu0 %v10486_v22  ;;  %4759 = vmatpush1.bf16.msra.mxu1 %v10489_v0  ;;  %v3870_v28 = vmax.f32 %v3858_v14, 0.0  ;;  %v3887_v55 = vrot.slane %v12590_v31, 4  ;;  %v10525_v63 = vld [vmem:[#allocation7 + $0x108] ss:$16 sps:$4 sm:$0xff]   ;;  %v10530_v3 = vld [vmem:[#allocation7 + $0x124] ss:$16 sps:$4 sm:$0xff]  }
 0x40d   : > { %v3871_v9 = vmax.f32 %v3859_v17, 0.0  ;;  %9029 = vmatprep.mubr.msk.bf16.mxu0 %vm4216_vm2, %v12663_v20  ;;  %9033 = vmatprep.mubr.msk.bf16.mxu1 %vm4216_vm2, %v12663_v20  ;;  %v10533_v22 = vld [vmem:[#allocation7 + $0x12c] ss:$16 sps:$4 sm:$0xff]   ;;  %v10528_v0 = vld [vmem:[#allocation7 + $0x120] ss:$16 sps:$4 sm:$0xff]  }
 0x40e   : > { %v3872_v30 = vmax.f32 %v3860_v7, 0.0  ;;  %4687 = vmatprep.subr.bf16.mxu0 %v10494_v19  ;;  %4760 = vmatprep.subr.bf16.mxu1 %v10497_v21  ;;  %v12677_v41 = vsel %vm3885_vm3, %v3886_v35, %v3887_v55  ;;  %v12690_v1 = vsel %vm3885_vm3, %v3887_v55, %v3892_v44  ;;  %v10531_v15 = vld [vmem:[#allocation7 + $0x128] ss:$16 sps:$4 sm:$0xff]   ;;  %v10536_v29 = vld [vmem:[#allocation7 + $0x144] ss:$16 sps:$4 sm:$0xff]  }
 0x40f   : > { %v12670_v25 = vpack.c.bf16 %v3871_v9, %v3869_v8  ;;  %v10534_v5 = vld [vmem:[#allocation7 + $0x140] ss:$16 sps:$4 sm:$0xff]   ;;  %v10537_v18 = vld [vmem:[#allocation7 + $0x148] ss:$16 sps:$4 sm:$0xff]   ;;  %v10542_v14 = vld [vmem:[#allocation7 + $0x164] ss:$16 sps:$4 sm:$0xff]  }
 0x410   : > { %v12672_v38 = vpack.c.bf16 %v3872_v30, %v3870_v28  ;;  %4688 = vmatpush1.bf16.msra.mxu0 %v10492_v54  ;;  %4761 = vmatpush1.bf16.msra.mxu1 %v10495_v23  ;;  %v10545_v45 = vld [vmem:[#allocation7 + $0x16c] ss:$16 sps:$4 sm:$0xff]   ;;  %v10540_v4 = vld [vmem:[#allocation7 + $0x160] ss:$16 sps:$4 sm:$0xff]   ;;  %v10543_v19 = vld [vmem:[#allocation7 + $0x168] ss:$16 sps:$4 sm:$0xff]  }
 0x411   : > { %4689 = vmatprep.subr.bf16.mxu0 %v10500_v32  ;;  %4762 = vmatprep.subr.bf16.mxu1 %v10503_v27  ;;  %v10548_v21 = vld [vmem:[#allocation7 + $0x184] ss:$16 sps:$4 sm:$0xff]   ;;  %v10551_v17 = vld [vmem:[#allocation7 + $0x18c] ss:$16 sps:$4 sm:$0xff]   ;;  %v10546_v7 = vld [vmem:[#allocation7 + $0x180] ss:$16 sps:$4 sm:$0xff]  }
 0x412   : > { %v10549_v54 = vld [vmem:[#allocation7 + $0x188] ss:$16 sps:$4 sm:$0xff]   ;;  %v10554_v23 = vld [vmem:[#allocation7 + $0x1a4] ss:$16 sps:$4 sm:$0xff]   ;;  %v10557_v8 = vld [vmem:[#allocation7 + $0x1ac] ss:$16 sps:$4 sm:$0xff]  }
 0x413   : > { %4282 = vmatmul.mubr.bf16.gmra.mrb[56].mxu0 %v12677_v41  ;;  %4355 = vmatmul.mubr.bf16.gmra.mrb[64].mxu1 %v12677_v41  ;;  %v10552_v9 = vld [vmem:[#allocation7 + $0x1a0] ss:$16 sps:$4 sm:$0xff]   ;;  %v10555_v32 = vld [vmem:[#allocation7 + $0x1a8] ss:$16 sps:$4 sm:$0xff]   ;;  %v10560_v27 = vld [vmem:[#allocation7 + $0x1c4] ss:$16 sps:$4 sm:$0xff]  }
 0x414   : > { %4690 = vmatpush1.bf16.msra.mxu0 %v10498_v39  ;;  %4763 = vmatpush1.bf16.msra.mxu1 %v10501_v43  ;;  %v10563_v28 = vld [vmem:[#allocation7 + $0x1cc] ss:$16 sps:$4 sm:$0xff]   ;;  %v10558_v30 = vld [vmem:[#allocation7 + $0x1c0] ss:$16 sps:$4 sm:$0xff]   ;;  %v10561_v55 = vld [vmem:[#allocation7 + $0x1c8] ss:$16 sps:$4 sm:$0xff]  }
 0x415   : > { %9030 = vmatprep.mubr.msk.bf16.mxu0 %vm4216_vm2, %v12682_v48  ;;  %9034 = vmatprep.mubr.msk.bf16.mxu1 %vm4216_vm2, %v12682_v48  ;;  %v10566_v39 = vld [vmem:[#allocation7 + $0x3c4] ss:$16 sps:$4 sm:$0xff]   ;;  %v10569_v43 = vld [vmem:[#allocation7 + $0x3cc] ss:$16 sps:$4 sm:$0xff]   ;;  %v10564_v35 = vld [vmem:[#allocation7 + $0x3c0] ss:$16 sps:$4 sm:$0xff]  }
 0x416   : > { %4691 = vmatprep.subr.bf16.mxu0 %v10506_v36  ;;  %4764 = vmatprep.subr.bf16.mxu1 %v10509_v56  ;;  %v10567_v51 = vld [vmem:[#allocation7 + $0x3c8] ss:$16 sps:$4 sm:$0xff]   ;;  %v10572_v36 = vld [vmem:[#allocation7 + $0x3e4] ss:$16 sps:$4 sm:$0xff]   ;;  %v10575_v56 = vld [vmem:[#allocation7 + $0x3ec] ss:$16 sps:$4 sm:$0xff]  }
 0x417   : > { %v10576_v44 = vld [vmem:[#allocation7 + $0x400] ss:$16 sps:$4 sm:$0xff]  }
 0x418   : > { %4692 = vmatpush1.bf16.msra.mxu0 %v10504_v53  ;;  %4765 = vmatpush1.bf16.msra.mxu1 %v10507_v57  ;;  %v10570_v53 = vld [vmem:[#allocation7 + $0x3e0] ss:$16 sps:$4 sm:$0xff]   ;;  %v10573_v57 = vld [vmem:[#allocation7 + $0x3e8] ss:$16 sps:$4 sm:$0xff]  }
 0x419   : > { %4693 = vmatprep.subr.bf16.mxu0 %v10512_v58  ;;  %4766 = vmatprep.subr.bf16.mxu1 %v10515_v59  ;;  %v10578_v58 = vld [vmem:[#allocation7 + $0x404] ss:$16 sps:$4 sm:$0xff]   ;;  %v10581_v59 = vld [vmem:[#allocation7 + $0x40c] ss:$16 sps:$4 sm:$0xff]  }
 0x41b   : > { %4292 = vmatmul.mubr.bf16.gmra.mrb[60].mxu0 %v12690_v1  ;;  %4365 = vmatmul.mubr.bf16.gmra.mrb[68].mxu1 %v12690_v1 }
 0x41c   : > { %4694 = vmatpush1.bf16.msra.mxu0 %v10510_v46  ;;  %4767 = vmatpush1.bf16.msra.mxu1 %v10513_v61  ;;  %v10579_v46 = vld [vmem:[#allocation7 + $0x408] ss:$16 sps:$4 sm:$0xff]   ;;  %v10587_v61 = vld [vmem:[#allocation7 + $0x42c] ss:$16 sps:$4 sm:$0xff]  }
 0x41d   : > { %9095 = vmatprep.mubr.msk.bf16.mxu0 %vm4216_vm2, %v12577_v26  ;;  %9099 = vmatprep.mubr.msk.bf16.mxu1 %vm4216_vm2, %v12577_v26  ;;  %v10539_v26 = vld [vmem:[#allocation7 + $0x14c] ss:$16 sps:$4 sm:$0xff]  }
 0x41e   : > { %4695 = vmatprep.subr.bf16.mxu0 %v10518_v2  ;;  %4768 = vmatprep.subr.bf16.mxu1 %v10521_v6  ;;  %v10582_v2 = vld [vmem:[#allocation7 + $0x420] ss:$16 sps:$4 sm:$0xff]   ;;  %v10585_v6 = vld [vmem:[#allocation7 + $0x428] ss:$16 sps:$4 sm:$0xff]  }
 0x420   : > { %4696 = vmatpush1.bf16.msra.mxu0 %v10516_v34  ;;  %4769 = vmatpush1.bf16.msra.mxu1 %v10519_v11  ;;  %v10590_v34 = vld [vmem:[#allocation7 + $0x444] ss:$16 sps:$4 sm:$0xff]   ;;  %v10593_v11 = vld [vmem:[#allocation7 + $0x44c] ss:$16 sps:$4 sm:$0xff]  }
 0x421   : > { %4697 = vmatprep.subr.bf16.mxu0 %v10524_v24  ;;  %4770 = vmatprep.subr.bf16.mxu1 %v10527_v13  ;;  %v10588_v24 = vld [vmem:[#allocation7 + $0x440] ss:$16 sps:$4 sm:$0xff]   ;;  %v10591_v13 = vld [vmem:[#allocation7 + $0x448] ss:$16 sps:$4 sm:$0xff]  }
 0x424   : > { %4698 = vmatpush1.bf16.msra.mxu0 %v10522_v12  ;;  %4771 = vmatpush1.bf16.msra.mxu1 %v10525_v63  ;;  %v10596_v12 = vld [vmem:[#allocation7 + $0x464] ss:$16 sps:$4 sm:$0xff]   ;;  %v10599_v63 = vld [vmem:[#allocation7 + $0x46c] ss:$16 sps:$4 sm:$0xff]  }
 0x425   : > { %4699 = vmatprep.subr.bf16.mxu0 %v10530_v3  ;;  %4772 = vmatprep.subr.bf16.mxu1 %v10533_v22  ;;  %v10594_v3 = vld [vmem:[#allocation7 + $0x460] ss:$16 sps:$4 sm:$0xff]   ;;  %v10597_v22 = vld [vmem:[#allocation7 + $0x468] ss:$16 sps:$4 sm:$0xff]  }
 0x428   : > { %4700 = vmatpush1.bf16.msra.mxu0 %v10528_v0  ;;  %4773 = vmatpush1.bf16.msra.mxu1 %v10531_v15  ;;  %v10602_v0 = vld [vmem:[#allocation7 + $0x484] ss:$16 sps:$4 sm:$0xff]   ;;  %v10605_v15 = vld [vmem:[#allocation7 + $0x48c] ss:$16 sps:$4 sm:$0xff]  }
 0x429   : > { %4701 = vmatprep.subr.bf16.mxu0 %v10536_v29  ;;  %4774 = vmatprep.subr.bf16.mxu1 %v10539_v26  ;;  %v10600_v29 = vld [vmem:[#allocation7 + $0x480] ss:$16 sps:$4 sm:$0xff]   ;;  %v10603_v26 = vld [vmem:[#allocation7 + $0x488] ss:$16 sps:$4 sm:$0xff]  }
 0x42c   : > { %4702 = vmatpush1.bf16.msra.mxu0 %v10534_v5  ;;  %4775 = vmatpush1.bf16.msra.mxu1 %v10537_v18  ;;  %v10608_v5 = vld [vmem:[#allocation7 + $0x4a4] ss:$16 sps:$4 sm:$0xff]   ;;  %v10611_v18 = vld [vmem:[#allocation7 + $0x4ac] ss:$16 sps:$4 sm:$0xff]  }
 0x42d   : > { %4703 = vmatprep.subr.bf16.mxu0 %v10542_v14  ;;  %4776 = vmatprep.subr.bf16.mxu1 %v10545_v45  ;;  %v10606_v14 = vld [vmem:[#allocation7 + $0x4a0] ss:$16 sps:$4 sm:$0xff]   ;;  %v10609_v45 = vld [vmem:[#allocation7 + $0x4a8] ss:$16 sps:$4 sm:$0xff]  }
 0x430   : > { %4704 = vmatpush1.bf16.msra.mxu0 %v10540_v4  ;;  %4777 = vmatpush1.bf16.msra.mxu1 %v10543_v19  ;;  %v10614_v4 = vld [vmem:[#allocation7 + $0x4c4] ss:$16 sps:$4 sm:$0xff]   ;;  %v10617_v19 = vld [vmem:[#allocation7 + $0x4cc] ss:$16 sps:$4 sm:$0xff]  }
 0x431   : > { %4705 = vmatprep.subr.bf16.mxu0 %v10548_v21  ;;  %4778 = vmatprep.subr.bf16.mxu1 %v10551_v17  ;;  %v10612_v21 = vld [vmem:[#allocation7 + $0x4c0] ss:$16 sps:$4 sm:$0xff]   ;;  %v10615_v17 = vld [vmem:[#allocation7 + $0x4c8] ss:$16 sps:$4 sm:$0xff]  }
 0x434   : > { %4706 = vmatpush1.bf16.msra.mxu0 %v10546_v7  ;;  %4779 = vmatpush1.bf16.msra.mxu1 %v10549_v54  ;;  %v10620_v7 = vld [vmem:[#allocation7 + $0x4e4] ss:$16 sps:$4 sm:$0xff]   ;;  %v10623_v54 = vld [vmem:[#allocation7 + $0x4ec] ss:$16 sps:$4 sm:$0xff]  }
 0x435   : > { %4707 = vmatprep.subr.bf16.mxu0 %v10554_v23  ;;  %4780 = vmatprep.subr.bf16.mxu1 %v10557_v8  ;;  %v10618_v23 = vld [vmem:[#allocation7 + $0x4e0] ss:$16 sps:$4 sm:$0xff]   ;;  %v10626_v8 = vld [vmem:[#allocation7 + $0x504] ss:$16 sps:$4 sm:$0xff]  }
 0x438   : > { %4708 = vmatpush1.bf16.msra.mxu0 %v10552_v9  ;;  %4781 = vmatpush1.bf16.msra.mxu1 %v10555_v32  ;;  %v10629_v9 = vld [vmem:[#allocation7 + $0x50c] ss:$16 sps:$4 sm:$0xff]   ;;  %v10624_v32 = vld [vmem:[#allocation7 + $0x500] ss:$16 sps:$4 sm:$0xff]  }
 0x439   : > { %4709 = vmatprep.subr.bf16.mxu0 %v10560_v27  ;;  %4782 = vmatprep.subr.bf16.mxu1 %v10563_v28  ;;  %v10627_v27 = vld [vmem:[#allocation7 + $0x508] ss:$16 sps:$4 sm:$0xff]   ;;  %v10632_v28 = vld [vmem:[#allocation7 + $0x524] ss:$16 sps:$4 sm:$0xff]  }
 0x43c   : > { %4710 = vmatpush1.bf16.msra.mxu0 %v10558_v30  ;;  %4783 = vmatpush1.bf16.msra.mxu1 %v10561_v55  ;;  %v10635_v30 = vld [vmem:[#allocation7 + $0x52c] ss:$16 sps:$4 sm:$0xff]   ;;  %v10630_v55 = vld [vmem:[#allocation7 + $0x520] ss:$16 sps:$4 sm:$0xff]  }
 0x43d   : > { %5133 = vmatprep.subr.bf16.mxu0 %v10566_v39  ;;  %5206 = vmatprep.subr.bf16.mxu1 %v10569_v43  ;;  %v10633_v39 = vld [vmem:[#allocation7 + $0x528] ss:$16 sps:$4 sm:$0xff]   ;;  %v10638_v43 = vld [vmem:[#allocation7 + $0x544] ss:$16 sps:$4 sm:$0xff]  }
 0x43f   : > { %4714 = vmatmul.mubr.bf16.vlgmr.msra.gmra.mrb[48].mxu0 %v12573_v62  ;;  %4787 = vmatmul.mubr.bf16.vlgmr.msra.gmra.mrb[56].mxu1 %v12573_v62  ;;  %v10584_v62 = vld [vmem:[#allocation7 + $0x424] ss:$16 sps:$4 sm:$0xff]  }
 0x440   : > { %9096 = vmatprep.mubr.msk.bf16.mxu0 %vm4216_vm2, %v12593_v37  ;;  %9100 = vmatprep.mubr.msk.bf16.mxu1 %vm4216_vm2, %v12593_v37 }
 0x441   : > { %5134 = vmatpush1.bf16.msra.mxu0 %v10564_v35  ;;  %5207 = vmatpush1.bf16.msra.mxu1 %v10567_v51  ;;  %v10641_v35 = vld [vmem:[#allocation7 + $0x54c] ss:$16 sps:$4 sm:$0xff]   ;;  %v10636_v51 = vld [vmem:[#allocation7 + $0x540] ss:$16 sps:$4 sm:$0xff]  }
 0x442   : > { %5135 = vmatprep.subr.bf16.mxu0 %v10572_v36  ;;  %5208 = vmatprep.subr.bf16.mxu1 %v10575_v56  ;;  %v10639_v36 = vld [vmem:[#allocation7 + $0x548] ss:$16 sps:$4 sm:$0xff]   ;;  %v10644_v56 = vld [vmem:[#allocation7 + $0x564] ss:$16 sps:$4 sm:$0xff]  }
 0x445   : > { %5136 = vmatpush1.bf16.msra.mxu0 %v10570_v53  ;;  %5209 = vmatpush1.bf16.msra.mxu1 %v10573_v57  ;;  %v10647_v53 = vld [vmem:[#allocation7 + $0x56c] ss:$16 sps:$4 sm:$0xff]   ;;  %v10642_v57 = vld [vmem:[#allocation7 + $0x560] ss:$16 sps:$4 sm:$0xff]  }
 0x446   : > { %5137 = vmatprep.subr.bf16.mxu0 %v10578_v58  ;;  %5210 = vmatprep.subr.bf16.mxu1 %v10581_v59  ;;  %v10645_v58 = vld [vmem:[#allocation7 + $0x568] ss:$16 sps:$4 sm:$0xff]   ;;  %v10650_v59 = vld [vmem:[#allocation7 + $0x584] ss:$16 sps:$4 sm:$0xff]  }
 0x447   : > { %4724 = vmatmul.mubr.bf16.gmra.mrb[52].mxu0 %v12590_v31  ;;  %4797 = vmatmul.mubr.bf16.gmra.mrb[60].mxu1 %v12590_v31 }
 0x448   : > { %9097 = vmatprep.mubr.msk.bf16.mxu0 %vm4216_vm2, %v12630_v33  ;;  %9101 = vmatprep.mubr.msk.bf16.mxu1 %vm4216_vm2, %v12630_v33 }
 0x449   : > { %5138 = vmatpush1.bf16.msra.mxu0 %v10576_v44  ;;  %5211 = vmatpush1.bf16.msra.mxu1 %v10579_v46  ;;  %v10653_v44 = vld [vmem:[#allocation7 + $0x58c] ss:$16 sps:$4 sm:$0xff]   ;;  %v10648_v46 = vld [vmem:[#allocation7 + $0x580] ss:$16 sps:$4 sm:$0xff]  }
 0x44a   : > { %5139 = vmatprep.subr.bf16.mxu0 %v10584_v62  ;;  %5212 = vmatprep.subr.bf16.mxu1 %v10587_v61  ;;  %v10651_v62 = vld [vmem:[#allocation7 + $0x588] ss:$16 sps:$4 sm:$0xff]   ;;  %v10656_v61 = vld [vmem:[#allocation7 + $0x5a4] ss:$16 sps:$4 sm:$0xff]  }
 0x44d   : > { %5140 = vmatpush1.bf16.msra.mxu0 %v10582_v2  ;;  %5213 = vmatpush1.bf16.msra.mxu1 %v10585_v6  ;;  %v10659_v2 = vld [vmem:[#allocation7 + $0x5ac] ss:$16 sps:$4 sm:$0xff]   ;;  %v10654_v6 = vld [vmem:[#allocation7 + $0x5a0] ss:$16 sps:$4 sm:$0xff]  }
 0x44e   : > { %5141 = vmatprep.subr.bf16.mxu0 %v10590_v34  ;;  %5214 = vmatprep.subr.bf16.mxu1 %v10593_v11  ;;  %v10657_v34 = vld [vmem:[#allocation7 + $0x5a8] ss:$16 sps:$4 sm:$0xff]   ;;  %v10662_v11 = vld [vmem:[#allocation7 + $0x5c4] ss:$16 sps:$4 sm:$0xff]  }
 0x44f   : > { %4734 = vmatmul.mubr.bf16.gmra.mrb[56].mxu0 %v12628_v10  ;;  %4807 = vmatmul.mubr.bf16.gmra.mrb[64].mxu1 %v12628_v10 }
 0x450   : > { %9098 = vmatprep.mubr.msk.bf16.mxu0 %vm4216_vm2, %v12645_v50  ;;  %9102 = vmatprep.mubr.msk.bf16.mxu1 %vm4216_vm2, %v12645_v50 }
 0x451   : > { %5142 = vmatpush1.bf16.msra.mxu0 %v10588_v24  ;;  %5215 = vmatpush1.bf16.msra.mxu1 %v10591_v13  ;;  %v10665_v24 = vld [vmem:[#allocation7 + $0x5cc] ss:$16 sps:$4 sm:$0xff]   ;;  %v10660_v13 = vld [vmem:[#allocation7 + $0x5c0] ss:$16 sps:$4 sm:$0xff]  }
 0x452   : > { %5143 = vmatprep.subr.bf16.mxu0 %v10596_v12  ;;  %5216 = vmatprep.subr.bf16.mxu1 %v10599_v63  ;;  %v10663_v12 = vld [vmem:[#allocation7 + $0x5c8] ss:$16 sps:$4 sm:$0xff]   ;;  %v10668_v63 = vld [vmem:[#allocation7 + $0x5e4] ss:$16 sps:$4 sm:$0xff]  }
 0x455   : > { %5144 = vmatpush1.bf16.msra.mxu0 %v10594_v3  ;;  %5217 = vmatpush1.bf16.msra.mxu1 %v10597_v22  ;;  %v10671_v3 = vld [vmem:[#allocation7 + $0x5ec] ss:$16 sps:$4 sm:$0xff]   ;;  %v3908_v22 = vrot.slane %v12645_v50, 4 }
 0x456   : > { %5145 = vmatprep.subr.bf16.mxu0 %v10602_v0  ;;  %5218 = vmatprep.subr.bf16.mxu1 %v10605_v15  ;;  %v10666_v0 = vld [vmem:[#allocation7 + $0x5e0] ss:$16 sps:$4 sm:$0xff]   ;;  %v3907_v15 = vrot.slane %v12630_v33, 4  ;;  %v3905_v33 = vrot.slane %v12642_v16, 4 }
 0x457   : > { %4744 = vmatmul.mubr.bf16.gmra.mrb[60].mxu0 %v12642_v16  ;;  %4817 = vmatmul.mubr.bf16.gmra.mrb[68].mxu1 %v12642_v16 }
 0x458   : > { %9163 = vmatprep.mubr.msk.bf16.mxu0 %vm4216_vm2, %v12663_v20  ;;  %9167 = vmatprep.mubr.msk.bf16.mxu1 %vm4216_vm2, %v12663_v20  ;;  %v10621_v20 = vld [vmem:[#allocation7 + $0x4e8] ss:$16 sps:$4 sm:$0xff]  }
 0x459   : > { %5146 = vmatpush1.bf16.msra.mxu0 %v10600_v29  ;;  %5219 = vmatpush1.bf16.msra.mxu1 %v10603_v26  ;;  %v10674_v29 = vld [vmem:[#allocation7 + $0x604] ss:$16 sps:$4 sm:$0xff]   ;;  %v3909_v26 = vsel %vm3885_vm3, %v3907_v15, %v3908_v22  ;;  %v10735_v15 = vld [vmem:[#allocation7 + $0x748] ss:$16 sps:$4 sm:$0xff]  }
 0x45a   : > { %5147 = vmatprep.subr.bf16.mxu0 %v10608_v5  ;;  %5220 = vmatprep.subr.bf16.mxu1 %v10611_v18  ;;  %v10672_v5 = vld [vmem:[#allocation7 + $0x600] ss:$16 sps:$4 sm:$0xff]   ;;  %v10675_v18 = vld [vmem:[#allocation7 + $0x608] ss:$16 sps:$4 sm:$0xff]  }
 0x45d   : > { %5148 = vmatpush1.bf16.msra.mxu0 %v10606_v14  ;;  %5221 = vmatpush1.bf16.msra.mxu1 %v10609_v45  ;;  %v10680_v14 = vld [vmem:[#allocation7 + $0x624] ss:$16 sps:$4 sm:$0xff]   ;;  %v10683_v45 = vld [vmem:[#allocation7 + $0x62c] ss:$16 sps:$4 sm:$0xff]  }
 0x45e   : > { %5149 = vmatprep.subr.bf16.mxu0 %v10614_v4  ;;  %5222 = vmatprep.subr.bf16.mxu1 %v10617_v19  ;;  %v3912_v4 = vrot.slane %v12672_v38, 4  ;;  %v10678_v19 = vld [vmem:[#allocation7 + $0x620] ss:$16 sps:$4 sm:$0xff]  }
 0x461   : > { %5150 = vmatpush1.bf16.msra.mxu0 %v10612_v21  ;;  %5223 = vmatpush1.bf16.msra.mxu1 %v10615_v17  ;;  %v10681_v21 = vld [vmem:[#allocation7 + $0x628] ss:$16 sps:$4 sm:$0xff]  }
 0x462   : > { %5151 = vmatprep.subr.bf16.mxu0 %v10620_v7  ;;  %5224 = vmatprep.subr.bf16.mxu1 %v10623_v54  ;;  %v10686_v7 = vld [vmem:[#allocation7 + $0x644] ss:$16 sps:$4 sm:$0xff]   ;;  %v10689_v54 = vld [vmem:[#allocation7 + $0x64c] ss:$16 sps:$4 sm:$0xff]  }
 0x465   : > { %5152 = vmatpush1.bf16.msra.mxu0 %v10618_v23  ;;  %5225 = vmatpush1.bf16.msra.mxu1 %v10621_v20  ;;  %v12744_v23 = vsel %vm3885_vm3, %v3908_v22, %v3912_v4  ;;  %v10687_v20 = vld [vmem:[#allocation7 + $0x648] ss:$16 sps:$4 sm:$0xff]   ;;  %v10734_v22 = vld [vmem:[#allocation7 + $0x744] ss:$16 sps:$4 sm:$0xff]  }
 0x466   : > { %5153 = vmatprep.subr.bf16.mxu0 %v10626_v8  ;;  %5226 = vmatprep.subr.bf16.mxu1 %v10629_v9  ;;  %v3910_v8 = vrot.slane %v12670_v25, 4  ;;  %v10692_v9 = vld [vmem:[#allocation7 + $0x664] ss:$16 sps:$4 sm:$0xff]  }
 0x467   : > { %v10752_v4 = vld [vmem:[#allocation7 + $0x7a4] ss:$16 sps:$4 sm:$0xff]  }
 0x469   : > { %5154 = vmatpush1.bf16.msra.mxu0 %v10624_v32  ;;  %5227 = vmatpush1.bf16.msra.mxu1 %v10627_v27  ;;  %v10695_v32 = vld [vmem:[#allocation7 + $0x66c] ss:$16 sps:$4 sm:$0xff]   ;;  %v10690_v27 = vld [vmem:[#allocation7 + $0x660] ss:$16 sps:$4 sm:$0xff]  }
 0x46a   : > { %5155 = vmatprep.subr.bf16.mxu0 %v10632_v28  ;;  %5228 = vmatprep.subr.bf16.mxu1 %v10635_v30  ;;  %v10693_v28 = vld [vmem:[#allocation7 + $0x668] ss:$16 sps:$4 sm:$0xff]   ;;  %v12752_v30 = vsel %vm3885_vm3, %v3905_v33, %v3910_v8  ;;  %v10767_v8 = vld [vmem:[#allocation7 + $0x7ec] ss:$16 sps:$4 sm:$0xff]  }
 0x46d   : > { %5156 = vmatpush1.bf16.msra.mxu0 %v10630_v55  ;;  %5229 = vmatpush1.bf16.msra.mxu1 %v10633_v39  ;;  %v10698_v55 = vld [vmem:[#allocation7 + $0x684] ss:$16 sps:$4 sm:$0xff]   ;;  %v10701_v39 = vld [vmem:[#allocation7 + $0x68c] ss:$16 sps:$4 sm:$0xff]  }
 0x46e   : > { %5157 = vmatprep.subr.bf16.mxu0 %v10638_v43  ;;  %5230 = vmatprep.subr.bf16.mxu1 %v10641_v35  ;;  %v10696_v43 = vld [vmem:[#allocation7 + $0x680] ss:$16 sps:$4 sm:$0xff]   ;;  %v10699_v35 = vld [vmem:[#allocation7 + $0x688] ss:$16 sps:$4 sm:$0xff]  }
 0x471   : > { %5158 = vmatpush1.bf16.msra.mxu0 %v10636_v51  ;;  %5231 = vmatpush1.bf16.msra.mxu1 %v10639_v36  ;;  %v10704_v51 = vld [vmem:[#allocation7 + $0x6a4] ss:$16 sps:$4 sm:$0xff]   ;;  %v10707_v36 = vld [vmem:[#allocation7 + $0x6ac] ss:$16 sps:$4 sm:$0xff]  }
 0x472   : > { %5159 = vmatprep.subr.bf16.mxu0 %v10644_v56  ;;  %5232 = vmatprep.subr.bf16.mxu1 %v10647_v53  ;;  %v10702_v56 = vld [vmem:[#allocation7 + $0x6a0] ss:$16 sps:$4 sm:$0xff]   ;;  %v10705_v53 = vld [vmem:[#allocation7 + $0x6a8] ss:$16 sps:$4 sm:$0xff]  }
 0x475   : > { %5160 = vmatpush1.bf16.msra.mxu0 %v10642_v57  ;;  %5233 = vmatpush1.bf16.msra.mxu1 %v10645_v58  ;;  %v10710_v57 = vld [vmem:[#allocation7 + $0x6c4] ss:$16 sps:$4 sm:$0xff]   ;;  %v10713_v58 = vld [vmem:[#allocation7 + $0x6cc] ss:$16 sps:$4 sm:$0xff]  }
 0x476   : > { %5161 = vmatprep.subr.bf16.mxu0 %v10650_v59  ;;  %5234 = vmatprep.subr.bf16.mxu1 %v10653_v44  ;;  %v10708_v59 = vld [vmem:[#allocation7 + $0x6c0] ss:$16 sps:$4 sm:$0xff]   ;;  %v10711_v44 = vld [vmem:[#allocation7 + $0x6c8] ss:$16 sps:$4 sm:$0xff]  }
 0x479   : > { %5162 = vmatpush1.bf16.msra.mxu0 %v10648_v46  ;;  %5235 = vmatpush1.bf16.msra.mxu1 %v10651_v62  ;;  %v10716_v46 = vld [vmem:[#allocation7 + $0x6e4] ss:$16 sps:$4 sm:$0xff]   ;;  %v10719_v62 = vld [vmem:[#allocation7 + $0x6ec] ss:$16 sps:$4 sm:$0xff]  }
 0x47a   : > { %5614 = vmatprep.subr.bf16.mxu0 %v10656_v61  ;;  %5687 = vmatprep.subr.bf16.mxu1 %v10659_v2  ;;  %v10714_v61 = vld [vmem:[#allocation7 + $0x6e0] ss:$16 sps:$4 sm:$0xff]   ;;  %v10717_v2 = vld [vmem:[#allocation7 + $0x6e8] ss:$16 sps:$4 sm:$0xff]  }
 0x47c   : > { %5166 = vmatmul.mubr.bf16.vlgmr.msra.gmra.mrb[48].mxu0 %v12677_v41  ;;  %5239 = vmatmul.mubr.bf16.vlgmr.msra.gmra.mrb[56].mxu1 %v12677_v41  ;;  %v10669_v41 = vld [vmem:[#allocation7 + $0x5e8] ss:$16 sps:$4 sm:$0xff]  }
 0x47d   : > { %9164 = vmatprep.mubr.msk.bf16.mxu0 %vm4216_vm2, %v12682_v48  ;;  %9168 = vmatprep.mubr.msk.bf16.mxu1 %vm4216_vm2, %v12682_v48  ;;  %v10677_v48 = vld [vmem:[#allocation7 + $0x60c] ss:$16 sps:$4 sm:$0xff]  }
 0x47e   : > { %5615 = vmatpush1.bf16.msra.mxu0 %v10654_v6  ;;  %5688 = vmatpush1.bf16.msra.mxu1 %v10657_v34  ;;  %v10722_v6 = vld [vmem:[#allocation7 + $0x704] ss:$16 sps:$4 sm:$0xff]   ;;  %v10725_v34 = vld [vmem:[#allocation7 + $0x70c] ss:$16 sps:$4 sm:$0xff]  }
 0x47f   : > { %5616 = vmatprep.subr.bf16.mxu0 %v10662_v11  ;;  %5689 = vmatprep.subr.bf16.mxu1 %v10665_v24  ;;  %v10720_v11 = vld [vmem:[#allocation7 + $0x700] ss:$16 sps:$4 sm:$0xff]   ;;  %v10723_v24 = vld [vmem:[#allocation7 + $0x708] ss:$16 sps:$4 sm:$0xff]  }
 0x482   : > { %5617 = vmatpush1.bf16.msra.mxu0 %v10660_v13  ;;  %5690 = vmatpush1.bf16.msra.mxu1 %v10663_v12  ;;  %v10728_v13 = vld [vmem:[#allocation7 + $0x724] ss:$16 sps:$4 sm:$0xff]   ;;  %v10731_v12 = vld [vmem:[#allocation7 + $0x72c] ss:$16 sps:$4 sm:$0xff]  }
 0x483   : > { %5618 = vmatprep.subr.bf16.mxu0 %v10668_v63  ;;  %5691 = vmatprep.subr.bf16.mxu1 %v10671_v3  ;;  %v10726_v63 = vld [vmem:[#allocation7 + $0x720] ss:$16 sps:$4 sm:$0xff]   ;;  %v10729_v3 = vld [vmem:[#allocation7 + $0x728] ss:$16 sps:$4 sm:$0xff]  }
 0x484   : > { %5176 = vmatmul.mubr.bf16.gmra.mrb[52].mxu0 %v12690_v1  ;;  %5249 = vmatmul.mubr.bf16.gmra.mrb[60].mxu1 %v12690_v1  ;;  %v3904_v1 = vrot.slane %v12628_v10, 4  ;;  %v10684_v10 = vld [vmem:[#allocation7 + $0x640] ss:$16 sps:$4 sm:$0xff]  }
 0x485   : > { %9165 = vmatprep.mubr.msk.bf16.mxu0 %vm4216_vm2, %v3909_v26  ;;  %9169 = vmatprep.mubr.msk.bf16.mxu1 %vm4216_vm2, %v3909_v26 }
 0x486   : > { %5619 = vmatpush1.bf16.msra.mxu0 %v10666_v0  ;;  %5692 = vmatpush1.bf16.msra.mxu1 %v10669_v41  ;;  %v12739_v17 = vsel %vm3885_vm3, %v3904_v1, %v3905_v33  ;;  %v10737_v0 = vld [vmem:[#allocation7 + $0x74c] ss:$16 sps:$4 sm:$0xff]   ;;  %v10732_v41 = vld [vmem:[#allocation7 + $0x740] ss:$16 sps:$4 sm:$0xff]  }
 0x487   : > { %5620 = vmatprep.subr.bf16.mxu0 %v10674_v29  ;;  %5693 = vmatprep.subr.bf16.mxu1 %v10677_v48  ;;  %v10740_v29 = vld [vmem:[#allocation7 + $0x764] ss:$16 sps:$4 sm:$0xff]   ;;  %v10743_v48 = vld [vmem:[#allocation7 + $0x76c] ss:$16 sps:$4 sm:$0xff]  }
 0x488   : > { %v10749_v33 = vld [vmem:[#allocation7 + $0x78c] ss:$16 sps:$4 sm:$0xff]  }
 0x489   : > { %v10755_v1 = vld [vmem:[#allocation7 + $0x7ac] ss:$16 sps:$4 sm:$0xff]  }
 0x48a   : > { %5621 = vmatpush1.bf16.msra.mxu0 %v10672_v5  ;;  %5694 = vmatpush1.bf16.msra.mxu1 %v10675_v18  ;;  %v10741_v5 = vld [vmem:[#allocation7 + $0x768] ss:$16 sps:$4 sm:$0xff]   ;;  %v10746_v18 = vld [vmem:[#allocation7 + $0x784] ss:$16 sps:$4 sm:$0xff]  }
 0x48b   : > { %5622 = vmatprep.subr.bf16.mxu0 %v10680_v14  ;;  %5695 = vmatprep.subr.bf16.mxu1 %v10683_v45  ;;  %v10744_v14 = vld [vmem:[#allocation7 + $0x780] ss:$16 sps:$4 sm:$0xff]   ;;  %v10747_v45 = vld [vmem:[#allocation7 + $0x788] ss:$16 sps:$4 sm:$0xff]  }
 0x48c   : > { %5186 = vmatmul.mubr.bf16.gmra.mrb[56].mxu0 %v12739_v17  ;;  %5259 = vmatmul.mubr.bf16.gmra.mrb[64].mxu1 %v12739_v17 }
 0x48d   : > { %9166 = vmatprep.mubr.msk.bf16.mxu0 %vm4216_vm2, %v12744_v23  ;;  %9170 = vmatprep.mubr.msk.bf16.mxu1 %vm4216_vm2, %v12744_v23 }
 0x48e   : > { %5623 = vmatpush1.bf16.msra.mxu0 %v10678_v19  ;;  %5696 = vmatpush1.bf16.msra.mxu1 %v10681_v21  ;;  %v10750_v19 = vld [vmem:[#allocation7 + $0x7a0] ss:$16 sps:$4 sm:$0xff]   ;;  %v10753_v21 = vld [vmem:[#allocation7 + $0x7a8] ss:$16 sps:$4 sm:$0xff]  }
 0x48f   : > { %5624 = vmatprep.subr.bf16.mxu0 %v10686_v7  ;;  %5697 = vmatprep.subr.bf16.mxu1 %v10689_v54  ;;  %v10758_v7 = vld [vmem:[#allocation7 + $0x7c4] ss:$16 sps:$4 sm:$0xff]   ;;  %v10761_v54 = vld [vmem:[#allocation7 + $0x7cc] ss:$16 sps:$4 sm:$0xff]  }
 0x492   : > { %5625 = vmatpush1.bf16.msra.mxu0 %v10684_v10  ;;  %5698 = vmatpush1.bf16.msra.mxu1 %v10687_v20  ;;  %v10756_v10 = vld [vmem:[#allocation7 + $0x7c0] ss:$16 sps:$4 sm:$0xff]   ;;  %v10759_v20 = vld [vmem:[#allocation7 + $0x7c8] ss:$16 sps:$4 sm:$0xff]  }
 0x493   : > { %5626 = vmatprep.subr.bf16.mxu0 %v10692_v9  ;;  %5699 = vmatprep.subr.bf16.mxu1 %v10695_v32  ;;  %v10765_v9 = vld [vmem:[#allocation7 + $0x7e8] ss:$16 sps:$4 sm:$0xff]   ;;  %v10770_v32 = vld [vmem:[#allocation7 + $0x804] ss:$16 sps:$4 sm:$0xff]  }
 0x494   : > { %5196 = vmatmul.mubr.bf16.gmra.mrb[60].mxu0 %v12752_v30  ;;  %5269 = vmatmul.mubr.bf16.gmra.mrb[68].mxu1 %v12752_v30 }
 0x495   : > { %9231 = vmatprep.mubr.msk.bf16.mxu0 %vm4216_vm2, %v3909_v26  ;;  %9235 = vmatprep.mubr.msk.bf16.mxu1 %vm4216_vm2, %v3909_v26  ;;  %v10738_v26 = vld [vmem:[#allocation7 + $0x760] ss:$16 sps:$4 sm:$0xff]  }
 0x496   : > { %5627 = vmatpush1.bf16.msra.mxu0 %v10690_v27  ;;  %5700 = vmatpush1.bf16.msra.mxu1 %v10693_v28  ;;  %v10773_v27 = vld [vmem:[#allocation7 + $0x80c] ss:$16 sps:$4 sm:$0xff]   ;;  %v10768_v28 = vld [vmem:[#allocation7 + $0x800] ss:$16 sps:$4 sm:$0xff]  }
 0x497   : > { %5628 = vmatprep.subr.bf16.mxu0 %v10698_v55  ;;  %5701 = vmatprep.subr.bf16.mxu1 %v10701_v39  ;;  %v10771_v55 = vld [vmem:[#allocation7 + $0x808] ss:$16 sps:$4 sm:$0xff]   ;;  %v10779_v39 = vld [vmem:[#allocation7 + $0x82c] ss:$16 sps:$4 sm:$0xff]  }
 0x49a   : > { %5629 = vmatpush1.bf16.msra.mxu0 %v10696_v43  ;;  %5702 = vmatpush1.bf16.msra.mxu1 %v10699_v35  ;;  %v10774_v43 = vld [vmem:[#allocation7 + $0x820] ss:$16 sps:$4 sm:$0xff]   ;;  %v10777_v35 = vld [vmem:[#allocation7 + $0x828] ss:$16 sps:$4 sm:$0xff]  }
 0x49b   : > { %5630 = vmatprep.subr.bf16.mxu0 %v10704_v51  ;;  %5703 = vmatprep.subr.bf16.mxu1 %v10707_v36  ;;  %v10782_v51 = vld [vmem:[#allocation7 + $0x844] ss:$16 sps:$4 sm:$0xff]   ;;  %v10785_v36 = vld [vmem:[#allocation7 + $0x84c] ss:$16 sps:$4 sm:$0xff]  }
 0x49e   : > { %5631 = vmatpush1.bf16.msra.mxu0 %v10702_v56  ;;  %5704 = vmatpush1.bf16.msra.mxu1 %v10705_v53  ;;  %v10780_v56 = vld [vmem:[#allocation7 + $0x840] ss:$16 sps:$4 sm:$0xff]   ;;  %v10783_v53 = vld [vmem:[#allocation7 + $0x848] ss:$16 sps:$4 sm:$0xff]  }
 0x49f   : > { %5632 = vmatprep.subr.bf16.mxu0 %v10710_v57  ;;  %5705 = vmatprep.subr.bf16.mxu1 %v10713_v58  ;;  %v10788_v57 = vld [vmem:[#allocation7 + $0x864] ss:$16 sps:$4 sm:$0xff]   ;;  %v10791_v58 = vld [vmem:[#allocation7 + $0x86c] ss:$16 sps:$4 sm:$0xff]  }
 0x4a2   : > { %5633 = vmatpush1.bf16.msra.mxu0 %v10708_v59  ;;  %5706 = vmatpush1.bf16.msra.mxu1 %v10711_v44  ;;  %v10786_v59 = vld [vmem:[#allocation7 + $0x860] ss:$16 sps:$4 sm:$0xff]   ;;  %v10789_v44 = vld [vmem:[#allocation7 + $0x868] ss:$16 sps:$4 sm:$0xff]  }
 0x4a3   : > { %5634 = vmatprep.subr.bf16.mxu0 %v10716_v46  ;;  %5707 = vmatprep.subr.bf16.mxu1 %v10719_v62  ;;  %v10794_v46 = vld [vmem:[#allocation7 + $0x884] ss:$16 sps:$4 sm:$0xff]   ;;  %v10797_v62 = vld [vmem:[#allocation7 + $0x88c] ss:$16 sps:$4 sm:$0xff]  }
 0x4a6   : > { %5635 = vmatpush1.bf16.msra.mxu0 %v10714_v61  ;;  %5708 = vmatpush1.bf16.msra.mxu1 %v10717_v2  ;;  %v10792_v61 = vld [vmem:[#allocation7 + $0x880] ss:$16 sps:$4 sm:$0xff]   ;;  %v10795_v2 = vld [vmem:[#allocation7 + $0x888] ss:$16 sps:$4 sm:$0xff]  }
 0x4a7   : > { %5636 = vmatprep.subr.bf16.mxu0 %v10722_v6  ;;  %5709 = vmatprep.subr.bf16.mxu1 %v10725_v34  ;;  %v10800_v6 = vld [vmem:[#allocation7 + $0x8a4] ss:$16 sps:$4 sm:$0xff]   ;;  %v10803_v34 = vld [vmem:[#allocation7 + $0x8ac] ss:$16 sps:$4 sm:$0xff]  }
 0x4aa   : > { %5637 = vmatpush1.bf16.msra.mxu0 %v10720_v11  ;;  %5710 = vmatpush1.bf16.msra.mxu1 %v10723_v24  ;;  %v10798_v11 = vld [vmem:[#allocation7 + $0x8a0] ss:$16 sps:$4 sm:$0xff]   ;;  %v10806_v24 = vld [vmem:[#allocation7 + $0x8c4] ss:$16 sps:$4 sm:$0xff]  }
 0x4ab   : > { %5638 = vmatprep.subr.bf16.mxu0 %v10728_v13  ;;  %5711 = vmatprep.subr.bf16.mxu1 %v10731_v12  ;;  %v10809_v13 = vld [vmem:[#allocation7 + $0x8cc] ss:$16 sps:$4 sm:$0xff]   ;;  %v10804_v12 = vld [vmem:[#allocation7 + $0x8c0] ss:$16 sps:$4 sm:$0xff]  }
 0x4ae   : > { %5639 = vmatpush1.bf16.msra.mxu0 %v10726_v63  ;;  %5712 = vmatpush1.bf16.msra.mxu1 %v10729_v3  ;;  %v10807_v63 = vld [vmem:[#allocation7 + $0x8c8] ss:$16 sps:$4 sm:$0xff]   ;;  %v10812_v3 = vld [vmem:[#allocation7 + $0x8e4] ss:$16 sps:$4 sm:$0xff]  }
 0x4af   : > { %5640 = vmatprep.subr.bf16.mxu0 %v10734_v22  ;;  %5713 = vmatprep.subr.bf16.mxu1 %v10737_v0  ;;  %v10815_v22 = vld [vmem:[#allocation7 + $0x8ec] ss:$16 sps:$4 sm:$0xff]   ;;  %v10810_v0 = vld [vmem:[#allocation7 + $0x8e0] ss:$16 sps:$4 sm:$0xff]  }
 0x4b2   : > { %5641 = vmatpush1.bf16.msra.mxu0 %v10732_v41  ;;  %5714 = vmatpush1.bf16.msra.mxu1 %v10735_v15  ;;  %v10813_v41 = vld [vmem:[#allocation7 + $0x8e8] ss:$16 sps:$4 sm:$0xff]   ;;  %v10818_v15 = vld [vmem:[#allocation7 + $0x904] ss:$16 sps:$4 sm:$0xff]  }
 0x4b3   : > { %5642 = vmatprep.subr.bf16.mxu0 %v10740_v29  ;;  %5715 = vmatprep.subr.bf16.mxu1 %v10743_v48  ;;  %v10821_v29 = vld [vmem:[#allocation7 + $0x90c] ss:$16 sps:$4 sm:$0xff]   ;;  %v10816_v48 = vld [vmem:[#allocation7 + $0x900] ss:$16 sps:$4 sm:$0xff]  }
 0x4b6   : > { %5643 = vmatpush1.bf16.msra.mxu0 %v10738_v26  ;;  %5716 = vmatpush1.bf16.msra.mxu1 %v10741_v5  ;;  %v10819_v26 = vld [vmem:[#allocation7 + $0x908] ss:$16 sps:$4 sm:$0xff]   ;;  %v10824_v5 = vld [vmem:[#allocation7 + $0x924] ss:$16 sps:$4 sm:$0xff]  }
 0x4b7   : > { %6095 = vmatprep.subr.bf16.mxu0 %v10746_v18  ;;  %6168 = vmatprep.subr.bf16.mxu1 %v10749_v33  ;;  %v10827_v18 = vld [vmem:[#allocation7 + $0x92c] ss:$16 sps:$4 sm:$0xff]   ;;  %v10822_v33 = vld [vmem:[#allocation7 + $0x920] ss:$16 sps:$4 sm:$0xff]  }
 0x4b9   : > { %5647 = vmatmul.mubr.bf16.vlgmr.msra.gmra.mrb[48].mxu0 %v12739_v17  ;;  %5720 = vmatmul.mubr.bf16.vlgmr.msra.gmra.mrb[56].mxu1 %v12739_v17  ;;  %v10764_v17 = vld [vmem:[#allocation7 + $0x7e4] ss:$16 sps:$4 sm:$0xff]  }
 0x4ba   : > { %9232 = vmatprep.mubr.msk.bf16.mxu0 %vm4216_vm2, %v12744_v23  ;;  %9236 = vmatprep.mubr.msk.bf16.mxu1 %vm4216_vm2, %v12744_v23  ;;  %v10762_v23 = vld [vmem:[#allocation7 + $0x7e0] ss:$16 sps:$4 sm:$0xff]  }
 0x4bb   : > { %6096 = vmatpush1.bf16.msra.mxu0 %v10744_v14  ;;  %6169 = vmatpush1.bf16.msra.mxu1 %v10747_v45  ;;  %v10825_v14 = vld [vmem:[#allocation7 + $0x928] ss:$16 sps:$4 sm:$0xff]   ;;  %v10830_v45 = vld [vmem:[#allocation7 + $0x944] ss:$16 sps:$4 sm:$0xff]  }
 0x4bc   : > { %6097 = vmatprep.subr.bf16.mxu0 %v10752_v4  ;;  %6170 = vmatprep.subr.bf16.mxu1 %v10755_v1  ;;  %v10833_v4 = vld [vmem:[#allocation7 + $0x94c] ss:$16 sps:$4 sm:$0xff]   ;;  %v10828_v1 = vld [vmem:[#allocation7 + $0x940] ss:$16 sps:$4 sm:$0xff]  }
 0x4bf   : > { %6098 = vmatpush1.bf16.msra.mxu0 %v10750_v19  ;;  %6171 = vmatpush1.bf16.msra.mxu1 %v10753_v21  ;;  %v10831_v19 = vld [vmem:[#allocation7 + $0x948] ss:$16 sps:$4 sm:$0xff]  }
 0x4c0   : > { %6099 = vmatprep.subr.bf16.mxu0 %v10758_v7  ;;  %6172 = vmatprep.subr.bf16.mxu1 %v10761_v54  ;;  %v10836_v21 = vld [vmem:[#allocation10 + $0x194] ss:$16 sps:$4 sm:$0xff]   ;;  %v10839_v7 = vld [vmem:[#allocation10 + $0x19c] ss:$16 sps:$4 sm:$0xff]   ;;  %v10834_v54 = vld [vmem:[#allocation10 + $0x190] ss:$16 sps:$4 sm:$0xff]  }
 0x4c1   : > { %5657 = vmatmul.mubr.bf16.gmra.mrb[52].mxu0 %v12752_v30  ;;  %5730 = vmatmul.mubr.bf16.gmra.mrb[60].mxu1 %v12752_v30  ;;  %v10776_v30 = vld [vmem:[#allocation7 + $0x824] ss:$16 sps:$4 sm:$0xff]  }
 0x4c2   : > { %9233 = vmatprep.mubr.msk.bf16.mxu0 %vm4216_vm2, %v12593_v37  ;;  %9237 = vmatprep.mubr.msk.bf16.mxu1 %vm4216_vm2, %v12593_v37 }
 0x4c3   : > { %6100 = vmatpush1.bf16.msra.mxu0 %v10756_v10  ;;  %6173 = vmatpush1.bf16.msra.mxu1 %v10759_v20  ;;  %v10837_v10 = vld [vmem:[#allocation10 + $0x198] ss:$16 sps:$4 sm:$0xff]   ;;  %v10842_v20 = vld [vmem:[#allocation10 + $0x1b4] ss:$16 sps:$4 sm:$0xff]  }
 0x4c4   : > { %6101 = vmatprep.subr.bf16.mxu0 %v10764_v17  ;;  %6174 = vmatprep.subr.bf16.mxu1 %v10767_v8  ;;  %v10845_v17 = vld [vmem:[#allocation10 + $0x1bc] ss:$16 sps:$4 sm:$0xff]   ;;  %v10840_v8 = vld [vmem:[#allocation10 + $0x1b0] ss:$16 sps:$4 sm:$0xff]  }
 0x4c7   : > { %6102 = vmatpush1.bf16.msra.mxu0 %v10762_v23  ;;  %6175 = vmatpush1.bf16.msra.mxu1 %v10765_v9  ;;  %v10843_v23 = vld [vmem:[#allocation10 + $0x1b8] ss:$16 sps:$4 sm:$0xff]   ;;  %v10848_v9 = vld [vmem:[#allocation10 + $0x1d4] ss:$16 sps:$4 sm:$0xff]  }
 0x4c8   : > { %6103 = vmatprep.subr.bf16.mxu0 %v10770_v32  ;;  %6176 = vmatprep.subr.bf16.mxu1 %v10773_v27  ;;  %v10851_v32 = vld [vmem:[#allocation10 + $0x1dc] ss:$16 sps:$4 sm:$0xff]   ;;  %v10846_v27 = vld [vmem:[#allocation10 + $0x1d0] ss:$16 sps:$4 sm:$0xff]  }
 0x4c9   : > { %5667 = vmatmul.mubr.bf16.gmra.mrb[56].mxu0 %v12590_v31  ;;  %5740 = vmatmul.mubr.bf16.gmra.mrb[64].mxu1 %v12590_v31 }
 0x4ca   : > { %9234 = vmatprep.mubr.msk.bf16.mxu0 %vm4216_vm2, %v12607_v42  ;;  %9238 = vmatprep.mubr.msk.bf16.mxu1 %vm4216_vm2, %v12607_v42 }
 0x4cb   : > { %6104 = vmatpush1.bf16.msra.mxu0 %v10768_v28  ;;  %6177 = vmatpush1.bf16.msra.mxu1 %v10771_v55  ;;  %v10849_v28 = vld [vmem:[#allocation10 + $0x1d8] ss:$16 sps:$4 sm:$0xff]   ;;  %v10857_v55 = vld [vmem:[#allocation10 + $0x1fc] ss:$16 sps:$4 sm:$0xff]  }
 0x4cc   : > { %6105 = vmatprep.subr.bf16.mxu0 %v10776_v30  ;;  %6178 = vmatprep.subr.bf16.mxu1 %v10779_v39  ;;  %v10855_v30 = vld [vmem:[#allocation10 + $0x1f8] ss:$16 sps:$4 sm:$0xff]   ;;  %v10860_v39 = vld [vmem:[#allocation10 + $0x214] ss:$16 sps:$4 sm:$0xff]  }
 0x4cf   : > { %6106 = vmatpush1.bf16.msra.mxu0 %v10774_v43  ;;  %6179 = vmatpush1.bf16.msra.mxu1 %v10777_v35  ;;  %v10863_v43 = vld [vmem:[#allocation10 + $0x21c] ss:$16 sps:$4 sm:$0xff]   ;;  %v10858_v35 = vld [vmem:[#allocation10 + $0x210] ss:$16 sps:$4 sm:$0xff]  }
 0x4d0   : > { %6107 = vmatprep.subr.bf16.mxu0 %v10782_v51  ;;  %6180 = vmatprep.subr.bf16.mxu1 %v10785_v36  ;;  %v10861_v51 = vld [vmem:[#allocation10 + $0x218] ss:$16 sps:$4 sm:$0xff]   ;;  %v10864_v36 = vld [vmem:[#allocation10 + $0x230] ss:$16 sps:$4 sm:$0xff]  }
 0x4d1   : > { %5677 = vmatmul.mubr.bf16.gmra.mrb[60].mxu0 %v12605_v60  ;;  %5750 = vmatmul.mubr.bf16.gmra.mrb[68].mxu1 %v12605_v60 }
 0x4d2   : > { %9299 = vmatprep.mubr.msk.bf16.mxu0 %vm4216_vm2, %v12593_v37  ;;  %9303 = vmatprep.mubr.msk.bf16.mxu1 %vm4216_vm2, %v12593_v37  ;;  %v10801_v37 = vld [vmem:[#allocation7 + $0x8a8] ss:$16 sps:$4 sm:$0xff]  }
 0x4d3   : > { %6108 = vmatpush1.bf16.msra.mxu0 %v10780_v56  ;;  %6181 = vmatpush1.bf16.msra.mxu1 %v10783_v53  ;;  %v10867_v56 = vld [vmem:[#allocation10 + $0x238] ss:$16 sps:$4 sm:$0xff]   ;;  %v10875_v53 = vld [vmem:[#allocation10 + $0x25c] ss:$16 sps:$4 sm:$0xff]  }
 0x4d4   : > { %6109 = vmatprep.subr.bf16.mxu0 %v10788_v57  ;;  %6182 = vmatprep.subr.bf16.mxu1 %v10791_v58  ;;  %v10870_v57 = vld [vmem:[#allocation10 + $0x250] ss:$16 sps:$4 sm:$0xff]   ;;  %v10873_v58 = vld [vmem:[#allocation10 + $0x258] ss:$16 sps:$4 sm:$0xff]  }
 0x4d7   : > { %6110 = vmatpush1.bf16.msra.mxu0 %v10786_v59  ;;  %6183 = vmatpush1.bf16.msra.mxu1 %v10789_v44  ;;  %v10881_v59 = vld [vmem:[#allocation10 + $0x27c] ss:$16 sps:$4 sm:$0xff]   ;;  %v10876_v44 = vld [vmem:[#allocation10 + $0x270] ss:$16 sps:$4 sm:$0xff]  }
 0x4d8   : > { %6111 = vmatprep.subr.bf16.mxu0 %v10794_v46  ;;  %6184 = vmatprep.subr.bf16.mxu1 %v10797_v62  ;;  %v10884_v46 = vld [vmem:[#allocation10 + $0x294] ss:$16 sps:$4 sm:$0xff]   ;;  %v10887_v62 = vld [vmem:[#allocation10 + $0x29c] ss:$16 sps:$4 sm:$0xff]  }
 0x4db   : > { %6112 = vmatpush1.bf16.msra.mxu0 %v10792_v61  ;;  %6185 = vmatpush1.bf16.msra.mxu1 %v10795_v2  ;;  %v10882_v61 = vld [vmem:[#allocation10 + $0x290] ss:$16 sps:$4 sm:$0xff]   ;;  %v10885_v2 = vld [vmem:[#allocation10 + $0x298] ss:$16 sps:$4 sm:$0xff]  }
 0x4dc   : > { %6113 = vmatprep.subr.bf16.mxu0 %v10800_v6  ;;  %6186 = vmatprep.subr.bf16.mxu1 %v10803_v34  ;;  %v10890_v6 = vld [vmem:[#allocation10 + $0x2b4] ss:$16 sps:$4 sm:$0xff]   ;;  %v10893_v34 = vld [vmem:[#allocation10 + $0x2bc] ss:$16 sps:$4 sm:$0xff]  }
 0x4df   : > { %6114 = vmatpush1.bf16.msra.mxu0 %v10798_v11  ;;  %6187 = vmatpush1.bf16.msra.mxu1 %v10801_v37  ;;  %v10888_v11 = vld [vmem:[#allocation10 + $0x2b0] ss:$16 sps:$4 sm:$0xff]   ;;  %v10891_v37 = vld [vmem:[#allocation10 + $0x2b8] ss:$16 sps:$4 sm:$0xff]  }
 0x4e0   : > { %6115 = vmatprep.subr.bf16.mxu0 %v10806_v24  ;;  %6188 = vmatprep.subr.bf16.mxu1 %v10809_v13  ;;  %v10896_v24 = vld [vmem:[#allocation10 + $0x2d4] ss:$16 sps:$4 sm:$0xff]   ;;  %v10899_v13 = vld [vmem:[#allocation10 + $0x2dc] ss:$16 sps:$4 sm:$0xff]  }
 0x4e3   : > { %6116 = vmatpush1.bf16.msra.mxu0 %v10804_v12  ;;  %6189 = vmatpush1.bf16.msra.mxu1 %v10807_v63  ;;  %v10894_v12 = vld [vmem:[#allocation10 + $0x2d0] ss:$16 sps:$4 sm:$0xff]   ;;  %v10897_v63 = vld [vmem:[#allocation10 + $0x2d8] ss:$16 sps:$4 sm:$0xff]  }
 0x4e4   : > { %6117 = vmatprep.subr.bf16.mxu0 %v10812_v3  ;;  %6190 = vmatprep.subr.bf16.mxu1 %v10815_v22  ;;  %v10902_v3 = vld [vmem:[#allocation10 + $0x2f4] ss:$16 sps:$4 sm:$0xff]   ;;  %v10905_v22 = vld [vmem:[#allocation10 + $0x2fc] ss:$16 sps:$4 sm:$0xff]  }
 0x4e7   : > { %6118 = vmatpush1.bf16.msra.mxu0 %v10810_v0  ;;  %6191 = vmatpush1.bf16.msra.mxu1 %v10813_v41  ;;  %v10900_v0 = vld [vmem:[#allocation10 + $0x2f0] ss:$16 sps:$4 sm:$0xff]   ;;  %v10903_v41 = vld [vmem:[#allocation10 + $0x2f8] ss:$16 sps:$4 sm:$0xff]  }
 0x4e8   : > { %6119 = vmatprep.subr.bf16.mxu0 %v10818_v15  ;;  %6192 = vmatprep.subr.bf16.mxu1 %v10821_v29  ;;  %v6426_v15 = vld [vmem:[#allocation10 + $0x310] sm:$0xff]  ;;  %v6427_v29 = vld [vmem:[#allocation10 + $0x318] sm:$0xff] }
 0x4eb   : > { %6120 = vmatpush1.bf16.msra.mxu0 %v10816_v48  ;;  %6193 = vmatpush1.bf16.msra.mxu1 %v10819_v26  ;;  %v9356_v48 = vcombine.high %v6426_v15, %v6426_v15  ;;  %v9358_v26 = vcombine.high %v6427_v29, %v6427_v29 }
 0x4ec   : > { %6121 = vmatprep.subr.bf16.mxu0 %v10824_v5  ;;  %6194 = vmatprep.subr.bf16.mxu1 %v10827_v18  ;;  %v9355_v5 = vcombine.low %v6426_v15, %v6426_v15  ;;  %v9357_v18 = vcombine.low %v6427_v29, %v6427_v29 }
 0x4ef   : > { %6122 = vmatpush1.bf16.msra.mxu0 %v10822_v33  ;;  %6195 = vmatpush1.bf16.msra.mxu1 %v10825_v14  ;;  %v6789_v33 = vsel %vm3885_vm3, %v9355_v5, 0  ;;  %v6795_v14 = vsel %vm3885_vm3, %v9357_v18, 0 }
 0x4f0   : > { %6123 = vmatprep.subr.bf16.mxu0 %v10830_v45  ;;  %6196 = vmatprep.subr.bf16.mxu1 %v10833_v4  ;;  %v10912_v45 = vld [vmem:[#allocation10 + $0x4] ss:$16 sps:$4 sm:$0xff]   ;;  %v10915_v4 = vld [vmem:[#allocation10 + $0xc] ss:$16 sps:$4 sm:$0xff]  }
 0x4f3   : > { %6124 = vmatpush1.bf16.msra.mxu0 %v10828_v1  ;;  %6197 = vmatpush1.bf16.msra.mxu1 %v10831_v19 }
 0x4f4   : > { %6800 = vmatprep.subr.bf16.mxu0 %v10836_v21  ;;  %6841 = vmatprep.subr.bf16.mxu1 %v10839_v7 }
 0x4f6   : > { %6128 = vmatmul.mubr.bf16.vlgmr.msra.gmra.mrb[48].mxu0 %v12590_v31  ;;  %6201 = vmatmul.mubr.bf16.vlgmr.msra.gmra.mrb[56].mxu1 %v12590_v31  ;;  %v10854_v31 = vld [vmem:[#allocation10 + $0x1f4] ss:$16 sps:$4 sm:$0xff]  }
 0x4f7   : > { %9300 = vmatprep.mubr.msk.bf16.mxu0 %vm4216_vm2, %v12607_v42  ;;  %9304 = vmatprep.mubr.msk.bf16.mxu1 %vm4216_vm2, %v12607_v42  ;;  %v10852_v42 = vld [vmem:[#allocation10 + $0x1f0] ss:$16 sps:$4 sm:$0xff]  }
 0x4f8   : > { %6801 = vmatpush1.bf16.msra.mxu0 %v10834_v54  ;;  %6842 = vmatpush1.bf16.msra.mxu1 %v10837_v10 }
 0x4f9   : > { %6802 = vmatprep.subr.bf16.mxu0 %v10842_v20  ;;  %6843 = vmatprep.subr.bf16.mxu1 %v10845_v17 }
 0x4fc   : > { %6803 = vmatpush1.bf16.msra.mxu0 %v10840_v8  ;;  %6844 = vmatpush1.bf16.msra.mxu1 %v10843_v23 }
 0x4fd   : > { %6804 = vmatprep.subr.bf16.mxu0 %v10848_v9  ;;  %6845 = vmatprep.subr.bf16.mxu1 %v10851_v32 }
 0x4fe   : > { %6138 = vmatmul.mubr.bf16.gmra.mrb[52].mxu0 %v12605_v60  ;;  %6211 = vmatmul.mubr.bf16.gmra.mrb[60].mxu1 %v12605_v60  ;;  %v10866_v60 = vld [vmem:[#allocation10 + $0x234] ss:$16 sps:$4 sm:$0xff]  }
 0x4ff   : > { %9301 = vmatprep.mubr.msk.bf16.mxu0 %vm4216_vm2, %v12645_v50  ;;  %9305 = vmatprep.mubr.msk.bf16.mxu1 %vm4216_vm2, %v12645_v50  ;;  %v10869_v50 = vld [vmem:[#allocation10 + $0x23c] ss:$16 sps:$4 sm:$0xff]  }
 0x500   : > { %6805 = vmatpush1.bf16.msra.mxu0 %v10846_v27  ;;  %6846 = vmatpush1.bf16.msra.mxu1 %v10849_v28 }
 0x501   : > { %6806 = vmatprep.subr.bf16.mxu0 %v10854_v31  ;;  %6847 = vmatprep.subr.bf16.mxu1 %v10857_v55 }
 0x504   : > { %6807 = vmatpush1.bf16.msra.mxu0 %v10852_v42  ;;  %6848 = vmatpush1.bf16.msra.mxu1 %v10855_v30 }
 0x505   : > { %6808 = vmatprep.subr.bf16.mxu0 %v10860_v39  ;;  %6849 = vmatprep.subr.bf16.mxu1 %v10863_v43 }
 0x506   : > { %6148 = vmatmul.mubr.bf16.gmra.mrb[56].mxu0 %v12642_v16  ;;  %6221 = vmatmul.mubr.bf16.gmra.mrb[64].mxu1 %v12642_v16  ;;  %v10872_v16 = vld [vmem:[#allocation10 + $0x254] ss:$16 sps:$4 sm:$0xff]  }
 0x507   : > { %9302 = vmatprep.mubr.msk.bf16.mxu0 %vm4216_vm2, %v12672_v38  ;;  %9306 = vmatprep.mubr.msk.bf16.mxu1 %vm4216_vm2, %v12672_v38  ;;  %v10878_v38 = vld [vmem:[#allocation10 + $0x274] ss:$16 sps:$4 sm:$0xff]  }
 0x508   : > { %6809 = vmatpush1.bf16.msra.mxu0 %v10858_v35  ;;  %6850 = vmatpush1.bf16.msra.mxu1 %v10861_v51 }
 0x509   : > { %6810 = vmatprep.subr.bf16.mxu0 %v10866_v60  ;;  %6851 = vmatprep.subr.bf16.mxu1 %v10869_v50 }
 0x50c   : > { %6811 = vmatpush1.bf16.msra.mxu0 %v10864_v36  ;;  %6852 = vmatpush1.bf16.msra.mxu1 %v10867_v56  ;;  %v1193_v36 = vld [vmem:[#allocation8] sm:$0x3] }
 0x50d   : > { %6812 = vmatprep.subr.bf16.mxu0 %v10872_v16  ;;  %6853 = vmatprep.subr.bf16.mxu1 %v10875_v53 }
 0x50e   : > { %6158 = vmatmul.mubr.bf16.gmra.mrb[60].mxu0 %v12670_v25  ;;  %6231 = vmatmul.mubr.bf16.gmra.mrb[68].mxu1 %v12670_v25  ;;  %v10879_v25 = vld [vmem:[#allocation10 + $0x278] ss:$16 sps:$4 sm:$0xff]  }
 0x510   : > { %6813 = vmatpush1.bf16.msra.mxu0 %v10870_v57  ;;  %6854 = vmatpush1.bf16.msra.mxu1 %v10873_v58  ;;  %v6301_v57 = vrot.slane %v1193_v36, %v12528_v47 }
 0x511   : > { %6814 = vmatprep.subr.bf16.mxu0 %v10878_v38  ;;  %6855 = vmatprep.subr.bf16.mxu1 %v10881_v59 }
 0x514   : > { %6815 = vmatpush1.bf16.msra.mxu0 %v10876_v44  ;;  %6856 = vmatpush1.bf16.msra.mxu1 %v10879_v25  ;;  %v6305_v44 = vrot.slane %v1193_v36, %v12534_v52  ;;  %v10919_v36 = vld [vmem:[#allocation10 + $0x28] ss:$16 sps:$4 sm:$0xff]  }
 0x515   : > { %6816 = vmatprep.subr.bf16.mxu0 %v10884_v46  ;;  %6857 = vmatprep.subr.bf16.mxu1 %v10887_v62 }
 0x518   : > { %6817 = vmatpush1.bf16.msra.mxu0 %v10882_v61  ;;  %6858 = vmatpush1.bf16.msra.mxu1 %v10885_v2 }
 0x519   : > { %6818 = vmatprep.subr.bf16.mxu0 %v10890_v6  ;;  %6859 = vmatprep.subr.bf16.mxu1 %v10893_v34 }
 0x51c   : > { %6819 = vmatpush1.bf16.msra.mxu0 %v10888_v11  ;;  %6860 = vmatpush1.bf16.msra.mxu1 %v10891_v37 }
 0x51d   : > { %6820 = vmatprep.subr.bf16.mxu0 %v10896_v24  ;;  %6861 = vmatprep.subr.bf16.mxu1 %v10899_v13 }
 0x520   : > { %6821 = vmatpush1.bf16.msra.mxu0 %v10894_v12  ;;  %6862 = vmatpush1.bf16.msra.mxu1 %v10897_v63 }
 0x521   : > { %6822 = vmatprep.subr.bf16.mxu0 %v10902_v3  ;;  %6863 = vmatprep.subr.bf16.mxu1 %v10905_v22 }
 0x524   : > { %6823 = vmatpush1.bf16.msra.mxu0 %v10900_v0  ;;  %6864 = vmatpush1.bf16.msra.mxu1 %v10903_v41 }
 0x525   : > { %9359 = vmatprep.subr.msk.bf16.mxu0 %vm3885_vm3, %v9356_v48  ;;  %9361 = vmatprep.subr.msk.bf16.mxu1 %vm3885_vm3, %v9358_v26 }
 0x528   : > { %6825 = vmatpush1.bf16.msra.mxu0 %v6789_v33  ;;  %6866 = vmatpush1.bf16.msra.mxu1 %v6795_v14 }
 0x529   : > { %7147 = vmatprep.subr.bf16.mxu0 %v10912_v45  ;;  %7188 = vmatprep.subr.bf16.mxu1 %v10915_v4 }
 0x5c9   : > { %v6129_v1 = vpop.f32.mrb[48].mxu0  ;;  %v6202_v19 = vpop.f32.mrb[56].mxu1 }
 0x5ca   : > { %v6273_v21 = vmax.f32 %v6129_v1, %v6202_v19  ;;  %v6131_v7 = vpop.f32.mrb[49].mxu0  ;;  %v6204_v54 = vpop.f32.mrb[57].mxu1 }
 0x5cb   : > { %v6274_v10 = vmax.f32 %v6131_v7, %v6204_v54  ;;  %v6133_v20 = vpop.f32.mrb[50].mxu0  ;;  %v6206_v17 = vpop.f32.mrb[58].mxu1 }
 0x5cc   : > { %v6275_v8 = vmax.f32 %v6133_v20, %v6206_v17  ;;  %v6135_v23 = vpop.f32.mrb[51].mxu0  ;;  %v6208_v9 = vpop.f32.mrb[59].mxu1 }
 0x5cd   : > { %v6276_v32 = vmax.f32 %v6135_v23, %v6208_v9 }
 0x5d1   : > { %v6139_v27 = vpop.f32.mrb[52].mxu0  ;;  %v6212_v28 = vpop.f32.mrb[60].mxu1 }
 0x5d2   : > { %v6277_v31 = vmax.f32 %v6139_v27, %v6212_v28  ;;  %v6141_v55 = vpop.f32.mrb[53].mxu0  ;;  %v6214_v42 = vpop.f32.mrb[61].mxu1  ;;  %v10910_v27 = vld [vmem:[#allocation10] ss:$16 sps:$4 sm:$0xff]   ;;  %v10913_v28 = vld [vmem:[#allocation10 + $0x8] ss:$16 sps:$4 sm:$0xff]  }
 0x5d3   : > { %v6278_v30 = vmax.f32 %v6141_v55, %v6214_v42  ;;  %v6143_v39 = vpop.f32.mrb[54].mxu0  ;;  %v6216_v43 = vpop.f32.mrb[62].mxu1 }
 0x5d4   : > { %v6279_v35 = vmax.f32 %v6143_v39, %v6216_v43  ;;  %v6145_v51 = vpop.f32.mrb[55].mxu0  ;;  %v6218_v60 = vpop.f32.mrb[63].mxu1  ;;  %v10921_v39 = vld [vmem:[#allocation10 + $0x2c] ss:$16 sps:$4 sm:$0xff]  }
 0x5d5   : > { %v6280_v50 = vmax.f32 %v6145_v51, %v6218_v60 }
 0x5d9   : > { %v6149_v56 = vpop.f32.mrb[56].mxu0  ;;  %v6222_v16 = vpop.f32.mrb[64].mxu1 }
 0x5da   : > { %v6281_v53 = vmax.f32 %v6273_v21, %v6149_v56  ;;  %v6151_v58 = vpop.f32.mrb[57].mxu0  ;;  %v6224_v38 = vpop.f32.mrb[65].mxu1 }
 0x5db   : > { %v6282_v59 = vmax.f32 %v6274_v10, %v6151_v58  ;;  %v6153_v25 = vpop.f32.mrb[58].mxu0  ;;  %v6226_v46 = vpop.f32.mrb[66].mxu1  ;;  %v10922_v58 = vld [vmem:[#allocation10 + $0x40] ss:$16 sps:$4 sm:$0xff]  }
 0x5dc   : > { %v6289_v62 = vmax.f32 %v6281_v53, %v6222_v16  ;;  %v6283_v61 = vmax.f32 %v6275_v8, %v6153_v25  ;;  %v6155_v2 = vpop.f32.mrb[59].mxu0  ;;  %v6228_v6 = vpop.f32.mrb[67].mxu1  ;;  %v10924_v16 = vld [vmem:[#allocation10 + $0x44] ss:$16 sps:$4 sm:$0xff]   ;;  %v10927_v53 = vld [vmem:[#allocation10 + $0x4c] ss:$16 sps:$4 sm:$0xff]  }
 0x5dd   : > { %v6290_v34 = vmax.f32 %v6282_v59, %v6224_v38  ;;  %v6284_v11 = vmax.f32 %v6276_v32, %v6155_v2  ;;  %v10925_v38 = vld [vmem:[#allocation10 + $0x48] ss:$16 sps:$4 sm:$0xff]   ;;  %v10930_v59 = vld [vmem:[#allocation10 + $0x64] ss:$16 sps:$4 sm:$0xff]   ;;  %v10928_v25 = vld [vmem:[#allocation10 + $0x60] ss:$16 sps:$4 sm:$0xff]  }
 0x5de   : > { %v6308_v37 = vadd.f32 %v6301_v57, %v6289_v62  ;;  %v6291_v24 = vmax.f32 %v6283_v61, %v6226_v46  ;;  %v10931_v46 = vld [vmem:[#allocation10 + $0x68] ss:$16 sps:$4 sm:$0xff]   ;;  %v10936_v62 = vld [vmem:[#allocation10 + $0x84] ss:$16 sps:$4 sm:$0xff]   ;;  %v10939_v61 = vld [vmem:[#allocation10 + $0x8c] ss:$16 sps:$4 sm:$0xff]  }
 0x5df   : > { %v6309_v13 = vadd.f32 %v6305_v44, %v6290_v34  ;;  %v6292_v12 = vmax.f32 %v6284_v11, %v6228_v6  ;;  %v10934_v2 = vld [vmem:[#allocation10 + $0x80] ss:$16 sps:$4 sm:$0xff]   ;;  %v10937_v6 = vld [vmem:[#allocation10 + $0x88] ss:$16 sps:$4 sm:$0xff]   ;;  %v10942_v34 = vld [vmem:[#allocation10 + $0xa4] ss:$16 sps:$4 sm:$0xff]  }
 0x5e0   : > { %v6310_v63 = vadd.f32 %v6301_v57, %v6291_v24  ;;  %v6316_v41 = vmax.f32 %v6308_v37, 0.0  ;;  %v10945_v11 = vld [vmem:[#allocation10 + $0xac] ss:$16 sps:$4 sm:$0xff]   ;;  %v10940_v37 = vld [vmem:[#allocation10 + $0xa0] ss:$16 sps:$4 sm:$0xff]  }
 0x5e1   : > { %v6311_v3 = vadd.f32 %v6305_v44, %v6292_v12  ;;  %v6159_v22 = vpop.f32.mrb[60].mxu0  ;;  %v6232_v0 = vpop.f32.mrb[68].mxu1  ;;  %v6317_v5 = vmax.f32 %v6309_v13, 0.0  ;;  %v10943_v24 = vld [vmem:[#allocation10 + $0xa8] ss:$16 sps:$4 sm:$0xff]  }
 0x5e2   : > { %v6318_v15 = vmax.f32 %v6310_v63, 0.0  ;;  %v6285_v29 = vmax.f32 %v6277_v31, %v6159_v22  ;;  %v6161_v48 = vpop.f32.mrb[61].mxu0  ;;  %v6234_v26 = vpop.f32.mrb[69].mxu1  ;;  %v10948_v13 = vld [vmem:[#allocation10 + $0xc4] ss:$16 sps:$4 sm:$0xff]  }
 0x5e3   : > { %v6319_v18 = vmax.f32 %v6311_v3, 0.0  ;;  %v6286_v33 = vmax.f32 %v6278_v30, %v6161_v48  ;;  %v6163_v14 = vpop.f32.mrb[62].mxu0  ;;  %v6236_v45 = vpop.f32.mrb[70].mxu1  ;;  %v10918_v30 = vld [vmem:[#allocation10 + $0x24] ss:$16 sps:$4 sm:$0xff]  }
 0x5e4   : > { %v12808_v4 = vpack.c.bf16 %v6318_v15, %v6316_v41  ;;  %v6293_v1 = vmax.f32 %v6285_v29, %v6232_v0  ;;  %v6287_v19 = vmax.f32 %v6279_v35, %v6163_v14  ;;  %v6165_v21 = vpop.f32.mrb[63].mxu0  ;;  %v6238_v7 = vpop.f32.mrb[71].mxu1  ;;  %v10951_v12 = vld [vmem:[#allocation10 + $0xcc] ss:$16 sps:$4 sm:$0xff]   ;;  %v10946_v63 = vld [vmem:[#allocation10 + $0xc0] ss:$16 sps:$4 sm:$0xff]  }
 0x5e5   : > { %v6325_v54 = vpack.c.bf16 %v6319_v18, %v6317_v5  ;;  %v6294_v10 = vmax.f32 %v6286_v33, %v6234_v26  ;;  %v6288_v20 = vmax.f32 %v6280_v50, %v6165_v21  ;;  %v10916_v50 = vld [vmem:[#allocation10 + $0x20] ss:$16 sps:$4 sm:$0xff]   ;;  %v10949_v3 = vld [vmem:[#allocation10 + $0xc8] ss:$16 sps:$4 sm:$0xff]   ;;  %v10954_v22 = vld [vmem:[#allocation10 + $0xe4] ss:$16 sps:$4 sm:$0xff]  }
 0x5e6   : > { %v6312_v17 = vadd.f32 %v6301_v57, %v6293_v1  ;;  %v6295_v8 = vmax.f32 %v6287_v19, %v6236_v45  ;;  %v6530_v31 = vrot.slane %v12808_v4, 4  ;;  %v10957_v0 = vld [vmem:[#allocation10 + $0xec] ss:$16 sps:$4 sm:$0xff]   ;;  %v10952_v41 = vld [vmem:[#allocation10 + $0xe0] ss:$16 sps:$4 sm:$0xff]  }
 0x5e7   : > { %v6313_v23 = vadd.f32 %v6305_v44, %v6294_v10  ;;  %v6296_v9 = vmax.f32 %v6288_v20, %v6238_v7  ;;  %v6531_v32 = vrot.slane %v6325_v54, 4  ;;  %v10955_v15 = vld [vmem:[#allocation10 + $0xe8] ss:$16 sps:$4 sm:$0xff]   ;;  %v10960_v29 = vld [vmem:[#allocation10 + $0x104] ss:$16 sps:$4 sm:$0xff]  }
 0x5e8   : > { %v6314_v55 = vadd.f32 %v6301_v57, %v6295_v8  ;;  %v6320_v43 = vmax.f32 %v6312_v17, 0.0  ;;  %v10963_v48 = vld [vmem:[#allocation10 + $0x10c] ss:$16 sps:$4 sm:$0xff]   ;;  %v10958_v26 = vld [vmem:[#allocation10 + $0x100] ss:$16 sps:$4 sm:$0xff]  }
 0x5e9   : > { %v6315_v42 = vadd.f32 %v6305_v44, %v6296_v9  ;;  %9360 = vmatprep.mubr.msk.bf16.mxu0 %vm6783_vm4, %v6531_v32  ;;  %9362 = vmatprep.mubr.msk.bf16.mxu1 %vm6783_vm4, %v6531_v32  ;;  %v6321_v51 = vmax.f32 %v6313_v23, 0.0  ;;  %v10933_v44 = vld [vmem:[#allocation10 + $0x6c] ss:$16 sps:$4 sm:$0xff]   ;;  %v10961_v5 = vld [vmem:[#allocation10 + $0x108] ss:$16 sps:$4 sm:$0xff]   ;;  %v6376_v20 = vld [vmem:[#allocation10 + $0x180] sm:$0xff] }
 0x5ea   : > { %v6322_v35 = vmax.f32 %v6314_v55, 0.0  ;;  %6833 = vmatmul.mubr.bf16.vlgmr.msra.gmra.mrb[64].mxu0 %v6530_v31  ;;  %6874 = vmatmul.mubr.bf16.vlgmr.msra.gmra.mrb[72].mxu1 %v6530_v31  ;;  %v10966_v18 = vld [vmem:[#allocation10 + $0x124] ss:$16 sps:$4 sm:$0xff]   ;;  %v10969_v33 = vld [vmem:[#allocation10 + $0x12c] ss:$16 sps:$4 sm:$0xff]   ;;  %v9412_v9 = vcombine.high %v6376_v20, %v6376_v20 }
 0x5eb   : > { %v6323_v60 = vmax.f32 %v6315_v42, 0.0  ;;  %7148 = vmatpush1.bf16.msra.mxu0 %v10910_v27  ;;  %7189 = vmatpush1.bf16.msra.mxu1 %v10913_v28  ;;  %v10964_v14 = vld [vmem:[#allocation10 + $0x120] ss:$16 sps:$4 sm:$0xff]   ;;  %v10967_v45 = vld [vmem:[#allocation10 + $0x128] ss:$16 sps:$4 sm:$0xff]   ;;  %v9411_v27 = vcombine.low %v6376_v20, %v6376_v20 }
 0x5ec   : > { %v12813_v56 = vpack.c.bf16 %v6322_v35, %v6320_v43  ;;  %9416 = vmatprep.mubr.msk.bf16.mxu0 %vm6783_vm4, %v6325_v54  ;;  %9418 = vmatprep.mubr.msk.bf16.mxu1 %vm6783_vm4, %v6325_v54  ;;  %v10972_v1 = vld [vmem:[#allocation10 + $0x144] ss:$16 sps:$4 sm:$0xff]   ;;  %v10975_v19 = vld [vmem:[#allocation10 + $0x14c] ss:$16 sps:$4 sm:$0xff]   ;;  %v10970_v21 = vld [vmem:[#allocation10 + $0x140] ss:$16 sps:$4 sm:$0xff]  }
 0x5ed   : > { %v12817_v57 = vpack.c.bf16 %v6323_v60, %v6321_v51  ;;  %7149 = vmatprep.subr.bf16.mxu0 %v10918_v30  ;;  %7190 = vmatprep.subr.bf16.mxu1 %v10921_v39  ;;  %v10973_v7 = vld [vmem:[#allocation10 + $0x148] ss:$16 sps:$4 sm:$0xff]   ;;  %v10978_v54 = vld [vmem:[#allocation10 + $0x164] ss:$16 sps:$4 sm:$0xff]   ;;  %v10981_v10 = vld [vmem:[#allocation10 + $0x16c] ss:$16 sps:$4 sm:$0xff]  }
 0x5ee   : > { %v6377_v17 = vld [vmem:[#allocation10 + $0x188] sm:$0xff]  ;;  %v10976_v8 = vld [vmem:[#allocation10 + $0x160] ss:$16 sps:$4 sm:$0xff]   ;;  %v7136_v31 = vsel %vm3885_vm3, %v9411_v27, 0  ;;  %v10988_v42 = vld [vmem:[#allocation10 + $0x324] ss:$16 sps:$4 sm:$0xff]  }
 0x5ef   : > { %7150 = vmatpush1.bf16.msra.mxu0 %v10916_v50  ;;  %7191 = vmatpush1.bf16.msra.mxu1 %v10919_v36  ;;  %v10979_v23 = vld [vmem:[#allocation10 + $0x168] ss:$16 sps:$4 sm:$0xff]   ;;  %v9414_v32 = vcombine.high %v6377_v17, %v6377_v17  ;;  %v9413_v28 = vcombine.low %v6377_v17, %v6377_v17  ;;  %v10991_v30 = vld [vmem:[#allocation10 + $0x32c] ss:$16 sps:$4 sm:$0xff]   ;;  %v10986_v39 = vld [vmem:[#allocation10 + $0x320] ss:$16 sps:$4 sm:$0xff]  }
 0x5f0   : > { %7151 = vmatprep.subr.bf16.mxu0 %v10924_v16  ;;  %7192 = vmatprep.subr.bf16.mxu1 %v10927_v53  ;;  %v10989_v43 = vld [vmem:[#allocation10 + $0x328] ss:$16 sps:$4 sm:$0xff]   ;;  %v10994_v35 = vld [vmem:[#allocation10 + $0x344] ss:$16 sps:$4 sm:$0xff]   ;;  %v10997_v51 = vld [vmem:[#allocation10 + $0x34c] ss:$16 sps:$4 sm:$0xff]  }
 0x5f1   : > { %v7142_v55 = vsel %vm3885_vm3, %v9413_v28, 0  ;;  %v10992_v60 = vld [vmem:[#allocation10 + $0x340] ss:$16 sps:$4 sm:$0xff]   ;;  %v10995_v50 = vld [vmem:[#allocation10 + $0x348] ss:$16 sps:$4 sm:$0xff]  }
 0x5f2   : > { %v11000_v36 = vld [vmem:[#allocation10 + $0x364] ss:$16 sps:$4 sm:$0xff]   ;;  %v11003_v16 = vld [vmem:[#allocation10 + $0x36c] ss:$16 sps:$4 sm:$0xff]   ;;  %v10998_v53 = vld [vmem:[#allocation10 + $0x360] ss:$16 sps:$4 sm:$0xff]  }
 0x5f3   : > { %7152 = vmatpush1.bf16.msra.mxu0 %v10922_v58  ;;  %7193 = vmatpush1.bf16.msra.mxu1 %v10925_v38  ;;  %v11001_v58 = vld [vmem:[#allocation10 + $0x368] ss:$16 sps:$4 sm:$0xff]   ;;  %v11009_v38 = vld [vmem:[#allocation10 + $0x38c] ss:$16 sps:$4 sm:$0xff]   ;;  %v11052_v20 = vld [vmem:[#allocation10 + $0x480] ss:$16 sps:$4 sm:$0xff]  }
 0x5f4   : > { %7153 = vmatprep.subr.bf16.mxu0 %v10930_v59  ;;  %7194 = vmatprep.subr.bf16.mxu1 %v10933_v44  ;;  %v11004_v59 = vld [vmem:[#allocation10 + $0x380] ss:$16 sps:$4 sm:$0xff]   ;;  %v11007_v44 = vld [vmem:[#allocation10 + $0x388] ss:$16 sps:$4 sm:$0xff]   ;;  %v11064_v28 = vld [vmem:[#allocation10 + $0x4b4] ss:$16 sps:$4 sm:$0xff]  }
 0x5f5   : > { %v11055_v17 = vld [vmem:[#allocation10 + $0x488] ss:$16 sps:$4 sm:$0xff]  }
 0x5f7   : > { %7154 = vmatpush1.bf16.msra.mxu0 %v10928_v25  ;;  %7195 = vmatpush1.bf16.msra.mxu1 %v10931_v46  ;;  %v11012_v25 = vld [vmem:[#allocation10 + $0x3a4] ss:$16 sps:$4 sm:$0xff]   ;;  %v11015_v46 = vld [vmem:[#allocation10 + $0x3ac] ss:$16 sps:$4 sm:$0xff]  }
 0x5f8   : > { %7155 = vmatprep.subr.bf16.mxu0 %v10936_v62  ;;  %7196 = vmatprep.subr.bf16.mxu1 %v10939_v61  ;;  %v11010_v62 = vld [vmem:[#allocation10 + $0x3a0] ss:$16 sps:$4 sm:$0xff]   ;;  %v11013_v61 = vld [vmem:[#allocation10 + $0x3a8] ss:$16 sps:$4 sm:$0xff]  }
 0x5fb   : > { %7156 = vmatpush1.bf16.msra.mxu0 %v10934_v2  ;;  %7197 = vmatpush1.bf16.msra.mxu1 %v10937_v6  ;;  %v11018_v2 = vld [vmem:[#allocation10 + $0x3c4] ss:$16 sps:$4 sm:$0xff]   ;;  %v11021_v6 = vld [vmem:[#allocation10 + $0x3cc] ss:$16 sps:$4 sm:$0xff]  }
 0x5fc   : > { %7157 = vmatprep.subr.bf16.mxu0 %v10942_v34  ;;  %7198 = vmatprep.subr.bf16.mxu1 %v10945_v11  ;;  %v11016_v34 = vld [vmem:[#allocation10 + $0x3c0] ss:$16 sps:$4 sm:$0xff]   ;;  %v11019_v11 = vld [vmem:[#allocation10 + $0x3c8] ss:$16 sps:$4 sm:$0xff]  }
 0x5ff   : > { %7158 = vmatpush1.bf16.msra.mxu0 %v10940_v37  ;;  %7199 = vmatpush1.bf16.msra.mxu1 %v10943_v24  ;;  %v11024_v37 = vld [vmem:[#allocation10 + $0x3e4] ss:$16 sps:$4 sm:$0xff]   ;;  %v11027_v24 = vld [vmem:[#allocation10 + $0x3ec] ss:$16 sps:$4 sm:$0xff]  }
 0x600   : > { %7159 = vmatprep.subr.bf16.mxu0 %v10948_v13  ;;  %7200 = vmatprep.subr.bf16.mxu1 %v10951_v12  ;;  %v11022_v13 = vld [vmem:[#allocation10 + $0x3e0] ss:$16 sps:$4 sm:$0xff]   ;;  %v11025_v12 = vld [vmem:[#allocation10 + $0x3e8] ss:$16 sps:$4 sm:$0xff]  }
 0x603   : > { %7160 = vmatpush1.bf16.msra.mxu0 %v10946_v63  ;;  %7201 = vmatpush1.bf16.msra.mxu1 %v10949_v3  ;;  %v11030_v63 = vld [vmem:[#allocation10 + $0x404] ss:$16 sps:$4 sm:$0xff]   ;;  %v11033_v3 = vld [vmem:[#allocation10 + $0x40c] ss:$16 sps:$4 sm:$0xff]  }
 0x604   : > { %7161 = vmatprep.subr.bf16.mxu0 %v10954_v22  ;;  %7202 = vmatprep.subr.bf16.mxu1 %v10957_v0  ;;  %v11028_v22 = vld [vmem:[#allocation10 + $0x400] ss:$16 sps:$4 sm:$0xff]   ;;  %v11031_v0 = vld [vmem:[#allocation10 + $0x408] ss:$16 sps:$4 sm:$0xff]  }
 0x607   : > { %7162 = vmatpush1.bf16.msra.mxu0 %v10952_v41  ;;  %7203 = vmatpush1.bf16.msra.mxu1 %v10955_v15  ;;  %v11036_v41 = vld [vmem:[#allocation10 + $0x424] ss:$16 sps:$4 sm:$0xff]   ;;  %v11039_v15 = vld [vmem:[#allocation10 + $0x42c] ss:$16 sps:$4 sm:$0xff]  }
 0x608   : > { %7163 = vmatprep.subr.bf16.mxu0 %v10960_v29  ;;  %7204 = vmatprep.subr.bf16.mxu1 %v10963_v48  ;;  %v11034_v29 = vld [vmem:[#allocation10 + $0x420] ss:$16 sps:$4 sm:$0xff]   ;;  %v11037_v48 = vld [vmem:[#allocation10 + $0x428] ss:$16 sps:$4 sm:$0xff]  }
 0x60b   : > { %7164 = vmatpush1.bf16.msra.mxu0 %v10958_v26  ;;  %7205 = vmatpush1.bf16.msra.mxu1 %v10961_v5  ;;  %v11042_v26 = vld [vmem:[#allocation10 + $0x444] ss:$16 sps:$4 sm:$0xff]   ;;  %v11045_v5 = vld [vmem:[#allocation10 + $0x44c] ss:$16 sps:$4 sm:$0xff]  }
 0x60c   : > { %7165 = vmatprep.subr.bf16.mxu0 %v10966_v18  ;;  %7206 = vmatprep.subr.bf16.mxu1 %v10969_v33  ;;  %v11040_v18 = vld [vmem:[#allocation10 + $0x440] ss:$16 sps:$4 sm:$0xff]   ;;  %v11043_v33 = vld [vmem:[#allocation10 + $0x448] ss:$16 sps:$4 sm:$0xff]  }
 0x60f   : > { %7166 = vmatpush1.bf16.msra.mxu0 %v10964_v14  ;;  %7207 = vmatpush1.bf16.msra.mxu1 %v10967_v45  ;;  %v11048_v14 = vld [vmem:[#allocation10 + $0x464] ss:$16 sps:$4 sm:$0xff]   ;;  %v11051_v45 = vld [vmem:[#allocation10 + $0x46c] ss:$16 sps:$4 sm:$0xff]  }
 0x610   : > { %7167 = vmatprep.subr.bf16.mxu0 %v10972_v1  ;;  %7208 = vmatprep.subr.bf16.mxu1 %v10975_v19  ;;  %v11046_v1 = vld [vmem:[#allocation10 + $0x460] ss:$16 sps:$4 sm:$0xff]   ;;  %v11049_v19 = vld [vmem:[#allocation10 + $0x468] ss:$16 sps:$4 sm:$0xff]  }
 0x613   : > { %7168 = vmatpush1.bf16.msra.mxu0 %v10970_v21  ;;  %7209 = vmatpush1.bf16.msra.mxu1 %v10973_v7  ;;  %v11054_v21 = vld [vmem:[#allocation10 + $0x484] ss:$16 sps:$4 sm:$0xff]   ;;  %v11057_v7 = vld [vmem:[#allocation10 + $0x48c] ss:$16 sps:$4 sm:$0xff]  }
 0x614   : > { %7169 = vmatprep.subr.bf16.mxu0 %v10978_v54  ;;  %7210 = vmatprep.subr.bf16.mxu1 %v10981_v10  ;;  %v6476_v54 = vld [vmem:[#allocation10 + $0x4a0] sm:$0xff]  ;;  %v6477_v10 = vld [vmem:[#allocation10 + $0x4a8] sm:$0xff] }
 0x617   : > { %7170 = vmatpush1.bf16.msra.mxu0 %v10976_v8  ;;  %7211 = vmatpush1.bf16.msra.mxu1 %v10979_v23  ;;  %v9468_v8 = vcombine.high %v6476_v54, %v6476_v54  ;;  %v9467_v23 = vcombine.low %v6476_v54, %v6476_v54  ;;  %v11128_v54 = vld [vmem:[#allocation10 + $0x610] ss:$16 sps:$4 sm:$0xff]  }
 0x618   : > { %9415 = vmatprep.subr.msk.bf16.mxu0 %vm3885_vm3, %v9412_v9  ;;  %9417 = vmatprep.subr.msk.bf16.mxu1 %vm3885_vm3, %v9414_v32  ;;  %v9470_v9 = vcombine.high %v6477_v10, %v6477_v10  ;;  %v9469_v32 = vcombine.low %v6477_v10, %v6477_v10  ;;  %v11131_v10 = vld [vmem:[#allocation10 + $0x618] ss:$16 sps:$4 sm:$0xff]  }
 0x619   : > { %v7483_v27 = vsel %vm3885_vm3, %v9467_v23, 0 }
 0x61b   : > { %7172 = vmatpush1.bf16.msra.mxu0 %v7136_v31  ;;  %7213 = vmatpush1.bf16.msra.mxu1 %v7142_v55  ;;  %v7489_v31 = vsel %vm3885_vm3, %v9469_v32, 0  ;;  %v11067_v55 = vld [vmem:[#allocation10 + $0x4bc] ss:$16 sps:$4 sm:$0xff]  }
 0x61c   : > { %7494 = vmatprep.subr.bf16.mxu0 %v10988_v42  ;;  %7535 = vmatprep.subr.bf16.mxu1 %v10991_v30  ;;  %v11062_v42 = vld [vmem:[#allocation10 + $0x4b0] ss:$16 sps:$4 sm:$0xff]   ;;  %v11065_v30 = vld [vmem:[#allocation10 + $0x4b8] ss:$16 sps:$4 sm:$0xff]  }
 0x61e   : > { %7180 = vmatmul.mubr.bf16.vlgmr.msra.gmra.mrb[68].mxu0 %v12808_v4  ;;  %7221 = vmatmul.mubr.bf16.vlgmr.msra.gmra.mrb[76].mxu1 %v12808_v4  ;;  %v11006_v4 = vld [vmem:[#allocation10 + $0x384] ss:$16 sps:$4 sm:$0xff]  }
 0x61f   : > { %7495 = vmatpush1.bf16.msra.mxu0 %v10986_v39  ;;  %9472 = vmatprep.mubr.msk.bf16.mxu0 %vm6783_vm4, %v12817_v57  ;;  %v11070_v39 = vld [vmem:[#allocation10 + $0x4d4] ss:$16 sps:$4 sm:$0xff]  }
 0x620   : > { %7536 = vmatpush1.bf16.msra.mxu1 %v10989_v43  ;;  %9474 = vmatprep.mubr.msk.bf16.mxu1 %vm6783_vm4, %v12817_v57  ;;  %v7583_v43 = vrot.slane %v12817_v57, 4  ;;  %v11077_v57 = vld [vmem:[#allocation10 + $0x4f8] ss:$16 sps:$4 sm:$0xff]  }
 0x621   : > { %7496 = vmatprep.subr.bf16.mxu0 %v10994_v35  ;;  %7537 = vmatprep.subr.bf16.mxu1 %v10997_v51  ;;  %v11073_v35 = vld [vmem:[#allocation10 + $0x4dc] ss:$16 sps:$4 sm:$0xff]   ;;  %v11068_v51 = vld [vmem:[#allocation10 + $0x4d0] ss:$16 sps:$4 sm:$0xff]  }
 0x623   : > { %7497 = vmatpush1.bf16.msra.mxu0 %v10992_v60  ;;  %v11071_v60 = vld [vmem:[#allocation10 + $0x4d8] ss:$16 sps:$4 sm:$0xff]  }
 0x624   : > { %7538 = vmatpush1.bf16.msra.mxu1 %v10995_v50  ;;  %7498 = vmatprep.subr.bf16.mxu0 %v11000_v36  ;;  %v11076_v50 = vld [vmem:[#allocation10 + $0x4f4] ss:$16 sps:$4 sm:$0xff]   ;;  %v11079_v36 = vld [vmem:[#allocation10 + $0x4fc] ss:$16 sps:$4 sm:$0xff]  }
 0x625   : > { %7539 = vmatprep.subr.bf16.mxu1 %v11003_v16  ;;  %v11074_v16 = vld [vmem:[#allocation10 + $0x4f0] ss:$16 sps:$4 sm:$0xff]  }
 0x627   : > { %7499 = vmatpush1.bf16.msra.mxu0 %v10998_v53  ;;  %v11082_v53 = vld [vmem:[#allocation10 + $0x514] ss:$16 sps:$4 sm:$0xff]  }
 0x628   : > { %7540 = vmatpush1.bf16.msra.mxu1 %v11001_v58  ;;  %7500 = vmatprep.subr.bf16.mxu0 %v11006_v4  ;;  %v11085_v58 = vld [vmem:[#allocation10 + $0x51c] ss:$16 sps:$4 sm:$0xff]   ;;  %v11080_v4 = vld [vmem:[#allocation10 + $0x510] ss:$16 sps:$4 sm:$0xff]  }
 0x629   : > { %7541 = vmatprep.subr.bf16.mxu1 %v11009_v38  ;;  %v11083_v38 = vld [vmem:[#allocation10 + $0x518] ss:$16 sps:$4 sm:$0xff]  }
 0x62b   : > { %7501 = vmatpush1.bf16.msra.mxu0 %v11004_v59  ;;  %v11088_v59 = vld [vmem:[#allocation10 + $0x534] ss:$16 sps:$4 sm:$0xff]  }
 0x62c   : > { %7542 = vmatpush1.bf16.msra.mxu1 %v11007_v44  ;;  %7502 = vmatprep.subr.bf16.mxu0 %v11012_v25  ;;  %v11091_v44 = vld [vmem:[#allocation10 + $0x53c] ss:$16 sps:$4 sm:$0xff]   ;;  %v11086_v25 = vld [vmem:[#allocation10 + $0x530] ss:$16 sps:$4 sm:$0xff]  }
 0x62d   : > { %7543 = vmatprep.subr.bf16.mxu1 %v11015_v46  ;;  %v11089_v46 = vld [vmem:[#allocation10 + $0x538] ss:$16 sps:$4 sm:$0xff]  }
 0x62f   : > { %7503 = vmatpush1.bf16.msra.mxu0 %v11010_v62  ;;  %v11094_v62 = vld [vmem:[#allocation10 + $0x554] ss:$16 sps:$4 sm:$0xff]  }
 0x630   : > { %7544 = vmatpush1.bf16.msra.mxu1 %v11013_v61  ;;  %7504 = vmatprep.subr.bf16.mxu0 %v11018_v2  ;;  %v11097_v61 = vld [vmem:[#allocation10 + $0x55c] ss:$16 sps:$4 sm:$0xff]   ;;  %v11092_v2 = vld [vmem:[#allocation10 + $0x550] ss:$16 sps:$4 sm:$0xff]  }
 0x631   : > { %7545 = vmatprep.subr.bf16.mxu1 %v11021_v6  ;;  %v11095_v6 = vld [vmem:[#allocation10 + $0x558] ss:$16 sps:$4 sm:$0xff]  }
 0x633   : > { %7505 = vmatpush1.bf16.msra.mxu0 %v11016_v34  ;;  %v11100_v34 = vld [vmem:[#allocation10 + $0x574] ss:$16 sps:$4 sm:$0xff]  }
 0x634   : > { %7546 = vmatpush1.bf16.msra.mxu1 %v11019_v11  ;;  %7506 = vmatprep.subr.bf16.mxu0 %v11024_v37  ;;  %v11103_v11 = vld [vmem:[#allocation10 + $0x57c] ss:$16 sps:$4 sm:$0xff]   ;;  %v11098_v37 = vld [vmem:[#allocation10 + $0x570] ss:$16 sps:$4 sm:$0xff]  }
 0x635   : > { %7547 = vmatprep.subr.bf16.mxu1 %v11027_v24  ;;  %v11101_v24 = vld [vmem:[#allocation10 + $0x578] ss:$16 sps:$4 sm:$0xff]  }
 0x637   : > { %7507 = vmatpush1.bf16.msra.mxu0 %v11022_v13  ;;  %v11106_v13 = vld [vmem:[#allocation10 + $0x594] ss:$16 sps:$4 sm:$0xff]  }
 0x638   : > { %7548 = vmatpush1.bf16.msra.mxu1 %v11025_v12  ;;  %7508 = vmatprep.subr.bf16.mxu0 %v11030_v63  ;;  %v11109_v12 = vld [vmem:[#allocation10 + $0x59c] ss:$16 sps:$4 sm:$0xff]   ;;  %v11104_v63 = vld [vmem:[#allocation10 + $0x590] ss:$16 sps:$4 sm:$0xff]  }
 0x639   : > { %7549 = vmatprep.subr.bf16.mxu1 %v11033_v3  ;;  %v11107_v3 = vld [vmem:[#allocation10 + $0x598] ss:$16 sps:$4 sm:$0xff]  }
 0x63b   : > { %7509 = vmatpush1.bf16.msra.mxu0 %v11028_v22  ;;  %v11112_v22 = vld [vmem:[#allocation10 + $0x5b4] ss:$16 sps:$4 sm:$0xff]  }
 0x63c   : > { %7550 = vmatpush1.bf16.msra.mxu1 %v11031_v0  ;;  %7510 = vmatprep.subr.bf16.mxu0 %v11036_v41  ;;  %v11115_v0 = vld [vmem:[#allocation10 + $0x5bc] ss:$16 sps:$4 sm:$0xff]   ;;  %v11110_v41 = vld [vmem:[#allocation10 + $0x5b0] ss:$16 sps:$4 sm:$0xff]  }
 0x63d   : > { %7551 = vmatprep.subr.bf16.mxu1 %v11039_v15  ;;  %v11113_v15 = vld [vmem:[#allocation10 + $0x5b8] ss:$16 sps:$4 sm:$0xff]  }
 0x63f   : > { %7511 = vmatpush1.bf16.msra.mxu0 %v11034_v29  ;;  %v11118_v29 = vld [vmem:[#allocation10 + $0x5d4] ss:$16 sps:$4 sm:$0xff]  }
 0x640   : > { %7552 = vmatpush1.bf16.msra.mxu1 %v11037_v48  ;;  %7512 = vmatprep.subr.bf16.mxu0 %v11042_v26  ;;  %v11121_v48 = vld [vmem:[#allocation10 + $0x5dc] ss:$16 sps:$4 sm:$0xff]   ;;  %v11116_v26 = vld [vmem:[#allocation10 + $0x5d0] ss:$16 sps:$4 sm:$0xff]  }
 0x641   : > { %7553 = vmatprep.subr.bf16.mxu1 %v11045_v5  ;;  %v11119_v5 = vld [vmem:[#allocation10 + $0x5d8] ss:$16 sps:$4 sm:$0xff]  }
 0x643   : > { %7513 = vmatpush1.bf16.msra.mxu0 %v11040_v18  ;;  %v11124_v18 = vld [vmem:[#allocation10 + $0x5f4] ss:$16 sps:$4 sm:$0xff]  }
 0x644   : > { %7554 = vmatpush1.bf16.msra.mxu1 %v11043_v33  ;;  %7514 = vmatprep.subr.bf16.mxu0 %v11048_v14  ;;  %v11127_v33 = vld [vmem:[#allocation10 + $0x5fc] ss:$16 sps:$4 sm:$0xff]   ;;  %v11122_v14 = vld [vmem:[#allocation10 + $0x5f0] ss:$16 sps:$4 sm:$0xff]  }
 0x645   : > { %7555 = vmatprep.subr.bf16.mxu1 %v11051_v45  ;;  %v11125_v45 = vld [vmem:[#allocation10 + $0x5f8] ss:$16 sps:$4 sm:$0xff]  }
 0x647   : > { %7515 = vmatpush1.bf16.msra.mxu0 %v11046_v1  ;;  %v11130_v1 = vld [vmem:[#allocation10 + $0x614] ss:$16 sps:$4 sm:$0xff]  }
 0x648   : > { %7556 = vmatpush1.bf16.msra.mxu1 %v11049_v19  ;;  %7516 = vmatprep.subr.bf16.mxu0 %v11054_v21  ;;  %v11133_v19 = vld [vmem:[#allocation10 + $0x61c] ss:$16 sps:$4 sm:$0xff]   ;;  %v6526_v21 = vld [vmem:[#allocation10 + $0x630] sm:$0xff] }
 0x649   : > { %7557 = vmatprep.subr.bf16.mxu1 %v11057_v7  ;;  %v6527_v7 = vld [vmem:[#allocation10 + $0x638] sm:$0xff] }
 0x64a   : > { %v9525_v23 = vcombine.low %v6527_v7, %v6527_v7 }
 0x64b   : > { %7517 = vmatpush1.bf16.msra.mxu0 %v11052_v20  ;;  %v9524_v20 = vcombine.high %v6526_v21, %v6526_v21 }
 0x64c   : > { %7558 = vmatpush1.bf16.msra.mxu1 %v11055_v17  ;;  %9471 = vmatprep.subr.msk.bf16.mxu0 %vm3885_vm3, %v9468_v8  ;;  %v9523_v17 = vcombine.low %v6526_v21, %v6526_v21  ;;  %v9526_v8 = vcombine.high %v6527_v7, %v6527_v7  ;;  %v7845_v32 = vsel %vm3885_vm3, %v9525_v23, 0 }
 0x64d   : > { %9473 = vmatprep.subr.msk.bf16.mxu1 %vm3885_vm3, %v9470_v9 }
 0x64e   : > { %v7839_v9 = vsel %vm3885_vm3, %v9523_v17, 0 }
 0x64f   : > { %7519 = vmatpush1.bf16.msra.mxu0 %v7483_v27  ;;  %v7582_v27 = vrot.slane %v12813_v56, 4 }
 0x650   : > { %7560 = vmatpush1.bf16.msra.mxu1 %v7489_v31  ;;  %7850 = vmatprep.subr.bf16.mxu0 %v11064_v28  ;;  %v11138_v28 = vld [vmem:[#allocation13 + $0x40] sm:$0xff]  }
 0x651   : > { %7891 = vmatprep.subr.bf16.mxu1 %v11067_v55  ;;  %v11139_v31 = vld [vmem:[#allocation13 + $0xc0] sm:$0xff]  }
 0x652   : > { %7527 = vmatmul.mubr.bf16.vlgmr.msra.gmra.mrb[72].mxu0 %v12813_v56  ;;  %v11140_v55 = vld [vmem:[#allocation13] sm:$0xff]  }
 0x653   : > { %7568 = vmatmul.mubr.bf16.vlgmr.msra.gmra.mrb[80].mxu1 %v12813_v56  ;;  %7851 = vmatpush1.bf16.msra.mxu0 %v11062_v42  ;;  %v11141_v42 = vld [vmem:[#allocation13 + $0x80] sm:$0xff]   ;;  %v11148_v56 = vld [vmem:[#allocation13 + $0x10] sm:$0xff]  }
 0x654   : > { %9528 = vmatprep.mubr.msk.bf16.mxu0 %vm6783_vm4, %v7583_v43  ;;  %7892 = vmatpush1.bf16.msra.mxu1 %v11065_v30  ;;  %v11142_v30 = vld [vmem:[#allocation13 + $0x48] sm:$0xff]  }
 0x655   : > { %9530 = vmatprep.mubr.msk.bf16.mxu1 %vm6783_vm4, %v7583_v43  ;;  %7852 = vmatprep.subr.bf16.mxu0 %v11070_v39  ;;  %v11143_v39 = vld [vmem:[#allocation13 + $0xc8] sm:$0xff]  }
 0x656   : > { %7893 = vmatprep.subr.bf16.mxu1 %v11073_v35  ;;  %v11144_v43 = vld [vmem:[#allocation13 + $0x8] sm:$0xff]  }
 0x657   : > { %7853 = vmatpush1.bf16.msra.mxu0 %v11068_v51  ;;  %v11145_v35 = vld [vmem:[#allocation13 + $0x88] sm:$0xff]   ;;  %v11146_v51 = vld [vmem:[#allocation13 + $0x50] sm:$0xff]  }
 0x658   : > { %7894 = vmatpush1.bf16.msra.mxu1 %v11071_v60  ;;  %7854 = vmatprep.subr.bf16.mxu0 %v11076_v50  ;;  %v11147_v60 = vld [vmem:[#allocation13 + $0xd0] sm:$0xff]  }
 0x659   : > { %7895 = vmatprep.subr.bf16.mxu1 %v11079_v36  ;;  %v11149_v50 = vld [vmem:[#allocation13 + $0x90] sm:$0xff]   ;;  %v11150_v36 = vld [vmem:[#allocation13 + $0x58] sm:$0xff]  }
 0x65b   : > { %7855 = vmatpush1.bf16.msra.mxu0 %v11074_v16  ;;  %v11151_v16 = vld [vmem:[#allocation13 + $0xd8] sm:$0xff]  }
 0x65c   : > { %7896 = vmatpush1.bf16.msra.mxu1 %v11077_v57  ;;  %7856 = vmatprep.subr.bf16.mxu0 %v11082_v53  ;;  %v11152_v57 = vld [vmem:[#allocation13 + $0x18] sm:$0xff]  }
 0x65d   : > { %7897 = vmatprep.subr.bf16.mxu1 %v11085_v58  ;;  %v11153_v53 = vld [vmem:[#allocation13 + $0x98] sm:$0xff]   ;;  %v11154_v58 = vld [vmem:[#allocation13 + $0x60] sm:$0xff]  }
 0x65f   : > { %7857 = vmatpush1.bf16.msra.mxu0 %v11080_v4  ;;  %v11155_v4 = vld [vmem:[#allocation13 + $0xe0] sm:$0xff]  }
 0x660   : > { %7898 = vmatpush1.bf16.msra.mxu1 %v11083_v38  ;;  %7858 = vmatprep.subr.bf16.mxu0 %v11088_v59  ;;  %v11156_v38 = vld [vmem:[#allocation13 + $0x20] sm:$0xff]  }
 0x661   : > { %7899 = vmatprep.subr.bf16.mxu1 %v11091_v44  ;;  %v11157_v59 = vld [vmem:[#allocation13 + $0xa0] sm:$0xff]   ;;  %v11158_v44 = vld [vmem:[#allocation13 + $0x68] sm:$0xff]  }
 0x663   : > { %7859 = vmatpush1.bf16.msra.mxu0 %v11086_v25  ;;  %v11159_v25 = vld [vmem:[#allocation13 + $0xe8] sm:$0xff]  }
 0x664   : > { %7900 = vmatpush1.bf16.msra.mxu1 %v11089_v46  ;;  %7860 = vmatprep.subr.bf16.mxu0 %v11094_v62  ;;  %v11160_v46 = vld [vmem:[#allocation13 + $0x28] sm:$0xff]  }
 0x665   : > { %7901 = vmatprep.subr.bf16.mxu1 %v11097_v61  ;;  %v11161_v62 = vld [vmem:[#allocation13 + $0xa8] sm:$0xff]  }
 0x667   : > { %7861 = vmatpush1.bf16.msra.mxu0 %v11092_v2 }
 0x668   : > { %7902 = vmatpush1.bf16.msra.mxu1 %v11095_v6  ;;  %7862 = vmatprep.subr.bf16.mxu0 %v11100_v34 }
 0x669   : > { %7903 = vmatprep.subr.bf16.mxu1 %v11103_v11 }
 0x66b   : > { %7863 = vmatpush1.bf16.msra.mxu0 %v11098_v37 }
 0x66c   : > { %7904 = vmatpush1.bf16.msra.mxu1 %v11101_v24  ;;  %7864 = vmatprep.subr.bf16.mxu0 %v11106_v13 }
 0x66d   : > { %7905 = vmatprep.subr.bf16.mxu1 %v11109_v12  ;;  %v11162_v12 = vld [vmem:[#allocation13 + $0x70] sm:$0xff]  }
 0x66f   : > { %7865 = vmatpush1.bf16.msra.mxu0 %v11104_v63  ;;  %v11163_v63 = vld [vmem:[#allocation13 + $0xf0] sm:$0xff]  }
 0x670   : > { %7906 = vmatpush1.bf16.msra.mxu1 %v11107_v3  ;;  %7866 = vmatprep.subr.bf16.mxu0 %v11112_v22  ;;  %v11164_v3 = vld [vmem:[#allocation13 + $0x30] sm:$0xff]  }
 0x671   : > { %7907 = vmatprep.subr.bf16.mxu1 %v11115_v0  ;;  %v11165_v22 = vld [vmem:[#allocation13 + $0xb0] sm:$0xff]   ;;  %v11166_v0 = vld [vmem:[#allocation13 + $0x78] sm:$0xff]  }
 0x673   : > { %7867 = vmatpush1.bf16.msra.mxu0 %v11110_v41  ;;  %v11167_v41 = vld [vmem:[#allocation13 + $0xf8] sm:$0xff]  }
 0x674   : > { %7908 = vmatpush1.bf16.msra.mxu1 %v11113_v15  ;;  %7868 = vmatprep.subr.bf16.mxu0 %v11118_v29  ;;  %v11168_v15 = vld [vmem:[#allocation13 + $0x38] sm:$0xff]  }
 0x675   : > { %7909 = vmatprep.subr.bf16.mxu1 %v11121_v48  ;;  %v11169_v29 = vld [vmem:[#allocation13 + $0xb8] sm:$0xff]   ;;  %v11563_v48 = vmov 0.0  }
 0x677   : > { %7869 = vmatpush1.bf16.msra.mxu0 %v11116_v26 }
 0x678   : > { %7910 = vmatpush1.bf16.msra.mxu1 %v11119_v5  ;;  %7870 = vmatprep.subr.bf16.mxu0 %v11124_v18 }
 0x679   : > { %7911 = vmatprep.subr.bf16.mxu1 %v11127_v33 }
 0x67b   : > { %7871 = vmatpush1.bf16.msra.mxu0 %v11122_v14 }
 0x67c   : > { %7912 = vmatpush1.bf16.msra.mxu1 %v11125_v45  ;;  %7872 = vmatprep.subr.bf16.mxu0 %v11130_v1 }
 0x67d   : > { %7913 = vmatprep.subr.bf16.mxu1 %v11133_v19 }
 0x67f   : > { %7873 = vmatpush1.bf16.msra.mxu0 %v11128_v54 }
 0x680   : > { %7914 = vmatpush1.bf16.msra.mxu1 %v11131_v10  ;;  %9527 = vmatprep.subr.msk.bf16.mxu0 %vm3885_vm3, %v9524_v20 }
 0x681   : > { %9529 = vmatprep.subr.msk.bf16.mxu1 %vm3885_vm3, %v9526_v8 }
 0x683   : > { %7875 = vmatpush1.bf16.msra.mxu0 %v7839_v9 }
 0x684   : > { %7916 = vmatpush1.bf16.msra.mxu1 %v7845_v32  ;;  %9577 = vmatprep.subr.bf16.mxu0 %v11138_v28 }
 0x685   : > { %9599 = vmatprep.subr.bf16.mxu1 %v11139_v31 }
 0x686   : > { %7883 = vmatmul.mubr.bf16.vlgmr.msra.gmra.mrb[76].mxu0 %v7582_v27 }
 0x687   : > { %7924 = vmatmul.mubr.bf16.vlgmr.msra.gmra.mrb[84].mxu1 %v7582_v27  ;;  %9578 = vmatpush3.bf16.msra.mxu0 %v11140_v55 }
 0x688   : > { %9600 = vmatpush3.bf16.msra.mxu1 %v11141_v42  ;;  %9579 = vmatprep.subr.bf16.mxu0 %v11142_v30 }
 0x689   : > { %9601 = vmatprep.subr.bf16.mxu1 %v11143_v39  ;;  %v7936_v39 = vld [vmem:[#allocation11] sm:$0xf] }
 0x68b   : > { %9580 = vmatpush3.bf16.msra.mxu0 %v11144_v43  ;;  %v7948_v43 = vsub.s32 2, %v12518_v40 }
 0x68c   : > { %9602 = vmatpush3.bf16.msra.mxu1 %v11145_v35  ;;  %9581 = vmatprep.subr.bf16.mxu0 %v11146_v51  ;;  %v7952_v35 = vsub.s32 3, %v12518_v40  ;;  %v7941_v51 = vrot.slane %v7936_v39, %v12528_v47 }
 0x68d   : > { %9603 = vmatprep.subr.bf16.mxu1 %v11147_v60 }
 0x68f   : > { %9582 = vmatpush3.bf16.msra.mxu0 %v11148_v56  ;;  %v7949_v56 = vrot.slane %v7936_v39, %v7948_v43 }
 0x690   : > { %9604 = vmatpush3.bf16.msra.mxu1 %v11149_v50  ;;  %9583 = vmatprep.subr.bf16.mxu0 %v11150_v36  ;;  %v7945_v50 = vrot.slane %v7936_v39, %v12534_v52 }
 0x691   : > { %9605 = vmatprep.subr.bf16.mxu1 %v11151_v16 }
 0x693   : > { %9584 = vmatpush3.bf16.msra.mxu0 %v11152_v57 }
 0x694   : > { %9606 = vmatpush3.bf16.msra.mxu1 %v11153_v53  ;;  %9585 = vmatprep.subr.bf16.mxu0 %v11154_v58  ;;  %v7953_v53 = vrot.slane %v7936_v39, %v7952_v35 }
 0x695   : > { %9607 = vmatprep.subr.bf16.mxu1 %v11155_v4 }
 0x697   : > { %9586 = vmatpush3.bf16.msra.mxu0 %v11156_v38 }
 0x698   : > { %9608 = vmatpush3.bf16.msra.mxu1 %v11157_v59  ;;  %9587 = vmatprep.subr.bf16.mxu0 %v11158_v44 }
 0x699   : > { %9609 = vmatprep.subr.bf16.mxu1 %v11159_v25 }
 0x69b   : > { %9588 = vmatpush3.bf16.msra.mxu0 %v11160_v46 }
 0x69c   : > { %9610 = vmatpush3.bf16.msra.mxu1 %v11161_v62  ;;  %9589 = vmatprep.subr.bf16.mxu0 %v11162_v12  ;;  %v11173_v12 = vld [vmem:[#allocation16 + $0x18] sm:$0xff]  }
 0x69d   : > { %9611 = vmatprep.subr.bf16.mxu1 %v11163_v63  ;;  %v11174_v63 = vld [vmem:[#allocation16 + $0x20] sm:$0xff]  }
 0x69f   : > { %9590 = vmatpush3.bf16.msra.mxu0 %v11164_v3  ;;  %v11175_v3 = vld [vmem:[#allocation16 + $0x28] sm:$0xff]  }
 0x6a0   : > { %9612 = vmatpush3.bf16.msra.mxu1 %v11165_v22  ;;  %9591 = vmatprep.subr.bf16.mxu0 %v11166_v0  ;;  %v11176_v22 = vld [vmem:[#allocation16 + $0x30] sm:$0xff]   ;;  %v11177_v0 = vld [vmem:[#allocation16 + $0x38] sm:$0xff]  }
 0x6a1   : > { %9613 = vmatprep.subr.bf16.mxu1 %v11167_v41 }
 0x6a3   : > { %9592 = vmatpush3.bf16.msra.mxu0 %v11168_v15 }
 0x6a4   : > { %9614 = vmatpush3.bf16.msra.mxu1 %v11169_v29  ;;  %9630 = vmatprep.subr.bf16.mxu0 %v11563_v48  ;;  %v9531_v29 = vld [vmem:[#allocation14] ss:$0 sm:$0xff] }
 0x6bd   : > { %v6834_v61 = vpop.f32.mrb[64].mxu0  ;;  %v6875_v2 = vpop.f32.mrb[72].mxu1 }
 0x6be   : > { %v6836_v6 = vpop.f32.mrb[65].mxu0  ;;  %v6877_v34 = vpop.f32.mrb[73].mxu1 }
 0x6bf   : > { %v6838_v11 = vpop.f32.mrb[66].mxu0  ;;  %v6879_v37 = vpop.f32.mrb[74].mxu1 }
 0x6c0   : > { %v6839_v24 = vpop.f32.mrb[67].mxu0  ;;  %v6880_v13 = vpop.f32.mrb[75].mxu1 }
 0x6c1   : > { %v11171_v24 = vld [vmem:[#allocation16 + $0x8] sm:$0xff]   ;;  %v11172_v13 = vld [vmem:[#allocation16 + $0x10] sm:$0xff]  }
 0x6f1   : > { %v7181_v26 = vpop.f32.mrb[68].mxu0  ;;  %v7222_v5 = vpop.f32.mrb[76].mxu1 }
 0x6f2   : > { %v7182_v18 = vadd.f32 %v7181_v26, %v6834_v61  ;;  %v7223_v33 = vadd.f32 %v7222_v5, %v6875_v2  ;;  %v7183_v14 = vpop.f32.mrb[69].mxu0  ;;  %v7224_v45 = vpop.f32.mrb[77].mxu1 }
 0x6f3   : > { %v7184_v1 = vadd.f32 %v7183_v14, %v6836_v6  ;;  %v7225_v19 = vadd.f32 %v7224_v45, %v6877_v34  ;;  %v7185_v21 = vpop.f32.mrb[70].mxu0  ;;  %v7226_v7 = vpop.f32.mrb[78].mxu1  ;;  %v11170_v6 = vld [vmem:[#allocation16] sm:$0xff]  }
 0x6f4   : > { %v7186_v54 = vpop.f32.mrb[71].mxu0  ;;  %v7227_v10 = vpop.f32.mrb[79].mxu1 }
 0x6f5   : > { %v8429_v10 = vand.u32 127, %v2681_v49 }
 0x6f7   : > { %vm8430_vm6 = vcmp.lt.s32.totalorder %v8429_v10, 10 }
 0x725   : > { %v7528_v20 = vpop.f32.mrb[72].mxu0 }
 0x726   : > { %v7576_v17 = vadd.f32 %v7528_v20, %v7182_v18  ;;  %v7569_v8 = vpop.f32.mrb[80].mxu1  ;;  %v7530_v23 = vpop.f32.mrb[73].mxu0  ;;  %v9564_v20 = vld [vmem:[#allocation17] ss:$0 sm:$0xff] }
 0x727   : > { %v7578_v9 = vadd.f32 %v7569_v8, %v7223_v33  ;;  %v7577_v32 = vadd.f32 %v7530_v23, %v7184_v1  ;;  %v7571_v27 = vpop.f32.mrb[81].mxu1  ;;  %v7532_v28 = vpop.f32.mrb[74].mxu0 }
 0x728   : > { %v7579_v31 = vadd.f32 %v7571_v27, %v7225_v19  ;;  %v7573_v55 = vpop.f32.mrb[82].mxu1  ;;  %v7533_v42 = vpop.f32.mrb[75].mxu0 }
 0x729   : > { %v7574_v30 = vpop.f32.mrb[83].mxu1 }
 0x759   : > { %v7884_v60 = vpop.f32.mrb[76].mxu0 }
 0x75a   : > { %v7932_v36 = vadd.f32 %v7884_v60, %v7576_v17  ;;  %v7925_v16 = vpop.f32.mrb[84].mxu1  ;;  %v7886_v57 = vpop.f32.mrb[77].mxu0 }
 0x75b   : > { %v7934_v58 = vadd.f32 %v7925_v16, %v7578_v9  ;;  %v7933_v4 = vadd.f32 %v7886_v57, %v7577_v32  ;;  %v7927_v38 = vpop.f32.mrb[85].mxu1  ;;  %v7888_v59 = vpop.f32.mrb[78].mxu0 }
 0x75c   : > { %v7958_v40 = vadd.f32 %v7941_v51, %v7932_v36  ;;  %v7935_v44 = vadd.f32 %v7927_v38, %v7579_v31  ;;  %v7929_v25 = vpop.f32.mrb[86].mxu1  ;;  %v7889_v47 = vpop.f32.mrb[79].mxu0 }
 0x75d   : > { %v7960_v46 = vadd.f32 %v7949_v56, %v7934_v58  ;;  %v7959_v62 = vadd.f32 %v7945_v50, %v7933_v4  ;;  %v7930_v61 = vpop.f32.mrb[87].mxu1 }
 0x75e   : > { %7962 = vst [vmem:[%s806_s12] sm:$0xff] %v7958_v40  ;;  %v7961_v52 = vadd.f32 %v7953_v53, %v7935_v44  ;;  %v7966_v34 = vpack.c.bf16 %v7958_v40, %v7958_v40 }
 0x75f   : > { %7964 = vst [vmem:[%s806_s12 + $0x10] sm:$0xff] %v7960_v46  ;;  %7963 = vst [vmem:[%s806_s12 + $0x8] sm:$0xff] %v7959_v62  ;;  %v7967_v2 = vpack.c.bf16 %v7959_v62, %v7959_v62  ;;  %v7968_v37 = vpack.c.bf16 %v7960_v46, %v7960_v46 }
 0x760   : > { %7965 = vst [vmem:[%s806_s12 + $0x18] sm:$0xff] %v7961_v52  ;;  %v7969_v11 = vpack.c.bf16 %v7961_v52, %v7961_v52 }
 0x761   : > { %8265 = vmatprep.mubr.bf16.mxu0 %v7967_v2 }
 0x762   : > { %8305 = vmatprep.mubr.bf16.mxu1 %v7969_v11  ;;  %8266 = vmatmul.mubr.bf16.vlgmr.msra.gmra.mrb[80].mxu0 %v7966_v34 }
 0x763   : > { %8306 = vmatmul.mubr.bf16.vlgmr.msra.gmra.mrb[88].mxu1 %v7968_v37  ;;  %9631 = vmatpush3.bf16.msra.mxu0 %v11170_v6 }
 0x764   : > { %9632 = vmatprep.subr.bf16.mxu0 %v11563_v48  ;;  %9646 = vmatprep.mubr.msk.bf16.mxu0 %vm11564_vm5, %v11563_v48 }
 0x767   : > { %9633 = vmatpush3.bf16.msra.mxu0 %v11171_v24 }
 0x768   : > { %9634 = vmatprep.subr.bf16.mxu0 %v11563_v48 }
 0x76b   : > { %9635 = vmatpush3.bf16.msra.mxu0 %v11172_v13 }
 0x76c   : > { %9636 = vmatprep.subr.bf16.mxu0 %v11563_v48 }
 0x76f   : > { %9637 = vmatpush3.bf16.msra.mxu0 %v11173_v12 }
 0x770   : > { %9638 = vmatprep.subr.bf16.mxu0 %v11563_v48 }
 0x773   : > { %9639 = vmatpush3.bf16.msra.mxu0 %v11174_v63 }
 0x774   : > { %9640 = vmatprep.subr.bf16.mxu0 %v11563_v48 }
 0x777   : > { %9641 = vmatpush3.bf16.msra.mxu0 %v11175_v3 }
 0x778   : > { %9642 = vmatprep.subr.bf16.mxu0 %v11563_v48 }
 0x77b   : > { %9643 = vmatpush3.bf16.msra.mxu0 %v11176_v22 }
 0x77c   : > { %9644 = vmatprep.subr.bf16.mxu0 %v11563_v48 }
 0x77f   : > { %9645 = vmatpush3.bf16.msra.mxu0 %v11177_v0 }
 0x835   : > { %v9593_v41 = vpop.f32.mrb[80].mxu0 }
 0x836   : > { %v9615_v15 = vpop.f32.mrb[88].mxu1  ;;  %v9594_v26 = vpop.f32.mrb[81].mxu0 }
 0x837   : > { %v9595_v5 = vadd.f32 %v9594_v26, %v9593_v41  ;;  %v9616_v18 = vpop.f32.mrb[89].mxu1  ;;  %v9596_v33 = vpop.f32.mrb[82].mxu0 }
 0x838   : > { %v9617_v14 = vadd.f32 %v9616_v18, %v9615_v15  ;;  %v9618_v45 = vpop.f32.mrb[90].mxu1  ;;  %v9597_v1 = vpop.f32.mrb[83].mxu0 }
 0x839   : > { %v8268_v19 = vadd.f32 %v9595_v5, %v9531_v29  ;;  %v9619_v21 = vpop.f32.mrb[91].mxu1 }
 0x83b   : > { %v8308_v7 = vadd.f32 %v9617_v14, %v8268_v19 }
 0x83d   : > { %v8313_v48 = vmax.f32 %v8308_v7, 0.0 }
 0x83f   : > { %8314 = vst [vmem:[%s810_s23] sm:$0xff] %v8313_v48  ;;  %v8315_v54 = vpack.c.bf16 %v8313_v48, %v8313_v48 }
 0x841   : > { %9647 = vmatmul.mubr.bf16.vlgmr.msra.gmra.mrb[84].mxu0 %v8315_v54 }
 0x914   : > { %v8421_v17 = vpop.f32.mrb[84].mxu0 }
 0x915   : > { %v8422_v8 = vadd.f32 %v9564_v20, %v8421_v17  ;;  %v9648_v23 = vpop.f32.mrb[85].mxu0 }
 0x916   : > { %v8424_v9 = vpop.f32.mrb[86].mxu0 }
 0x917   : > { %8427 = vst [vmem:[%s814_s21] sm:$0xff] %v8422_v8  ;;  %v9649_v32 = vpop.f32.mrb[87].mxu0  ;;  %v8431_v27 = vsel %vm8430_vm6, %v8422_v8, -inf }
 0x918   : > { %8432 = vmax.xlane.f32.xlu0 %v8431_v27 }
 0x9a5   : > { %v8433_v28 = vpop.xlane.xlu0 %8432 }
 0x9a6   : > { %v8434_v31 = vsub.f32 %v8431_v27, %v8433_v28 }
 0x9a8   : > { %v8435_v49 = vmul.f32 1.442695, %v8434_v31 }
 0x9aa   : > { %11178 = vpow2.f32 %v8435_v49 }
 0x9b4   : > { %v11179_v55 = vpop.eup %11178 }
 0x9b5   : > { %v8437_v42 = vsel %vm8430_vm6, %v11179_v55, 0.0 }
 0x9b6   : > { %8438 = vadd.xlane.f32.xlu0 %v8437_v42 }
 0xa43   : > { %v8439_v30 = vpop.xlane.xlu0 %8438 }
 0xa44   : > { %11180 = vrcp.f32 %v8439_v30 }
 0xa45   : > { %11182 = vlog2.f32 %v8439_v30 }
 0xa4e   : > { %v11181_v39 = vpop.eup %11180 }
 0xa4f   : > { %v11183_v43 = vpop.eup %11182  ;;  %v8441_v35 = vmul.f32 %v11181_v39, %v8437_v42 }
 0xa50   : > { %v8444_v51 = vmul.f32 0.6931472, %v11183_v43 }
 0xa51   : > { %8442 = vst [vmem:[%s818_s29] sm:$0xff] %v8441_v35 }
 0xa52   : > { %v8445_v60 = vsub.f32 %v8434_v31, %v8444_v51 }
 0xa54   : > { %v8446_v56 = vsel %vm8430_vm6, %v8445_v60, 0.0 }
 0xa55   : > { %8447 = vst [vmem:[%s822_s6] sm:$0xff] %v8446_v56 }
 0xa56 PF: > { %s12955_s20 = sld [smem:[#allocation25_spill]]  ;;  %s12956_s25 = sld [smem:[#allocation26_spill]] }
 0xa57   : > { %s12957_s18 = smov %s11542_s19 }
 0xa5c   : > { %p29_p9 = scmp.ge.s32.totalorder %s12955_s20, 4   ;;  %s12958_s19 = smov %s12956_s25 }
 0xa5e   :  { %31 = sbr.rel (!%p29_p9) target bundleno = 17 (0x11), region = 229 }
 0xa65   :  { %8525 = vsyncpa [#allocation4], 1 }
 0xa66   :  { %8527 = vsyncpa [#allocation4 + $0x1], 1 }
 0xa67   :  { %8528 = vsyncpa [#allocation6], 1 }
 0xa68   :  { %8529 = vsyncpa [#allocation9], 1 }
 0xa69   :  { %8530 = vsyncpa [#allocation12], 1 }
 0xa6a   :  { %8531 = vsyncpa [#allocation15], 1 }
 0xa6b   :  { %8532 = vsyncpa [#allocation18], 1 }

</bundles_post_ra>
